<compile_context>
chip_gen: v7x
topology: tpu7x:2x2x1
jax: 0.10.0
libtpu: 0.0.40
codegen_flags: <defaults>
</compile_context>

<pallas_src>
import functools
import math

import jax
import jax.numpy as jnp
from jax.experimental import pallas as pl
from jax.experimental.pallas import tpu as pltpu  # TPU-specific hooks (unused at toy size)

D_MODEL = 32
NHEAD = 4
DIM_FF = 64
NUM_LAYERS = 2
EPS = 1e-5

# -- layout of the packed (., 1, D) vector slab ("dvec") -----------------------
_DV_STRIDE = 13                       # rows per layer
_DV_SA_QB, _DV_SA_VB, _DV_SA_OB = 0, 1, 2     # self-attn q(scaled)/v/out biases
_DV_CA_QB, _DV_CA_VB, _DV_CA_OB = 3, 4, 5     # cross-attn q(scaled)/v/out biases
_DV_B2 = 6                                     # FFN linear2 bias
_DV_LN1W, _DV_LN1B = 7, 8
_DV_LN2W, _DV_LN2B = 9, 10
_DV_LN3W, _DV_LN3B = 11, 12
# rows 13*L and 13*L+1 hold the final decoder-norm weight / bias


# ---------------------------------------------------------------------------
# in-kernel helpers (pure jnp, traced inside the Pallas kernel body)
# ---------------------------------------------------------------------------
def _layer_norm(x, w, b):
    mu = jnp.mean(x, axis=-1, keepdims=True)
    var = jnp.mean(jnp.square(x - mu), axis=-1, keepdims=True)
    return (x - mu) * jax.lax.rsqrt(var + EPS) * w + b


def _mha(q_in, k_in, v_in, aw_ref, base, b_q, b_v, b_o,
         *, nhead, batch, t_q, t_k):
    """nn.MultiheadAttention semantics on batch-folded (B*T, D) slabs.

    Weights are pre-transposed to (in, out); aw_ref[base + {0,1,2,3}] are the
    q/k/v/out projection matrices.  1/sqrt(hd) is folded into the Q weight and
    bias; the K bias is folded out (softmax is invariant to it).
    """
    d = q_in.shape[-1]
    hd = d // nhead

    # full-width projections over the whole folded batch (max sublane occupancy)
    q = jnp.dot(q_in, aw_ref[base + 0], preferred_element_type=jnp.float32) + b_q
    k = jnp.dot(k_in, aw_ref[base + 1], preferred_element_type=jnp.float32)
    v = jnp.dot(v_in, aw_ref[base + 2], preferred_element_type=jnp.float32) + b_v
    w_o = aw_ref[base + 3]                                   # (D, D)

    outs = []
    for b in range(batch):                                   # static unroll
        qb = q[b * t_q:(b + 1) * t_q]                        # sublane-aligned slices
        kb = k[b * t_k:(b + 1) * t_k]
        vb = v[b * t_k:(b + 1) * t_k]
        acc = None
        for h in range(nhead):                               # static unroll
            sl = slice(h * hd, (h + 1) * hd)
            # scores: contract last dims (Q @ K^T without an explicit transpose)
            s = jax.lax.dot_general(qb[:, sl], kb[:, sl],
                                    (((1,), (1,)), ((), ())),
                                    preferred_element_type=jnp.float32)  # (t_q, t_k)
            s = s - jnp.max(s, axis=-1, keepdims=True)
            p = jnp.exp(s)
            p = p * pl.reciprocal(jnp.sum(p, axis=-1, keepdims=True), approx=True)
            oh = jnp.dot(p, vb[:, sl], preferred_element_type=jnp.float32)  # (t_q, hd)
            # accumulate straight into the output projection via a
            # sublane-aligned row slice of W_out (no head concat).
            contrib = jnp.dot(oh, w_o[sl, :], preferred_element_type=jnp.float32)
            acc = contrib if acc is None else acc + contrib
        outs.append(acc)
    out = outs[0] if batch == 1 else jnp.concatenate(outs, axis=0)   # (B*t_q, D)
    return out + b_o


# ---------------------------------------------------------------------------
# fused Pallas kernel: all decoder layers + final LayerNorm, whole batch
# ---------------------------------------------------------------------------
def fused_decoder_kernel(tgt_ref, mem_ref, qpos_ref, pos_ref,
                         aw_ref, w1_ref, w2_ref, dv_ref, fv_ref, out_ref,
                         *, nhead, num_layers, batch, t_len, s_len):
    x = tgt_ref[...]                        # (B*T, D)
    mem = mem_ref[...]                      # (B*S, D)
    qpos = qpos_ref[...]                    # (B*T, D)
    kv_cross = mem + pos_ref[...]           # (B*S, D); identical for every layer

    for l in range(num_layers):             # static unroll over layers
        aw0 = l * 8                         # 8 (D, D) attention slabs per layer
        dv0 = l * _DV_STRIDE

        # --- self attention (q = k = x + query_pos, v = x), post-norm ---
        qk = x + qpos
        sa = _mha(qk, qk, x, aw_ref, aw0,
                  dv_ref[dv0 + _DV_SA_QB], dv_ref[dv0 + _DV_SA_VB],
                  dv_ref[dv0 + _DV_SA_OB],
                  nhead=nhead, batch=batch, t_q=t_len, t_k=t_len)
        x = _layer_norm(x + sa, dv_ref[dv0 + _DV_LN1W], dv_ref[dv0 + _DV_LN1B])

        # --- cross attention (q = x + query_pos, k = memory + pos, v = memory) ---
        ca = _mha(x + qpos, kv_cross, mem, aw_ref, aw0 + 4,
                  dv_ref[dv0 + _DV_CA_QB], dv_ref[dv0 + _DV_CA_VB],
                  dv_ref[dv0 + _DV_CA_OB],
                  nhead=nhead, batch=batch, t_q=t_len, t_k=s_len)
        x = _layer_norm(x + ca, dv_ref[dv0 + _DV_LN2W], dv_ref[dv0 + _DV_LN2B])

        # --- feed forward ---
        h = jnp.maximum(
            jnp.dot(x, w1_ref[l], preferred_element_type=jnp.float32) + fv_ref[l],
            0.0)
        f = (jnp.dot(h, w2_ref[l], preferred_element_type=jnp.float32)
             + dv_ref[dv0 + _DV_B2])
        x = _layer_norm(x + f, dv_ref[dv0 + _DV_LN3W], dv_ref[dv0 + _DV_LN3B])

    # final decoder norm (self.norm) — fused into the same kernel
    x = _layer_norm(x, dv_ref[num_layers * _DV_STRIDE],
                    dv_ref[num_layers * _DV_STRIDE + 1])
    out_ref[...] = x                        # single coarse (B*T, D) store


# ---------------------------------------------------------------------------
# wrapper
# ---------------------------------------------------------------------------
def _cost_estimate(B, T, S, D, FF, L, packed):
    per_layer = (4 * 2 * T * D * D            # self-attn q/k/v/out projections
                 + 2 * 2 * T * T * D          # self-attn scores + attn@V
                 + 2 * 2 * T * D * D          # cross-attn q + out projections
                 + 2 * 2 * S * D * D          # cross-attn k/v projections
                 + 2 * 2 * T * S * D          # cross-attn scores + attn@V
                 + 2 * 2 * T * D * FF)        # FFN linear1 + linear2
    flops = B * L * per_layer
    transcendentals = B * (L * (T * T + T * S)      # softmax exp
                           + (3 * L + 1) * T)       # layernorm rsqrt
    act_bytes = 4 * (3 * B * T * D + 2 * B * S * D)
    w_bytes = 4 * sum(int(v.size) for v in packed.values())
    return pl.CostEstimate(flops=flops, transcendentals=transcendentals,
                           bytes_accessed=act_bytes + w_bytes)


@functools.partial(jax.jit, static_argnames=("nhead",))
def transformer_decoder(tgt, memory, pos, query_pos, packed, *, nhead):
    """tgt (T,B,D), memory (S,B,D), pos (S,B,D), query_pos (T,B,D) -> (1,T,B,D)."""
    T, B, D = tgt.shape
    S = memory.shape[0]
    FF = packed["w1"].shape[-1]
    num_layers = packed["w1"].shape[0]

    # batch-first and folded into the row axis (fuses into the jit-ed program)
    tgt_f = jnp.transpose(tgt, (1, 0, 2)).reshape(B * T, D)
    mem_f = jnp.transpose(memory, (1, 0, 2)).reshape(B * S, D)
    qpos_f = jnp.transpose(query_pos, (1, 0, 2)).reshape(B * T, D)
    pos_f = jnp.transpose(pos, (1, 0, 2)).reshape(B * S, D)

    # Single invocation (no grid): every operand becomes one full-array VMEM
    # block, so there is no per-grid-step overhead and no double buffering.
    out_f = pl.pallas_call(
        functools.partial(fused_decoder_kernel, nhead=nhead,
                          num_layers=num_layers, batch=B, t_len=T, s_len=S),
        out_shape=jax.ShapeDtypeStruct((B * T, D), jnp.float32),
        cost_estimate=_cost_estimate(B, T, S, D, FF, num_layers, packed),
    )(tgt_f, mem_f, qpos_f, pos_f,
      packed["aw"], packed["w1"], packed["w2"], packed["dvec"], packed["fvec"])

    return jnp.transpose(out_f.reshape(B, T, D), (1, 0, 2))[None]   # (1, T, B, D)


# ---------------------------------------------------------------------------
# parameter packing: PyTorch layout -> stacked, pre-transposed kernel slabs
# ---------------------------------------------------------------------------
def pack_params(layers, norm_w, norm_b, nhead):
    d = norm_w.shape[0]
    scale = 1.0 / math.sqrt(d // nhead)
    aw, w1, w2, dvec, fvec = [], [], [], [], []
    for p in layers:
        # attention projection matrices, (in, out) layout; scale folded into Q
        for a in ("sa", "ca"):
            w_in = p[f"{a}_in_w"]                       # (3D, D)
            aw.append(w_in[:d].T * scale)               # Q (scaled)
            aw.append(w_in[d:2 * d].T)                  # K
            aw.append(w_in[2 * d:].T)                   # V
            aw.append(p[f"{a}_out_w"].T)                # out projection
        w1.append(p["lin1_w"].T)                        # (D, FF)
        w2.append(p["lin2_w"].T)                        # (FF, D)
        fvec.append(p["lin1_b"][None])                  # (1, FF)
        # D-wide vector slab rows (K bias folded out entirely)
        for a in ("sa", "ca"):
            b_in = p[f"{a}_in_b"]                       # (3D,)
            dvec.append((b_in[:d] * scale)[None])       # scaled Q bias
            dvec.append(b_in[2 * d:][None])             # V bias
            dvec.append(p[f"{a}_out_b"][None])          # out bias
        dvec.append(p["lin2_b"][None])                  # FFN linear2 bias
        for k in (1, 2, 3):
            dvec.append(p[f"ln{k}_w"][None])
            dvec.append(p[f"ln{k}_b"][None])
    dvec.append(norm_w[None])                           # final decoder norm
    dvec.append(norm_b[None])
    return dict(aw=jnp.stack(aw),                       # (8L, D, D)
                w1=jnp.stack(w1),                       # (L, D, FF)
                w2=jnp.stack(w2),                       # (L, FF, D)
                dvec=jnp.stack(dvec),                   # (13L+2, 1, D)
                fvec=jnp.stack(fvec))                   # (L, 1, FF)


# ---------------------------------------------------------------------------
# pure-JAX reference (PyTorch TransformerDecoder semantics) for validation
# ---------------------------------------------------------------------------
def reference_decoder(tgt, memory, pos, query_pos, layers, norm_w, norm_b, nhead):
    def ln(x, w, b):
        mu = x.mean(-1, keepdims=True)
        var = ((x - mu) ** 2).mean(-1, keepdims=True)
        return (x - mu) / jnp.sqrt(var + EPS) * w + b

    def split_heads(x):                                 # (L,B,D) -> (B,H,L,hd)
        L, B, D = x.shape
        return x.reshape(L, B, nhead, D // nhead).transpose(1, 2, 0, 3)

    def mha(q_in, k_in, v_in, w_in, b_in, w_out, b_out):
        D = q_in.shape[-1]
        hd = D // nhead
        q = q_in @ w_in[:D].T + b_in[:D]
        k = k_in @ w_in[D:2 * D].T + b_in[D:2 * D]
        v = v_in @ w_in[2 * D:].T + b_in[2 * D:]
        qh, kh, vh = split_heads(q), split_heads(k), split_heads(v)
        s = jnp.einsum("bhqd,bhkd->bhqk", qh, kh) / math.sqrt(hd)
        p = jax.nn.softmax(s, axis=-1)
        o = jnp.einsum("bhqk,bhkd->bhqd", p, vh)
        o = o.transpose(2, 0, 1, 3).reshape(q_in.shape)
        return o @ w_out.T + b_out

    x = tgt
    for p in layers:
        qk = x + query_pos
        sa = mha(qk, qk, x, p["sa_in_w"], p["sa_in_b"], p["sa_out_w"], p["sa_out_b"])
        x = ln(x + sa, p["ln1_w"], p["ln1_b"])
        ca = mha(x + query_pos, memory + pos, memory,
                 p["ca_in_w"], p["ca_in_b"], p["ca_out_w"], p["ca_out_b"])
        x = ln(x + ca, p["ln2_w"], p["ln2_b"])
        h = jax.nn.relu(x @ p["lin1_w"].T + p["lin1_b"])
        f = h @ p["lin2_w"].T + p["lin2_b"]
        x = ln(x + f, p["ln3_w"], p["ln3_b"])
    x = ln(x, norm_w, norm_b)
    return x[None]


# ---------------------------------------------------------------------------
# deterministic synthetic parameters (PyTorch layout; no checkpoint load)
# ---------------------------------------------------------------------------
def init_params(key, d_model, dim_ff, num_layers):
    s = 0.02
    layers = []
    for _ in range(num_layers):
        key, *ks = jax.random.split(key, 13)
        n = lambda k, shape: jax.random.normal(k, shape, jnp.float32) * s
        layers.append(dict(
            sa_in_w=n(ks[0], (3 * d_model, d_model)),
            sa_in_b=n(ks[1], (3 * d_model,)),
            sa_out_w=n(ks[2], (d_model, d_model)),
            sa_out_b=n(ks[3], (d_model,)),
            ca_in_w=n(ks[4], (3 * d_model, d_model)),
            ca_in_b=n(ks[5], (3 * d_model,)),
            ca_out_w=n(ks[6], (d_model, d_model)),
            ca_out_b=n(ks[7], (d_model,)),
            lin1_w=n(ks[8], (dim_ff, d_model)),
            lin1_b=n(ks[9], (dim_ff,)),
            lin2_w=n(ks[10], (d_model, dim_ff)),
            lin2_b=n(ks[11], (d_model,)),
            ln1_w=jnp.ones((d_model,), jnp.float32), ln1_b=jnp.zeros((d_model,), jnp.float32),
            ln2_w=jnp.ones((d_model,), jnp.float32), ln2_b=jnp.zeros((d_model,), jnp.float32),
            ln3_w=jnp.ones((d_model,), jnp.float32), ln3_b=jnp.zeros((d_model,), jnp.float32),
        ))
    norm_w = jnp.ones((d_model,), jnp.float32)
    norm_b = jnp.zeros((d_model,), jnp.float32)
    return layers, norm_w, norm_b


if __name__ == "__main__":
    key = jax.random.PRNGKey(0)
    T, S, B, D = 8, 16, 2, D_MODEL    # queries, memory tokens, batch, d_model
    k1, k2, k3, k4, k5 = jax.random.split(key, 5)

    tgt = jax.random.normal(k1, (T, B, D), jnp.float32)
    memory = jax.random.normal(k2, (S, B, D), jnp.float32)
    pos = jax.random.normal(k3, (S, B, D), jnp.float32)
    query_pos = jax.random.normal(k4, (T, B, D), jnp.float32)

    layers, norm_w, norm_b = init_params(k5, D, DIM_FF, NUM_LAYERS)
    packed = pack_params(layers, norm_w, norm_b, NHEAD)

    out = transformer_decoder(tgt, memory, pos, query_pos, packed, nhead=NHEAD)
    out = jax.block_until_ready(out)

    assert out.shape == (1, T, B, D), out.shape
    assert bool(jnp.all(jnp.isfinite(out)))

    # numerical check against a pure-JAX PyTorch-semantics reference
    with jax.default_matmul_precision("highest"):
        ref = reference_decoder(tgt, memory, pos, query_pos,
                                layers, norm_w, norm_b, NHEAD)
    assert bool(jnp.allclose(out, ref, atol=1e-2, rtol=1e-2)), (
        float(jnp.max(jnp.abs(out - ref))))

    print("KERNEL_OK")
</pallas_src>

<mosaic_0001>
module attributes {stable_mosaic.version = 11 : i64} {
  func.func @fused_decoder_kernel(%arg0: memref<16x32xf32, #tpu.memory_space<vmem>>, %arg1: memref<32x32xf32, #tpu.memory_space<vmem>>, %arg2: memref<16x32xf32, #tpu.memory_space<vmem>>, %arg3: memref<32x32xf32, #tpu.memory_space<vmem>>, %arg4: memref<16x32x32xf32, #tpu.memory_space<vmem>>, %arg5: memref<2x32x64xf32, #tpu.memory_space<vmem>>, %arg6: memref<2x64x32xf32, #tpu.memory_space<vmem>>, %arg7: memref<28x1x32xf32, #tpu.memory_space<vmem>>, %arg8: memref<2x1x64xf32, #tpu.memory_space<vmem>>, %arg9: memref<16x32xf32, #tpu.memory_space<vmem>>) attributes {dimension_semantics = [], scalar_prefetch = 0 : i64, scratch_operands = 0 : i64, tpu.core_type = #tpu.core_type<tc>} {
    %c0 = arith.constant 0 : index
    %c0_0 = arith.constant 0 : index
    %0 = vector.load %arg0[%c0, %c0_0] : memref<16x32xf32, #tpu.memory_space<vmem>>, vector<16x32xf32>
    %c0_1 = arith.constant 0 : index
    %c0_2 = arith.constant 0 : index
    %1 = vector.load %arg1[%c0_1, %c0_2] : memref<32x32xf32, #tpu.memory_space<vmem>>, vector<32x32xf32>
    %c0_3 = arith.constant 0 : index
    %c0_4 = arith.constant 0 : index
    %2 = vector.load %arg2[%c0_3, %c0_4] : memref<16x32xf32, #tpu.memory_space<vmem>>, vector<16x32xf32>
    %c0_5 = arith.constant 0 : index
    %c0_6 = arith.constant 0 : index
    %3 = vector.load %arg3[%c0_5, %c0_6] : memref<32x32xf32, #tpu.memory_space<vmem>>, vector<32x32xf32>
    %4 = arith.addf %1, %3 : vector<32x32xf32>
    %5 = arith.addf %0, %2 : vector<16x32xf32>
    %c0_7 = arith.constant 0 : index
    %c0_8 = arith.constant 0 : index
    %c0_9 = arith.constant 0 : index
    %6 = vector.load %arg7[%c0_7, %c0_8, %c0_9] : memref<28x1x32xf32, #tpu.memory_space<vmem>>, vector<1x1x32xf32>
    %7 = vector.shape_cast %6 : vector<1x1x32xf32> to vector<1x32xf32>
    %c1 = arith.constant 1 : index
    %c0_10 = arith.constant 0 : index
    %c0_11 = arith.constant 0 : index
    %8 = vector.load %arg7[%c1, %c0_10, %c0_11] : memref<28x1x32xf32, #tpu.memory_space<vmem>>, vector<1x1x32xf32>
    %9 = vector.shape_cast %8 : vector<1x1x32xf32> to vector<1x32xf32>
    %c2 = arith.constant 2 : index
    %c0_12 = arith.constant 0 : index
    %c0_13 = arith.constant 0 : index
    %10 = vector.load %arg7[%c2, %c0_12, %c0_13] : memref<28x1x32xf32, #tpu.memory_space<vmem>>, vector<1x1x32xf32>
    %11 = vector.shape_cast %10 : vector<1x1x32xf32> to vector<1x32xf32>
    %c0_14 = arith.constant 0 : index
    %c0_15 = arith.constant 0 : index
    %c0_16 = arith.constant 0 : index
    %12 = vector.load %arg4[%c0_14, %c0_15, %c0_16] : memref<16x32x32xf32, #tpu.memory_space<vmem>>, vector<1x32x32xf32>
    %13 = vector.shape_cast %12 : vector<1x32x32xf32> to vector<32x32xf32>
    %cst = arith.constant dense<0.000000e+00> : vector<16x32xf32>
    %14 = tpu.matmul %5, %13, %cst {dimension_numbers = #tpu.dot_dimension_numbers<[1], [0], [0], [1], [0, 0, 1, 1], [], []>} : vector<16x32xf32>, vector<32x32xf32>, vector<16x32xf32> -> vector<16x32xf32>
    %15 = vector.broadcast %7 : vector<1x32xf32> to vector<16x32xf32>
    %16 = arith.addf %14, %15 : vector<16x32xf32>
    %c1_17 = arith.constant 1 : index
    %c0_18 = arith.constant 0 : index
    %c0_19 = arith.constant 0 : index
    %17 = vector.load %arg4[%c1_17, %c0_18, %c0_19] : memref<16x32x32xf32, #tpu.memory_space<vmem>>, vector<1x32x32xf32>
    %18 = vector.shape_cast %17 : vector<1x32x32xf32> to vector<32x32xf32>
    %cst_20 = arith.constant dense<0.000000e+00> : vector<16x32xf32>
    %19 = tpu.matmul %5, %18, %cst_20 {dimension_numbers = #tpu.dot_dimension_numbers<[1], [0], [0], [1], [0, 0, 1, 1], [], []>} : vector<16x32xf32>, vector<32x32xf32>, vector<16x32xf32> -> vector<16x32xf32>
    %c2_21 = arith.constant 2 : index
    %c0_22 = arith.constant 0 : index
    %c0_23 = arith.constant 0 : index
    %20 = vector.load %arg4[%c2_21, %c0_22, %c0_23] : memref<16x32x32xf32, #tpu.memory_space<vmem>>, vector<1x32x32xf32>
    %21 = vector.shape_cast %20 : vector<1x32x32xf32> to vector<32x32xf32>
    %cst_24 = arith.constant dense<0.000000e+00> : vector<16x32xf32>
    %22 = tpu.matmul %0, %21, %cst_24 {dimension_numbers = #tpu.dot_dimension_numbers<[1], [0], [0], [1], [0, 0, 1, 1], [], []>} : vector<16x32xf32>, vector<32x32xf32>, vector<16x32xf32> -> vector<16x32xf32>
    %23 = vector.broadcast %9 : vector<1x32xf32> to vector<16x32xf32>
    %24 = arith.addf %22, %23 : vector<16x32xf32>
    %c3 = arith.constant 3 : index
    %c0_25 = arith.constant 0 : index
    %c0_26 = arith.constant 0 : index
    %25 = vector.load %arg4[%c3, %c0_25, %c0_26] : memref<16x32x32xf32, #tpu.memory_space<vmem>>, vector<1x32x32xf32>
    %26 = vector.shape_cast %25 : vector<1x32x32xf32> to vector<32x32xf32>
    %27 = vector.extract_strided_slice %16 {offsets = [0, 0], sizes = [8, 32], strides = [1, 1]} : vector<16x32xf32> to vector<8x32xf32>
    %28 = vector.extract_strided_slice %19 {offsets = [0, 0], sizes = [8, 32], strides = [1, 1]} : vector<16x32xf32> to vector<8x32xf32>
    %29 = vector.extract_strided_slice %24 {offsets = [0, 0], sizes = [8, 32], strides = [1, 1]} : vector<16x32xf32> to vector<8x32xf32>
    %30 = vector.extract_strided_slice %27 {offsets = [0, 0], sizes = [8, 8], strides = [1, 1]} : vector<8x32xf32> to vector<8x8xf32>
    %31 = vector.extract_strided_slice %28 {offsets = [0, 0], sizes = [8, 8], strides = [1, 1]} : vector<8x32xf32> to vector<8x8xf32>
    %cst_27 = arith.constant dense<0.000000e+00> : vector<8x8xf32>
    %32 = tpu.matmul %30, %31, %cst_27 {dimension_numbers = #tpu.dot_dimension_numbers<[1], [1], [0], [0], [0, 0, 1, 0], [], []>} : vector<8x8xf32>, vector<8x8xf32>, vector<8x8xf32> -> vector<8x8xf32>
    %cst_28 = arith.constant dense<0xFF800000> : vector<8xf32>
    %33 = vector.multi_reduction <maximumf>, %32, %cst_28 [1] : vector<8x8xf32> to vector<8xf32>
    %34 = vector.shape_cast %33 : vector<8xf32> to vector<8x1xf32>
    %35 = vector.broadcast %34 : vector<8x1xf32> to vector<8x8xf32>
    %36 = arith.subf %32, %35 : vector<8x8xf32>
    %37 = math.exp %36 : vector<8x8xf32>
    %cst_29 = arith.constant dense<0.000000e+00> : vector<8xf32>
    %38 = vector.multi_reduction <add>, %37, %cst_29 [1] : vector<8x8xf32> to vector<8xf32>
    %39 = vector.shape_cast %38 : vector<8xf32> to vector<8x1xf32>
    %40 = tpu.reciprocal %39 {approx = true} : vector<8x1xf32> -> vector<8x1xf32>
    %41 = vector.broadcast %40 : vector<8x1xf32> to vector<8x8xf32>
    %42 = arith.mulf %37, %41 : vector<8x8xf32>
    %43 = vector.extract_strided_slice %29 {offsets = [0, 0], sizes = [8, 8], strides = [1, 1]} : vector<8x32xf32> to vector<8x8xf32>
    %cst_30 = arith.constant dense<0.000000e+00> : vector<8x8xf32>
    %44 = tpu.matmul %42, %43, %cst_30 {dimension_numbers = #tpu.dot_dimension_numbers<[1], [0], [0], [1], [0, 0, 1, 1], [], []>} : vector<8x8xf32>, vector<8x8xf32>, vector<8x8xf32> -> vector<8x8xf32>
    %45 = vector.extract_strided_slice %26 {offsets = [0, 0], sizes = [8, 32], strides = [1, 1]} : vector<32x32xf32> to vector<8x32xf32>
    %cst_31 = arith.constant dense<0.000000e+00> : vector<8x32xf32>
    %46 = tpu.matmul %44, %45, %cst_31 {dimension_numbers = #tpu.dot_dimension_numbers<[1], [0], [0], [1], [0, 0, 1, 1], [], []>} : vector<8x8xf32>, vector<8x32xf32>, vector<8x32xf32> -> vector<8x32xf32>
    %47 = vector.extract_strided_slice %27 {offsets = [0, 8], sizes = [8, 8], strides = [1, 1]} : vector<8x32xf32> to vector<8x8xf32>
    %48 = vector.extract_strided_slice %28 {offsets = [0, 8], sizes = [8, 8], strides = [1, 1]} : vector<8x32xf32> to vector<8x8xf32>
    %cst_32 = arith.constant dense<0.000000e+00> : vector<8x8xf32>
    %49 = tpu.matmul %47, %48, %cst_32 {dimension_numbers = #tpu.dot_dimension_numbers<[1], [1], [0], [0], [0, 0, 1, 0], [], []>} : vector<8x8xf32>, vector<8x8xf32>, vector<8x8xf32> -> vector<8x8xf32>
    %cst_33 = arith.constant dense<0xFF800000> : vector<8xf32>
    %50 = vector.multi_reduction <maximumf>, %49, %cst_33 [1] : vector<8x8xf32> to vector<8xf32>
    %51 = vector.shape_cast %50 : vector<8xf32> to vector<8x1xf32>
    %52 = vector.broadcast %51 : vector<8x1xf32> to vector<8x8xf32>
    %53 = arith.subf %49, %52 : vector<8x8xf32>
    %54 = math.exp %53 : vector<8x8xf32>
    %cst_34 = arith.constant dense<0.000000e+00> : vector<8xf32>
    %55 = vector.multi_reduction <add>, %54, %cst_34 [1] : vector<8x8xf32> to vector<8xf32>
    %56 = vector.shape_cast %55 : vector<8xf32> to vector<8x1xf32>
    %57 = tpu.reciprocal %56 {approx = true} : vector<8x1xf32> -> vector<8x1xf32>
    %58 = vector.broadcast %57 : vector<8x1xf32> to vector<8x8xf32>
    %59 = arith.mulf %54, %58 : vector<8x8xf32>
    %60 = vector.extract_strided_slice %29 {offsets = [0, 8], sizes = [8, 8], strides = [1, 1]} : vector<8x32xf32> to vector<8x8xf32>
    %cst_35 = arith.constant dense<0.000000e+00> : vector<8x8xf32>
    %61 = tpu.matmul %59, %60, %cst_35 {dimension_numbers = #tpu.dot_dimension_numbers<[1], [0], [0], [1], [0, 0, 1, 1], [], []>} : vector<8x8xf32>, vector<8x8xf32>, vector<8x8xf32> -> vector<8x8xf32>
    %62 = vector.extract_strided_slice %26 {offsets = [8, 0], sizes = [8, 32], strides = [1, 1]} : vector<32x32xf32> to vector<8x32xf32>
    %cst_36 = arith.constant dense<0.000000e+00> : vector<8x32xf32>
    %63 = tpu.matmul %61, %62, %cst_36 {dimension_numbers = #tpu.dot_dimension_numbers<[1], [0], [0], [1], [0, 0, 1, 1], [], []>} : vector<8x8xf32>, vector<8x32xf32>, vector<8x32xf32> -> vector<8x32xf32>
    %64 = arith.addf %46, %63 : vector<8x32xf32>
    %65 = vector.extract_strided_slice %27 {offsets = [0, 16], sizes = [8, 8], strides = [1, 1]} : vector<8x32xf32> to vector<8x8xf32>
    %66 = vector.extract_strided_slice %28 {offsets = [0, 16], sizes = [8, 8], strides = [1, 1]} : vector<8x32xf32> to vector<8x8xf32>
    %cst_37 = arith.constant dense<0.000000e+00> : vector<8x8xf32>
    %67 = tpu.matmul %65, %66, %cst_37 {dimension_numbers = #tpu.dot_dimension_numbers<[1], [1], [0], [0], [0, 0, 1, 0], [], []>} : vector<8x8xf32>, vector<8x8xf32>, vector<8x8xf32> -> vector<8x8xf32>
    %cst_38 = arith.constant dense<0xFF800000> : vector<8xf32>
    %68 = vector.multi_reduction <maximumf>, %67, %cst_38 [1] : vector<8x8xf32> to vector<8xf32>
    %69 = vector.shape_cast %68 : vector<8xf32> to vector<8x1xf32>
    %70 = vector.broadcast %69 : vector<8x1xf32> to vector<8x8xf32>
    %71 = arith.subf %67, %70 : vector<8x8xf32>
    %72 = math.exp %71 : vector<8x8xf32>
    %cst_39 = arith.constant dense<0.000000e+00> : vector<8xf32>
    %73 = vector.multi_reduction <add>, %72, %cst_39 [1] : vector<8x8xf32> to vector<8xf32>
    %74 = vector.shape_cast %73 : vector<8xf32> to vector<8x1xf32>
    %75 = tpu.reciprocal %74 {approx = true} : vector<8x1xf32> -> vector<8x1xf32>
    %76 = vector.broadcast %75 : vector<8x1xf32> to vector<8x8xf32>
    %77 = arith.mulf %72, %76 : vector<8x8xf32>
    %78 = vector.extract_strided_slice %29 {offsets = [0, 16], sizes = [8, 8], strides = [1, 1]} : vector<8x32xf32> to vector<8x8xf32>
    %cst_40 = arith.constant dense<0.000000e+00> : vector<8x8xf32>
    %79 = tpu.matmul %77, %78, %cst_40 {dimension_numbers = #tpu.dot_dimension_numbers<[1], [0], [0], [1], [0, 0, 1, 1], [], []>} : vector<8x8xf32>, vector<8x8xf32>, vector<8x8xf32> -> vector<8x8xf32>
    %80 = vector.extract_strided_slice %26 {offsets = [16, 0], sizes = [8, 32], strides = [1, 1]} : vector<32x32xf32> to vector<8x32xf32>
    %cst_41 = arith.constant dense<0.000000e+00> : vector<8x32xf32>
    %81 = tpu.matmul %79, %80, %cst_41 {dimension_numbers = #tpu.dot_dimension_numbers<[1], [0], [0], [1], [0, 0, 1, 1], [], []>} : vector<8x8xf32>, vector<8x32xf32>, vector<8x32xf32> -> vector<8x32xf32>
    %82 = arith.addf %64, %81 : vector<8x32xf32>
    %83 = vector.extract_strided_slice %27 {offsets = [0, 24], sizes = [8, 8], strides = [1, 1]} : vector<8x32xf32> to vector<8x8xf32>
    %84 = vector.extract_strided_slice %28 {offsets = [0, 24], sizes = [8, 8], strides = [1, 1]} : vector<8x32xf32> to vector<8x8xf32>
    %cst_42 = arith.constant dense<0.000000e+00> : vector<8x8xf32>
    %85 = tpu.matmul %83, %84, %cst_42 {dimension_numbers = #tpu.dot_dimension_numbers<[1], [1], [0], [0], [0, 0, 1, 0], [], []>} : vector<8x8xf32>, vector<8x8xf32>, vector<8x8xf32> -> vector<8x8xf32>
    %cst_43 = arith.constant dense<0xFF800000> : vector<8xf32>
    %86 = vector.multi_reduction <maximumf>, %85, %cst_43 [1] : vector<8x8xf32> to vector<8xf32>
    %87 = vector.shape_cast %86 : vector<8xf32> to vector<8x1xf32>
    %88 = vector.broadcast %87 : vector<8x1xf32> to vector<8x8xf32>
    %89 = arith.subf %85, %88 : vector<8x8xf32>
    %90 = math.exp %89 : vector<8x8xf32>
    %cst_44 = arith.constant dense<0.000000e+00> : vector<8xf32>
    %91 = vector.multi_reduction <add>, %90, %cst_44 [1] : vector<8x8xf32> to vector<8xf32>
    %92 = vector.shape_cast %91 : vector<8xf32> to vector<8x1xf32>
    %93 = tpu.reciprocal %92 {approx = true} : vector<8x1xf32> -> vector<8x1xf32>
    %94 = vector.broadcast %93 : vector<8x1xf32> to vector<8x8xf32>
    %95 = arith.mulf %90, %94 : vector<8x8xf32>
    %96 = vector.extract_strided_slice %29 {offsets = [0, 24], sizes = [8, 8], strides = [1, 1]} : vector<8x32xf32> to vector<8x8xf32>
    %cst_45 = arith.constant dense<0.000000e+00> : vector<8x8xf32>
    %97 = tpu.matmul %95, %96, %cst_45 {dimension_numbers = #tpu.dot_dimension_numbers<[1], [0], [0], [1], [0, 0, 1, 1], [], []>} : vector<8x8xf32>, vector<8x8xf32>, vector<8x8xf32> -> vector<8x8xf32>
    %98 = vector.extract_strided_slice %26 {offsets = [24, 0], sizes = [8, 32], strides = [1, 1]} : vector<32x32xf32> to vector<8x32xf32>
    %cst_46 = arith.constant dense<0.000000e+00> : vector<8x32xf32>
    %99 = tpu.matmul %97, %98, %cst_46 {dimension_numbers = #tpu.dot_dimension_numbers<[1], [0], [0], [1], [0, 0, 1, 1], [], []>} : vector<8x8xf32>, vector<8x32xf32>, vector<8x32xf32> -> vector<8x32xf32>
    %100 = arith.addf %82, %99 : vector<8x32xf32>
    %101 = vector.extract_strided_slice %16 {offsets = [8, 0], sizes = [8, 32], strides = [1, 1]} : vector<16x32xf32> to vector<8x32xf32>
    %102 = vector.extract_strided_slice %19 {offsets = [8, 0], sizes = [8, 32], strides = [1, 1]} : vector<16x32xf32> to vector<8x32xf32>
    %103 = vector.extract_strided_slice %24 {offsets = [8, 0], sizes = [8, 32], strides = [1, 1]} : vector<16x32xf32> to vector<8x32xf32>
    %104 = vector.extract_strided_slice %101 {offsets = [0, 0], sizes = [8, 8], strides = [1, 1]} : vector<8x32xf32> to vector<8x8xf32>
    %105 = vector.extract_strided_slice %102 {offsets = [0, 0], sizes = [8, 8], strides = [1, 1]} : vector<8x32xf32> to vector<8x8xf32>
    %cst_47 = arith.constant dense<0.000000e+00> : vector<8x8xf32>
    %106 = tpu.matmul %104, %105, %cst_47 {dimension_numbers = #tpu.dot_dimension_numbers<[1], [1], [0], [0], [0, 0, 1, 0], [], []>} : vector<8x8xf32>, vector<8x8xf32>, vector<8x8xf32> -> vector<8x8xf32>
    %cst_48 = arith.constant dense<0xFF800000> : vector<8xf32>
    %107 = vector.multi_reduction <maximumf>, %106, %cst_48 [1] : vector<8x8xf32> to vector<8xf32>
    %108 = vector.shape_cast %107 : vector<8xf32> to vector<8x1xf32>
    %109 = vector.broadcast %108 : vector<8x1xf32> to vector<8x8xf32>
    %110 = arith.subf %106, %109 : vector<8x8xf32>
    %111 = math.exp %110 : vector<8x8xf32>
    %cst_49 = arith.constant dense<0.000000e+00> : vector<8xf32>
    %112 = vector.multi_reduction <add>, %111, %cst_49 [1] : vector<8x8xf32> to vector<8xf32>
    %113 = vector.shape_cast %112 : vector<8xf32> to vector<8x1xf32>
    %114 = tpu.reciprocal %113 {approx = true} : vector<8x1xf32> -> vector<8x1xf32>
    %115 = vector.broadcast %114 : vector<8x1xf32> to vector<8x8xf32>
    %116 = arith.mulf %111, %115 : vector<8x8xf32>
    %117 = vector.extract_strided_slice %103 {offsets = [0, 0], sizes = [8, 8], strides = [1, 1]} : vector<8x32xf32> to vector<8x8xf32>
    %cst_50 = arith.constant dense<0.000000e+00> : vector<8x8xf32>
    %118 = tpu.matmul %116, %117, %cst_50 {dimension_numbers = #tpu.dot_dimension_numbers<[1], [0], [0], [1], [0, 0, 1, 1], [], []>} : vector<8x8xf32>, vector<8x8xf32>, vector<8x8xf32> -> vector<8x8xf32>
    %119 = vector.extract_strided_slice %26 {offsets = [0, 0], sizes = [8, 32], strides = [1, 1]} : vector<32x32xf32> to vector<8x32xf32>
    %cst_51 = arith.constant dense<0.000000e+00> : vector<8x32xf32>
    %120 = tpu.matmul %118, %119, %cst_51 {dimension_numbers = #tpu.dot_dimension_numbers<[1], [0], [0], [1], [0, 0, 1, 1], [], []>} : vector<8x8xf32>, vector<8x32xf32>, vector<8x32xf32> -> vector<8x32xf32>
    %121 = vector.extract_strided_slice %101 {offsets = [0, 8], sizes = [8, 8], strides = [1, 1]} : vector<8x32xf32> to vector<8x8xf32>
    %122 = vector.extract_strided_slice %102 {offsets = [0, 8], sizes = [8, 8], strides = [1, 1]} : vector<8x32xf32> to vector<8x8xf32>
    %cst_52 = arith.constant dense<0.000000e+00> : vector<8x8xf32>
    %123 = tpu.matmul %121, %122, %cst_52 {dimension_numbers = #tpu.dot_dimension_numbers<[1], [1], [0], [0], [0, 0, 1, 0], [], []>} : vector<8x8xf32>, vector<8x8xf32>, vector<8x8xf32> -> vector<8x8xf32>
    %cst_53 = arith.constant dense<0xFF800000> : vector<8xf32>
    %124 = vector.multi_reduction <maximumf>, %123, %cst_53 [1] : vector<8x8xf32> to vector<8xf32>
    %125 = vector.shape_cast %124 : vector<8xf32> to vector<8x1xf32>
    %126 = vector.broadcast %125 : vector<8x1xf32> to vector<8x8xf32>
    %127 = arith.subf %123, %126 : vector<8x8xf32>
    %128 = math.exp %127 : vector<8x8xf32>
    %cst_54 = arith.constant dense<0.000000e+00> : vector<8xf32>
    %129 = vector.multi_reduction <add>, %128, %cst_54 [1] : vector<8x8xf32> to vector<8xf32>
    %130 = vector.shape_cast %129 : vector<8xf32> to vector<8x1xf32>
    %131 = tpu.reciprocal %130 {approx = true} : vector<8x1xf32> -> vector<8x1xf32>
    %132 = vector.broadcast %131 : vector<8x1xf32> to vector<8x8xf32>
    %133 = arith.mulf %128, %132 : vector<8x8xf32>
    %134 = vector.extract_strided_slice %103 {offsets = [0, 8], sizes = [8, 8], strides = [1, 1]} : vector<8x32xf32> to vector<8x8xf32>
    %cst_55 = arith.constant dense<0.000000e+00> : vector<8x8xf32>
    %135 = tpu.matmul %133, %134, %cst_55 {dimension_numbers = #tpu.dot_dimension_numbers<[1], [0], [0], [1], [0, 0, 1, 1], [], []>} : vector<8x8xf32>, vector<8x8xf32>, vector<8x8xf32> -> vector<8x8xf32>
    %136 = vector.extract_strided_slice %26 {offsets = [8, 0], sizes = [8, 32], strides = [1, 1]} : vector<32x32xf32> to vector<8x32xf32>
    %cst_56 = arith.constant dense<0.000000e+00> : vector<8x32xf32>
    %137 = tpu.matmul %135, %136, %cst_56 {dimension_numbers = #tpu.dot_dimension_numbers<[1], [0], [0], [1], [0, 0, 1, 1], [], []>} : vector<8x8xf32>, vector<8x32xf32>, vector<8x32xf32> -> vector<8x32xf32>
    %138 = arith.addf %120, %137 : vector<8x32xf32>
    %139 = vector.extract_strided_slice %101 {offsets = [0, 16], sizes = [8, 8], strides = [1, 1]} : vector<8x32xf32> to vector<8x8xf32>
    %140 = vector.extract_strided_slice %102 {offsets = [0, 16], sizes = [8, 8], strides = [1, 1]} : vector<8x32xf32> to vector<8x8xf32>
    %cst_57 = arith.constant dense<0.000000e+00> : vector<8x8xf32>
    %141 = tpu.matmul %139, %140, %cst_57 {dimension_numbers = #tpu.dot_dimension_numbers<[1], [1], [0], [0], [0, 0, 1, 0], [], []>} : vector<8x8xf32>, vector<8x8xf32>, vector<8x8xf32> -> vector<8x8xf32>
    %cst_58 = arith.constant dense<0xFF800000> : vector<8xf32>
    %142 = vector.multi_reduction <maximumf>, %141, %cst_58 [1] : vector<8x8xf32> to vector<8xf32>
    %143 = vector.shape_cast %142 : vector<8xf32> to vector<8x1xf32>
    %144 = vector.broadcast %143 : vector<8x1xf32> to vector<8x8xf32>
    %145 = arith.subf %141, %144 : vector<8x8xf32>
    %146 = math.exp %145 : vector<8x8xf32>
    %cst_59 = arith.constant dense<0.000000e+00> : vector<8xf32>
    %147 = vector.multi_reduction <add>, %146, %cst_59 [1] : vector<8x8xf32> to vector<8xf32>
    %148 = vector.shape_cast %147 : vector<8xf32> to vector<8x1xf32>
    %149 = tpu.reciprocal %148 {approx = true} : vector<8x1xf32> -> vector<8x1xf32>
    %150 = vector.broadcast %149 : vector<8x1xf32> to vector<8x8xf32>
    %151 = arith.mulf %146, %150 : vector<8x8xf32>
    %152 = vector.extract_strided_slice %103 {offsets = [0, 16], sizes = [8, 8], strides = [1, 1]} : vector<8x32xf32> to vector<8x8xf32>
    %cst_60 = arith.constant dense<0.000000e+00> : vector<8x8xf32>
    %153 = tpu.matmul %151, %152, %cst_60 {dimension_numbers = #tpu.dot_dimension_numbers<[1], [0], [0], [1], [0, 0, 1, 1], [], []>} : vector<8x8xf32>, vector<8x8xf32>, vector<8x8xf32> -> vector<8x8xf32>
    %154 = vector.extract_strided_slice %26 {offsets = [16, 0], sizes = [8, 32], strides = [1, 1]} : vector<32x32xf32> to vector<8x32xf32>
    %cst_61 = arith.constant dense<0.000000e+00> : vector<8x32xf32>
    %155 = tpu.matmul %153, %154, %cst_61 {dimension_numbers = #tpu.dot_dimension_numbers<[1], [0], [0], [1], [0, 0, 1, 1], [], []>} : vector<8x8xf32>, vector<8x32xf32>, vector<8x32xf32> -> vector<8x32xf32>
    %156 = arith.addf %138, %155 : vector<8x32xf32>
    %157 = vector.extract_strided_slice %101 {offsets = [0, 24], sizes = [8, 8], strides = [1, 1]} : vector<8x32xf32> to vector<8x8xf32>
    %158 = vector.extract_strided_slice %102 {offsets = [0, 24], sizes = [8, 8], strides = [1, 1]} : vector<8x32xf32> to vector<8x8xf32>
    %cst_62 = arith.constant dense<0.000000e+00> : vector<8x8xf32>
    %159 = tpu.matmul %157, %158, %cst_62 {dimension_numbers = #tpu.dot_dimension_numbers<[1], [1], [0], [0], [0, 0, 1, 0], [], []>} : vector<8x8xf32>, vector<8x8xf32>, vector<8x8xf32> -> vector<8x8xf32>
    %cst_63 = arith.constant dense<0xFF800000> : vector<8xf32>
    %160 = vector.multi_reduction <maximumf>, %159, %cst_63 [1] : vector<8x8xf32> to vector<8xf32>
    %161 = vector.shape_cast %160 : vector<8xf32> to vector<8x1xf32>
    %162 = vector.broadcast %161 : vector<8x1xf32> to vector<8x8xf32>
    %163 = arith.subf %159, %162 : vector<8x8xf32>
    %164 = math.exp %163 : vector<8x8xf32>
    %cst_64 = arith.constant dense<0.000000e+00> : vector<8xf32>
    %165 = vector.multi_reduction <add>, %164, %cst_64 [1] : vector<8x8xf32> to vector<8xf32>
    %166 = vector.shape_cast %165 : vector<8xf32> to vector<8x1xf32>
    %167 = tpu.reciprocal %166 {approx = true} : vector<8x1xf32> -> vector<8x1xf32>
    %168 = vector.broadcast %167 : vector<8x1xf32> to vector<8x8xf32>
    %169 = arith.mulf %164, %168 : vector<8x8xf32>
    %170 = vector.extract_strided_slice %103 {offsets = [0, 24], sizes = [8, 8], strides = [1, 1]} : vector<8x32xf32> to vector<8x8xf32>
    %cst_65 = arith.constant dense<0.000000e+00> : vector<8x8xf32>
    %171 = tpu.matmul %169, %170, %cst_65 {dimension_numbers = #tpu.dot_dimension_numbers<[1], [0], [0], [1], [0, 0, 1, 1], [], []>} : vector<8x8xf32>, vector<8x8xf32>, vector<8x8xf32> -> vector<8x8xf32>
    %172 = vector.extract_strided_slice %26 {offsets = [24, 0], sizes = [8, 32], strides = [1, 1]} : vector<32x32xf32> to vector<8x32xf32>
    %cst_66 = arith.constant dense<0.000000e+00> : vector<8x32xf32>
    %173 = tpu.matmul %171, %172, %cst_66 {dimension_numbers = #tpu.dot_dimension_numbers<[1], [0], [0], [1], [0, 0, 1, 1], [], []>} : vector<8x8xf32>, vector<8x32xf32>, vector<8x32xf32> -> vector<8x32xf32>
    %174 = arith.addf %156, %173 : vector<8x32xf32>
    %175 = tpu.concatenate %100, %174 in 0 : vector<8x32xf32>, vector<8x32xf32> -> vector<16x32xf32>
    %176 = vector.broadcast %11 : vector<1x32xf32> to vector<16x32xf32>
    %177 = arith.addf %175, %176 : vector<16x32xf32>
    %178 = arith.addf %0, %177 : vector<16x32xf32>
    %c7 = arith.constant 7 : index
    %c0_67 = arith.constant 0 : index
    %c0_68 = arith.constant 0 : index
    %179 = vector.load %arg7[%c7, %c0_67, %c0_68] : memref<28x1x32xf32, #tpu.memory_space<vmem>>, vector<1x1x32xf32>
    %180 = vector.shape_cast %179 : vector<1x1x32xf32> to vector<1x32xf32>
    %c8 = arith.constant 8 : index
    %c0_69 = arith.constant 0 : index
    %c0_70 = arith.constant 0 : index
    %181 = vector.load %arg7[%c8, %c0_69, %c0_70] : memref<28x1x32xf32, #tpu.memory_space<vmem>>, vector<1x1x32xf32>
    %182 = vector.shape_cast %181 : vector<1x1x32xf32> to vector<1x32xf32>
    %cst_71 = arith.constant dense<0.000000e+00> : vector<16xf32>
    %183 = vector.multi_reduction <add>, %178, %cst_71 [1] : vector<16x32xf32> to vector<16xf32>
    %184 = vector.shape_cast %183 : vector<16xf32> to vector<16x1xf32>
    %cst_72 = arith.constant 3.200000e+01 : f32
    %185 = vector.broadcast %cst_72 : f32 to vector<16x1xf32>
    %186 = arith.divf %184, %185 : vector<16x1xf32>
    %187 = vector.broadcast %186 : vector<16x1xf32> to vector<16x32xf32>
    %188 = arith.subf %178, %187 : vector<16x32xf32>
    %189 = arith.mulf %188, %188 : vector<16x32xf32>
    %cst_73 = arith.constant dense<0.000000e+00> : vector<16xf32>
    %190 = vector.multi_reduction <add>, %189, %cst_73 [1] : vector<16x32xf32> to vector<16xf32>
    %191 = vector.shape_cast %190 : vector<16xf32> to vector<16x1xf32>
    %cst_74 = arith.constant 3.200000e+01 : f32
    %192 = vector.broadcast %cst_74 : f32 to vector<16x1xf32>
    %193 = arith.divf %191, %192 : vector<16x1xf32>
    %194 = vector.broadcast %186 : vector<16x1xf32> to vector<16x32xf32>
    %195 = arith.subf %178, %194 : vector<16x32xf32>
    %cst_75 = arith.constant 9.99999974E-6 : f32
    %196 = vector.broadcast %cst_75 : f32 to vector<16x1xf32>
    %197 = arith.addf %193, %196 : vector<16x1xf32>
    %198 = math.rsqrt %197 : vector<16x1xf32>
    %199 = vector.broadcast %198 : vector<16x1xf32> to vector<16x32xf32>
    %200 = arith.mulf %195, %199 : vector<16x32xf32>
    %201 = vector.broadcast %180 : vector<1x32xf32> to vector<16x32xf32>
    %202 = arith.mulf %200, %201 : vector<16x32xf32>
    %203 = vector.broadcast %182 : vector<1x32xf32> to vector<16x32xf32>
    %204 = arith.addf %202, %203 : vector<16x32xf32>
    %205 = arith.addf %204, %2 : vector<16x32xf32>
    %c3_76 = arith.constant 3 : index
    %c0_77 = arith.constant 0 : index
    %c0_78 = arith.constant 0 : index
    %206 = vector.load %arg7[%c3_76, %c0_77, %c0_78] : memref<28x1x32xf32, #tpu.memory_space<vmem>>, vector<1x1x32xf32>
    %207 = vector.shape_cast %206 : vector<1x1x32xf32> to vector<1x32xf32>
    %c4 = arith.constant 4 : index
    %c0_79 = arith.constant 0 : index
    %c0_80 = arith.constant 0 : index
    %208 = vector.load %arg7[%c4, %c0_79, %c0_80] : memref<28x1x32xf32, #tpu.memory_space<vmem>>, vector<1x1x32xf32>
    %209 = vector.shape_cast %208 : vector<1x1x32xf32> to vector<1x32xf32>
    %c5 = arith.constant 5 : index
    %c0_81 = arith.constant 0 : index
    %c0_82 = arith.constant 0 : index
    %210 = vector.load %arg7[%c5, %c0_81, %c0_82] : memref<28x1x32xf32, #tpu.memory_space<vmem>>, vector<1x1x32xf32>
    %211 = vector.shape_cast %210 : vector<1x1x32xf32> to vector<1x32xf32>
    %c4_83 = arith.constant 4 : index
    %c0_84 = arith.constant 0 : index
    %c0_85 = arith.constant 0 : index
    %212 = vector.load %arg4[%c4_83, %c0_84, %c0_85] : memref<16x32x32xf32, #tpu.memory_space<vmem>>, vector<1x32x32xf32>
    %213 = vector.shape_cast %212 : vector<1x32x32xf32> to vector<32x32xf32>
    %cst_86 = arith.constant dense<0.000000e+00> : vector<16x32xf32>
    %214 = tpu.matmul %205, %213, %cst_86 {dimension_numbers = #tpu.dot_dimension_numbers<[1], [0], [0], [1], [0, 0, 1, 1], [], []>} : vector<16x32xf32>, vector<32x32xf32>, vector<16x32xf32> -> vector<16x32xf32>
    %215 = vector.broadcast %207 : vector<1x32xf32> to vector<16x32xf32>
    %216 = arith.addf %214, %215 : vector<16x32xf32>
    %c5_87 = arith.constant 5 : index
    %c0_88 = arith.constant 0 : index
    %c0_89 = arith.constant 0 : index
    %217 = vector.load %arg4[%c5_87, %c0_88, %c0_89] : memref<16x32x32xf32, #tpu.memory_space<vmem>>, vector<1x32x32xf32>
    %218 = vector.shape_cast %217 : vector<1x32x32xf32> to vector<32x32xf32>
    %cst_90 = arith.constant dense<0.000000e+00> : vector<32x32xf32>
    %219 = tpu.matmul %4, %218, %cst_90 {dimension_numbers = #tpu.dot_dimension_numbers<[1], [0], [0], [1], [0, 0, 1, 1], [], []>} : vector<32x32xf32>, vector<32x32xf32>, vector<32x32xf32> -> vector<32x32xf32>
    %c6 = arith.constant 6 : index
    %c0_91 = arith.constant 0 : index
    %c0_92 = arith.constant 0 : index
    %220 = vector.load %arg4[%c6, %c0_91, %c0_92] : memref<16x32x32xf32, #tpu.memory_space<vmem>>, vector<1x32x32xf32>
    %221 = vector.shape_cast %220 : vector<1x32x32xf32> to vector<32x32xf32>
    %cst_93 = arith.constant dense<0.000000e+00> : vector<32x32xf32>
    %222 = tpu.matmul %1, %221, %cst_93 {dimension_numbers = #tpu.dot_dimension_numbers<[1], [0], [0], [1], [0, 0, 1, 1], [], []>} : vector<32x32xf32>, vector<32x32xf32>, vector<32x32xf32> -> vector<32x32xf32>
    %223 = vector.broadcast %209 : vector<1x32xf32> to vector<32x32xf32>
    %224 = arith.addf %222, %223 : vector<32x32xf32>
    %c7_94 = arith.constant 7 : index
    %c0_95 = arith.constant 0 : index
    %c0_96 = arith.constant 0 : index
    %225 = vector.load %arg4[%c7_94, %c0_95, %c0_96] : memref<16x32x32xf32, #tpu.memory_space<vmem>>, vector<1x32x32xf32>
    %226 = vector.shape_cast %225 : vector<1x32x32xf32> to vector<32x32xf32>
    %227 = vector.extract_strided_slice %216 {offsets = [0, 0], sizes = [8, 32], strides = [1, 1]} : vector<16x32xf32> to vector<8x32xf32>
    %228 = vector.extract_strided_slice %219 {offsets = [0, 0], sizes = [16, 32], strides = [1, 1]} : vector<32x32xf32> to vector<16x32xf32>
    %229 = vector.extract_strided_slice %224 {offsets = [0, 0], sizes = [16, 32], strides = [1, 1]} : vector<32x32xf32> to vector<16x32xf32>
    %230 = vector.extract_strided_slice %227 {offsets = [0, 0], sizes = [8, 8], strides = [1, 1]} : vector<8x32xf32> to vector<8x8xf32>
    %231 = vector.extract_strided_slice %228 {offsets = [0, 0], sizes = [16, 8], strides = [1, 1]} : vector<16x32xf32> to vector<16x8xf32>
    %cst_97 = arith.constant dense<0.000000e+00> : vector<8x16xf32>
    %232 = tpu.matmul %230, %231, %cst_97 {dimension_numbers = #tpu.dot_dimension_numbers<[1], [1], [0], [0], [0, 0, 1, 0], [], []>} : vector<8x8xf32>, vector<16x8xf32>, vector<8x16xf32> -> vector<8x16xf32>
    %cst_98 = arith.constant dense<0xFF800000> : vector<8xf32>
    %233 = vector.multi_reduction <maximumf>, %232, %cst_98 [1] : vector<8x16xf32> to vector<8xf32>
    %234 = vector.shape_cast %233 : vector<8xf32> to vector<8x1xf32>
    %235 = vector.broadcast %234 : vector<8x1xf32> to vector<8x16xf32>
    %236 = arith.subf %232, %235 : vector<8x16xf32>
    %237 = math.exp %236 : vector<8x16xf32>
    %cst_99 = arith.constant dense<0.000000e+00> : vector<8xf32>
    %238 = vector.multi_reduction <add>, %237, %cst_99 [1] : vector<8x16xf32> to vector<8xf32>
    %239 = vector.shape_cast %238 : vector<8xf32> to vector<8x1xf32>
    %240 = tpu.reciprocal %239 {approx = true} : vector<8x1xf32> -> vector<8x1xf32>
    %241 = vector.broadcast %240 : vector<8x1xf32> to vector<8x16xf32>
    %242 = arith.mulf %237, %241 : vector<8x16xf32>
    %243 = vector.extract_strided_slice %229 {offsets = [0, 0], sizes = [16, 8], strides = [1, 1]} : vector<16x32xf32> to vector<16x8xf32>
    %cst_100 = arith.constant dense<0.000000e+00> : vector<8x8xf32>
    %244 = tpu.matmul %242, %243, %cst_100 {dimension_numbers = #tpu.dot_dimension_numbers<[1], [0], [0], [1], [0, 0, 1, 1], [], []>} : vector<8x16xf32>, vector<16x8xf32>, vector<8x8xf32> -> vector<8x8xf32>
    %245 = vector.extract_strided_slice %226 {offsets = [0, 0], sizes = [8, 32], strides = [1, 1]} : vector<32x32xf32> to vector<8x32xf32>
    %cst_101 = arith.constant dense<0.000000e+00> : vector<8x32xf32>
    %246 = tpu.matmul %244, %245, %cst_101 {dimension_numbers = #tpu.dot_dimension_numbers<[1], [0], [0], [1], [0, 0, 1, 1], [], []>} : vector<8x8xf32>, vector<8x32xf32>, vector<8x32xf32> -> vector<8x32xf32>
    %247 = vector.extract_strided_slice %227 {offsets = [0, 8], sizes = [8, 8], strides = [1, 1]} : vector<8x32xf32> to vector<8x8xf32>
    %248 = vector.extract_strided_slice %228 {offsets = [0, 8], sizes = [16, 8], strides = [1, 1]} : vector<16x32xf32> to vector<16x8xf32>
    %cst_102 = arith.constant dense<0.000000e+00> : vector<8x16xf32>
    %249 = tpu.matmul %247, %248, %cst_102 {dimension_numbers = #tpu.dot_dimension_numbers<[1], [1], [0], [0], [0, 0, 1, 0], [], []>} : vector<8x8xf32>, vector<16x8xf32>, vector<8x16xf32> -> vector<8x16xf32>
    %cst_103 = arith.constant dense<0xFF800000> : vector<8xf32>
    %250 = vector.multi_reduction <maximumf>, %249, %cst_103 [1] : vector<8x16xf32> to vector<8xf32>
    %251 = vector.shape_cast %250 : vector<8xf32> to vector<8x1xf32>
    %252 = vector.broadcast %251 : vector<8x1xf32> to vector<8x16xf32>
    %253 = arith.subf %249, %252 : vector<8x16xf32>
    %254 = math.exp %253 : vector<8x16xf32>
    %cst_104 = arith.constant dense<0.000000e+00> : vector<8xf32>
    %255 = vector.multi_reduction <add>, %254, %cst_104 [1] : vector<8x16xf32> to vector<8xf32>
    %256 = vector.shape_cast %255 : vector<8xf32> to vector<8x1xf32>
    %257 = tpu.reciprocal %256 {approx = true} : vector<8x1xf32> -> vector<8x1xf32>
    %258 = vector.broadcast %257 : vector<8x1xf32> to vector<8x16xf32>
    %259 = arith.mulf %254, %258 : vector<8x16xf32>
    %260 = vector.extract_strided_slice %229 {offsets = [0, 8], sizes = [16, 8], strides = [1, 1]} : vector<16x32xf32> to vector<16x8xf32>
    %cst_105 = arith.constant dense<0.000000e+00> : vector<8x8xf32>
    %261 = tpu.matmul %259, %260, %cst_105 {dimension_numbers = #tpu.dot_dimension_numbers<[1], [0], [0], [1], [0, 0, 1, 1], [], []>} : vector<8x16xf32>, vector<16x8xf32>, vector<8x8xf32> -> vector<8x8xf32>
    %262 = vector.extract_strided_slice %226 {offsets = [8, 0], sizes = [8, 32], strides = [1, 1]} : vector<32x32xf32> to vector<8x32xf32>
    %cst_106 = arith.constant dense<0.000000e+00> : vector<8x32xf32>
    %263 = tpu.matmul %261, %262, %cst_106 {dimension_numbers = #tpu.dot_dimension_numbers<[1], [0], [0], [1], [0, 0, 1, 1], [], []>} : vector<8x8xf32>, vector<8x32xf32>, vector<8x32xf32> -> vector<8x32xf32>
    %264 = arith.addf %246, %263 : vector<8x32xf32>
    %265 = vector.extract_strided_slice %227 {offsets = [0, 16], sizes = [8, 8], strides = [1, 1]} : vector<8x32xf32> to vector<8x8xf32>
    %266 = vector.extract_strided_slice %228 {offsets = [0, 16], sizes = [16, 8], strides = [1, 1]} : vector<16x32xf32> to vector<16x8xf32>
    %cst_107 = arith.constant dense<0.000000e+00> : vector<8x16xf32>
    %267 = tpu.matmul %265, %266, %cst_107 {dimension_numbers = #tpu.dot_dimension_numbers<[1], [1], [0], [0], [0, 0, 1, 0], [], []>} : vector<8x8xf32>, vector<16x8xf32>, vector<8x16xf32> -> vector<8x16xf32>
    %cst_108 = arith.constant dense<0xFF800000> : vector<8xf32>
    %268 = vector.multi_reduction <maximumf>, %267, %cst_108 [1] : vector<8x16xf32> to vector<8xf32>
    %269 = vector.shape_cast %268 : vector<8xf32> to vector<8x1xf32>
    %270 = vector.broadcast %269 : vector<8x1xf32> to vector<8x16xf32>
    %271 = arith.subf %267, %270 : vector<8x16xf32>
    %272 = math.exp %271 : vector<8x16xf32>
    %cst_109 = arith.constant dense<0.000000e+00> : vector<8xf32>
    %273 = vector.multi_reduction <add>, %272, %cst_109 [1] : vector<8x16xf32> to vector<8xf32>
    %274 = vector.shape_cast %273 : vector<8xf32> to vector<8x1xf32>
    %275 = tpu.reciprocal %274 {approx = true} : vector<8x1xf32> -> vector<8x1xf32>
    %276 = vector.broadcast %275 : vector<8x1xf32> to vector<8x16xf32>
    %277 = arith.mulf %272, %276 : vector<8x16xf32>
    %278 = vector.extract_strided_slice %229 {offsets = [0, 16], sizes = [16, 8], strides = [1, 1]} : vector<16x32xf32> to vector<16x8xf32>
    %cst_110 = arith.constant dense<0.000000e+00> : vector<8x8xf32>
    %279 = tpu.matmul %277, %278, %cst_110 {dimension_numbers = #tpu.dot_dimension_numbers<[1], [0], [0], [1], [0, 0, 1, 1], [], []>} : vector<8x16xf32>, vector<16x8xf32>, vector<8x8xf32> -> vector<8x8xf32>
    %280 = vector.extract_strided_slice %226 {offsets = [16, 0], sizes = [8, 32], strides = [1, 1]} : vector<32x32xf32> to vector<8x32xf32>
    %cst_111 = arith.constant dense<0.000000e+00> : vector<8x32xf32>
    %281 = tpu.matmul %279, %280, %cst_111 {dimension_numbers = #tpu.dot_dimension_numbers<[1], [0], [0], [1], [0, 0, 1, 1], [], []>} : vector<8x8xf32>, vector<8x32xf32>, vector<8x32xf32> -> vector<8x32xf32>
    %282 = arith.addf %264, %281 : vector<8x32xf32>
    %283 = vector.extract_strided_slice %227 {offsets = [0, 24], sizes = [8, 8], strides = [1, 1]} : vector<8x32xf32> to vector<8x8xf32>
    %284 = vector.extract_strided_slice %228 {offsets = [0, 24], sizes = [16, 8], strides = [1, 1]} : vector<16x32xf32> to vector<16x8xf32>
    %cst_112 = arith.constant dense<0.000000e+00> : vector<8x16xf32>
    %285 = tpu.matmul %283, %284, %cst_112 {dimension_numbers = #tpu.dot_dimension_numbers<[1], [1], [0], [0], [0, 0, 1, 0], [], []>} : vector<8x8xf32>, vector<16x8xf32>, vector<8x16xf32> -> vector<8x16xf32>
    %cst_113 = arith.constant dense<0xFF800000> : vector<8xf32>
    %286 = vector.multi_reduction <maximumf>, %285, %cst_113 [1] : vector<8x16xf32> to vector<8xf32>
    %287 = vector.shape_cast %286 : vector<8xf32> to vector<8x1xf32>
    %288 = vector.broadcast %287 : vector<8x1xf32> to vector<8x16xf32>
    %289 = arith.subf %285, %288 : vector<8x16xf32>
    %290 = math.exp %289 : vector<8x16xf32>
    %cst_114 = arith.constant dense<0.000000e+00> : vector<8xf32>
    %291 = vector.multi_reduction <add>, %290, %cst_114 [1] : vector<8x16xf32> to vector<8xf32>
    %292 = vector.shape_cast %291 : vector<8xf32> to vector<8x1xf32>
    %293 = tpu.reciprocal %292 {approx = true} : vector<8x1xf32> -> vector<8x1xf32>
    %294 = vector.broadcast %293 : vector<8x1xf32> to vector<8x16xf32>
    %295 = arith.mulf %290, %294 : vector<8x16xf32>
    %296 = vector.extract_strided_slice %229 {offsets = [0, 24], sizes = [16, 8], strides = [1, 1]} : vector<16x32xf32> to vector<16x8xf32>
    %cst_115 = arith.constant dense<0.000000e+00> : vector<8x8xf32>
    %297 = tpu.matmul %295, %296, %cst_115 {dimension_numbers = #tpu.dot_dimension_numbers<[1], [0], [0], [1], [0, 0, 1, 1], [], []>} : vector<8x16xf32>, vector<16x8xf32>, vector<8x8xf32> -> vector<8x8xf32>
    %298 = vector.extract_strided_slice %226 {offsets = [24, 0], sizes = [8, 32], strides = [1, 1]} : vector<32x32xf32> to vector<8x32xf32>
    %cst_116 = arith.constant dense<0.000000e+00> : vector<8x32xf32>
    %299 = tpu.matmul %297, %298, %cst_116 {dimension_numbers = #tpu.dot_dimension_numbers<[1], [0], [0], [1], [0, 0, 1, 1], [], []>} : vector<8x8xf32>, vector<8x32xf32>, vector<8x32xf32> -> vector<8x32xf32>
    %300 = arith.addf %282, %299 : vector<8x32xf32>
    %301 = vector.extract_strided_slice %216 {offsets = [8, 0], sizes = [8, 32], strides = [1, 1]} : vector<16x32xf32> to vector<8x32xf32>
    %302 = vector.extract_strided_slice %219 {offsets = [16, 0], sizes = [16, 32], strides = [1, 1]} : vector<32x32xf32> to vector<16x32xf32>
    %303 = vector.extract_strided_slice %224 {offsets = [16, 0], sizes = [16, 32], strides = [1, 1]} : vector<32x32xf32> to vector<16x32xf32>
    %304 = vector.extract_strided_slice %301 {offsets = [0, 0], sizes = [8, 8], strides = [1, 1]} : vector<8x32xf32> to vector<8x8xf32>
    %305 = vector.extract_strided_slice %302 {offsets = [0, 0], sizes = [16, 8], strides = [1, 1]} : vector<16x32xf32> to vector<16x8xf32>
    %cst_117 = arith.constant dense<0.000000e+00> : vector<8x16xf32>
    %306 = tpu.matmul %304, %305, %cst_117 {dimension_numbers = #tpu.dot_dimension_numbers<[1], [1], [0], [0], [0, 0, 1, 0], [], []>} : vector<8x8xf32>, vector<16x8xf32>, vector<8x16xf32> -> vector<8x16xf32>
    %cst_118 = arith.constant dense<0xFF800000> : vector<8xf32>
    %307 = vector.multi_reduction <maximumf>, %306, %cst_118 [1] : vector<8x16xf32> to vector<8xf32>
    %308 = vector.shape_cast %307 : vector<8xf32> to vector<8x1xf32>
    %309 = vector.broadcast %308 : vector<8x1xf32> to vector<8x16xf32>
    %310 = arith.subf %306, %309 : vector<8x16xf32>
    %311 = math.exp %310 : vector<8x16xf32>
    %cst_119 = arith.constant dense<0.000000e+00> : vector<8xf32>
    %312 = vector.multi_reduction <add>, %311, %cst_119 [1] : vector<8x16xf32> to vector<8xf32>
    %313 = vector.shape_cast %312 : vector<8xf32> to vector<8x1xf32>
    %314 = tpu.reciprocal %313 {approx = true} : vector<8x1xf32> -> vector<8x1xf32>
    %315 = vector.broadcast %314 : vector<8x1xf32> to vector<8x16xf32>
    %316 = arith.mulf %311, %315 : vector<8x16xf32>
    %317 = vector.extract_strided_slice %303 {offsets = [0, 0], sizes = [16, 8], strides = [1, 1]} : vector<16x32xf32> to vector<16x8xf32>
    %cst_120 = arith.constant dense<0.000000e+00> : vector<8x8xf32>
    %318 = tpu.matmul %316, %317, %cst_120 {dimension_numbers = #tpu.dot_dimension_numbers<[1], [0], [0], [1], [0, 0, 1, 1], [], []>} : vector<8x16xf32>, vector<16x8xf32>, vector<8x8xf32> -> vector<8x8xf32>
    %319 = vector.extract_strided_slice %226 {offsets = [0, 0], sizes = [8, 32], strides = [1, 1]} : vector<32x32xf32> to vector<8x32xf32>
    %cst_121 = arith.constant dense<0.000000e+00> : vector<8x32xf32>
    %320 = tpu.matmul %318, %319, %cst_121 {dimension_numbers = #tpu.dot_dimension_numbers<[1], [0], [0], [1], [0, 0, 1, 1], [], []>} : vector<8x8xf32>, vector<8x32xf32>, vector<8x32xf32> -> vector<8x32xf32>
    %321 = vector.extract_strided_slice %301 {offsets = [0, 8], sizes = [8, 8], strides = [1, 1]} : vector<8x32xf32> to vector<8x8xf32>
    %322 = vector.extract_strided_slice %302 {offsets = [0, 8], sizes = [16, 8], strides = [1, 1]} : vector<16x32xf32> to vector<16x8xf32>
    %cst_122 = arith.constant dense<0.000000e+00> : vector<8x16xf32>
    %323 = tpu.matmul %321, %322, %cst_122 {dimension_numbers = #tpu.dot_dimension_numbers<[1], [1], [0], [0], [0, 0, 1, 0], [], []>} : vector<8x8xf32>, vector<16x8xf32>, vector<8x16xf32> -> vector<8x16xf32>
    %cst_123 = arith.constant dense<0xFF800000> : vector<8xf32>
    %324 = vector.multi_reduction <maximumf>, %323, %cst_123 [1] : vector<8x16xf32> to vector<8xf32>
    %325 = vector.shape_cast %324 : vector<8xf32> to vector<8x1xf32>
    %326 = vector.broadcast %325 : vector<8x1xf32> to vector<8x16xf32>
    %327 = arith.subf %323, %326 : vector<8x16xf32>
    %328 = math.exp %327 : vector<8x16xf32>
    %cst_124 = arith.constant dense<0.000000e+00> : vector<8xf32>
    %329 = vector.multi_reduction <add>, %328, %cst_124 [1] : vector<8x16xf32> to vector<8xf32>
    %330 = vector.shape_cast %329 : vector<8xf32> to vector<8x1xf32>
    %331 = tpu.reciprocal %330 {approx = true} : vector<8x1xf32> -> vector<8x1xf32>
    %332 = vector.broadcast %331 : vector<8x1xf32> to vector<8x16xf32>
    %333 = arith.mulf %328, %332 : vector<8x16xf32>
    %334 = vector.extract_strided_slice %303 {offsets = [0, 8], sizes = [16, 8], strides = [1, 1]} : vector<16x32xf32> to vector<16x8xf32>
    %cst_125 = arith.constant dense<0.000000e+00> : vector<8x8xf32>
    %335 = tpu.matmul %333, %334, %cst_125 {dimension_numbers = #tpu.dot_dimension_numbers<[1], [0], [0], [1], [0, 0, 1, 1], [], []>} : vector<8x16xf32>, vector<16x8xf32>, vector<8x8xf32> -> vector<8x8xf32>
    %336 = vector.extract_strided_slice %226 {offsets = [8, 0], sizes = [8, 32], strides = [1, 1]} : vector<32x32xf32> to vector<8x32xf32>
    %cst_126 = arith.constant dense<0.000000e+00> : vector<8x32xf32>
    %337 = tpu.matmul %335, %336, %cst_126 {dimension_numbers = #tpu.dot_dimension_numbers<[1], [0], [0], [1], [0, 0, 1, 1], [], []>} : vector<8x8xf32>, vector<8x32xf32>, vector<8x32xf32> -> vector<8x32xf32>
    %338 = arith.addf %320, %337 : vector<8x32xf32>
    %339 = vector.extract_strided_slice %301 {offsets = [0, 16], sizes = [8, 8], strides = [1, 1]} : vector<8x32xf32> to vector<8x8xf32>
    %340 = vector.extract_strided_slice %302 {offsets = [0, 16], sizes = [16, 8], strides = [1, 1]} : vector<16x32xf32> to vector<16x8xf32>
    %cst_127 = arith.constant dense<0.000000e+00> : vector<8x16xf32>
    %341 = tpu.matmul %339, %340, %cst_127 {dimension_numbers = #tpu.dot_dimension_numbers<[1], [1], [0], [0], [0, 0, 1, 0], [], []>} : vector<8x8xf32>, vector<16x8xf32>, vector<8x16xf32> -> vector<8x16xf32>
    %cst_128 = arith.constant dense<0xFF800000> : vector<8xf32>
    %342 = vector.multi_reduction <maximumf>, %341, %cst_128 [1] : vector<8x16xf32> to vector<8xf32>
    %343 = vector.shape_cast %342 : vector<8xf32> to vector<8x1xf32>
    %344 = vector.broadcast %343 : vector<8x1xf32> to vector<8x16xf32>
    %345 = arith.subf %341, %344 : vector<8x16xf32>
    %346 = math.exp %345 : vector<8x16xf32>
    %cst_129 = arith.constant dense<0.000000e+00> : vector<8xf32>
    %347 = vector.multi_reduction <add>, %346, %cst_129 [1] : vector<8x16xf32> to vector<8xf32>
    %348 = vector.shape_cast %347 : vector<8xf32> to vector<8x1xf32>
    %349 = tpu.reciprocal %348 {approx = true} : vector<8x1xf32> -> vector<8x1xf32>
    %350 = vector.broadcast %349 : vector<8x1xf32> to vector<8x16xf32>
    %351 = arith.mulf %346, %350 : vector<8x16xf32>
    %352 = vector.extract_strided_slice %303 {offsets = [0, 16], sizes = [16, 8], strides = [1, 1]} : vector<16x32xf32> to vector<16x8xf32>
    %cst_130 = arith.constant dense<0.000000e+00> : vector<8x8xf32>
    %353 = tpu.matmul %351, %352, %cst_130 {dimension_numbers = #tpu.dot_dimension_numbers<[1], [0], [0], [1], [0, 0, 1, 1], [], []>} : vector<8x16xf32>, vector<16x8xf32>, vector<8x8xf32> -> vector<8x8xf32>
    %354 = vector.extract_strided_slice %226 {offsets = [16, 0], sizes = [8, 32], strides = [1, 1]} : vector<32x32xf32> to vector<8x32xf32>
    %cst_131 = arith.constant dense<0.000000e+00> : vector<8x32xf32>
    %355 = tpu.matmul %353, %354, %cst_131 {dimension_numbers = #tpu.dot_dimension_numbers<[1], [0], [0], [1], [0, 0, 1, 1], [], []>} : vector<8x8xf32>, vector<8x32xf32>, vector<8x32xf32> -> vector<8x32xf32>
    %356 = arith.addf %338, %355 : vector<8x32xf32>
    %357 = vector.extract_strided_slice %301 {offsets = [0, 24], sizes = [8, 8], strides = [1, 1]} : vector<8x32xf32> to vector<8x8xf32>
    %358 = vector.extract_strided_slice %302 {offsets = [0, 24], sizes = [16, 8], strides = [1, 1]} : vector<16x32xf32> to vector<16x8xf32>
    %cst_132 = arith.constant dense<0.000000e+00> : vector<8x16xf32>
    %359 = tpu.matmul %357, %358, %cst_132 {dimension_numbers = #tpu.dot_dimension_numbers<[1], [1], [0], [0], [0, 0, 1, 0], [], []>} : vector<8x8xf32>, vector<16x8xf32>, vector<8x16xf32> -> vector<8x16xf32>
    %cst_133 = arith.constant dense<0xFF800000> : vector<8xf32>
    %360 = vector.multi_reduction <maximumf>, %359, %cst_133 [1] : vector<8x16xf32> to vector<8xf32>
    %361 = vector.shape_cast %360 : vector<8xf32> to vector<8x1xf32>
    %362 = vector.broadcast %361 : vector<8x1xf32> to vector<8x16xf32>
    %363 = arith.subf %359, %362 : vector<8x16xf32>
    %364 = math.exp %363 : vector<8x16xf32>
    %cst_134 = arith.constant dense<0.000000e+00> : vector<8xf32>
    %365 = vector.multi_reduction <add>, %364, %cst_134 [1] : vector<8x16xf32> to vector<8xf32>
    %366 = vector.shape_cast %365 : vector<8xf32> to vector<8x1xf32>
    %367 = tpu.reciprocal %366 {approx = true} : vector<8x1xf32> -> vector<8x1xf32>
    %368 = vector.broadcast %367 : vector<8x1xf32> to vector<8x16xf32>
    %369 = arith.mulf %364, %368 : vector<8x16xf32>
    %370 = vector.extract_strided_slice %303 {offsets = [0, 24], sizes = [16, 8], strides = [1, 1]} : vector<16x32xf32> to vector<16x8xf32>
    %cst_135 = arith.constant dense<0.000000e+00> : vector<8x8xf32>
    %371 = tpu.matmul %369, %370, %cst_135 {dimension_numbers = #tpu.dot_dimension_numbers<[1], [0], [0], [1], [0, 0, 1, 1], [], []>} : vector<8x16xf32>, vector<16x8xf32>, vector<8x8xf32> -> vector<8x8xf32>
    %372 = vector.extract_strided_slice %226 {offsets = [24, 0], sizes = [8, 32], strides = [1, 1]} : vector<32x32xf32> to vector<8x32xf32>
    %cst_136 = arith.constant dense<0.000000e+00> : vector<8x32xf32>
    %373 = tpu.matmul %371, %372, %cst_136 {dimension_numbers = #tpu.dot_dimension_numbers<[1], [0], [0], [1], [0, 0, 1, 1], [], []>} : vector<8x8xf32>, vector<8x32xf32>, vector<8x32xf32> -> vector<8x32xf32>
    %374 = arith.addf %356, %373 : vector<8x32xf32>
    %375 = tpu.concatenate %300, %374 in 0 : vector<8x32xf32>, vector<8x32xf32> -> vector<16x32xf32>
    %376 = vector.broadcast %211 : vector<1x32xf32> to vector<16x32xf32>
    %377 = arith.addf %375, %376 : vector<16x32xf32>
    %378 = arith.addf %204, %377 : vector<16x32xf32>
    %c9 = arith.constant 9 : index
    %c0_137 = arith.constant 0 : index
    %c0_138 = arith.constant 0 : index
    %379 = vector.load %arg7[%c9, %c0_137, %c0_138] : memref<28x1x32xf32, #tpu.memory_space<vmem>>, vector<1x1x32xf32>
    %380 = vector.shape_cast %379 : vector<1x1x32xf32> to vector<1x32xf32>
    %c10 = arith.constant 10 : index
    %c0_139 = arith.constant 0 : index
    %c0_140 = arith.constant 0 : index
    %381 = vector.load %arg7[%c10, %c0_139, %c0_140] : memref<28x1x32xf32, #tpu.memory_space<vmem>>, vector<1x1x32xf32>
    %382 = vector.shape_cast %381 : vector<1x1x32xf32> to vector<1x32xf32>
    %cst_141 = arith.constant dense<0.000000e+00> : vector<16xf32>
    %383 = vector.multi_reduction <add>, %378, %cst_141 [1] : vector<16x32xf32> to vector<16xf32>
    %384 = vector.shape_cast %383 : vector<16xf32> to vector<16x1xf32>
    %cst_142 = arith.constant 3.200000e+01 : f32
    %385 = vector.broadcast %cst_142 : f32 to vector<16x1xf32>
    %386 = arith.divf %384, %385 : vector<16x1xf32>
    %387 = vector.broadcast %386 : vector<16x1xf32> to vector<16x32xf32>
    %388 = arith.subf %378, %387 : vector<16x32xf32>
    %389 = arith.mulf %388, %388 : vector<16x32xf32>
    %cst_143 = arith.constant dense<0.000000e+00> : vector<16xf32>
    %390 = vector.multi_reduction <add>, %389, %cst_143 [1] : vector<16x32xf32> to vector<16xf32>
    %391 = vector.shape_cast %390 : vector<16xf32> to vector<16x1xf32>
    %cst_144 = arith.constant 3.200000e+01 : f32
    %392 = vector.broadcast %cst_144 : f32 to vector<16x1xf32>
    %393 = arith.divf %391, %392 : vector<16x1xf32>
    %394 = vector.broadcast %386 : vector<16x1xf32> to vector<16x32xf32>
    %395 = arith.subf %378, %394 : vector<16x32xf32>
    %cst_145 = arith.constant 9.99999974E-6 : f32
    %396 = vector.broadcast %cst_145 : f32 to vector<16x1xf32>
    %397 = arith.addf %393, %396 : vector<16x1xf32>
    %398 = math.rsqrt %397 : vector<16x1xf32>
    %399 = vector.broadcast %398 : vector<16x1xf32> to vector<16x32xf32>
    %400 = arith.mulf %395, %399 : vector<16x32xf32>
    %401 = vector.broadcast %380 : vector<1x32xf32> to vector<16x32xf32>
    %402 = arith.mulf %400, %401 : vector<16x32xf32>
    %403 = vector.broadcast %382 : vector<1x32xf32> to vector<16x32xf32>
    %404 = arith.addf %402, %403 : vector<16x32xf32>
    %c0_146 = arith.constant 0 : index
    %c0_147 = arith.constant 0 : index
    %c0_148 = arith.constant 0 : index
    %405 = vector.load %arg5[%c0_146, %c0_147, %c0_148] : memref<2x32x64xf32, #tpu.memory_space<vmem>>, vector<1x32x64xf32>
    %406 = vector.shape_cast %405 : vector<1x32x64xf32> to vector<32x64xf32>
    %cst_149 = arith.constant dense<0.000000e+00> : vector<16x64xf32>
    %407 = tpu.matmul %404, %406, %cst_149 {dimension_numbers = #tpu.dot_dimension_numbers<[1], [0], [0], [1], [0, 0, 1, 1], [], []>} : vector<16x32xf32>, vector<32x64xf32>, vector<16x64xf32> -> vector<16x64xf32>
    %c0_150 = arith.constant 0 : index
    %c0_151 = arith.constant 0 : index
    %c0_152 = arith.constant 0 : index
    %408 = vector.load %arg8[%c0_150, %c0_151, %c0_152] : memref<2x1x64xf32, #tpu.memory_space<vmem>>, vector<1x1x64xf32>
    %409 = vector.shape_cast %408 : vector<1x1x64xf32> to vector<1x64xf32>
    %410 = vector.broadcast %409 : vector<1x64xf32> to vector<16x64xf32>
    %411 = arith.addf %407, %410 : vector<16x64xf32>
    %cst_153 = arith.constant 0.000000e+00 : f32
    %412 = vector.broadcast %cst_153 : f32 to vector<16x64xf32>
    %413 = arith.maximumf %411, %412 : vector<16x64xf32>
    %c0_154 = arith.constant 0 : index
    %c0_155 = arith.constant 0 : index
    %c0_156 = arith.constant 0 : index
    %414 = vector.load %arg6[%c0_154, %c0_155, %c0_156] : memref<2x64x32xf32, #tpu.memory_space<vmem>>, vector<1x64x32xf32>
    %415 = vector.shape_cast %414 : vector<1x64x32xf32> to vector<64x32xf32>
    %cst_157 = arith.constant dense<0.000000e+00> : vector<16x32xf32>
    %416 = tpu.matmul %413, %415, %cst_157 {dimension_numbers = #tpu.dot_dimension_numbers<[1], [0], [0], [1], [0, 0, 1, 1], [], []>} : vector<16x64xf32>, vector<64x32xf32>, vector<16x32xf32> -> vector<16x32xf32>
    %c6_158 = arith.constant 6 : index
    %c0_159 = arith.constant 0 : index
    %c0_160 = arith.constant 0 : index
    %417 = vector.load %arg7[%c6_158, %c0_159, %c0_160] : memref<28x1x32xf32, #tpu.memory_space<vmem>>, vector<1x1x32xf32>
    %418 = vector.shape_cast %417 : vector<1x1x32xf32> to vector<1x32xf32>
    %419 = vector.broadcast %418 : vector<1x32xf32> to vector<16x32xf32>
    %420 = arith.addf %416, %419 : vector<16x32xf32>
    %421 = arith.addf %404, %420 : vector<16x32xf32>
    %c11 = arith.constant 11 : index
    %c0_161 = arith.constant 0 : index
    %c0_162 = arith.constant 0 : index
    %422 = vector.load %arg7[%c11, %c0_161, %c0_162] : memref<28x1x32xf32, #tpu.memory_space<vmem>>, vector<1x1x32xf32>
    %423 = vector.shape_cast %422 : vector<1x1x32xf32> to vector<1x32xf32>
    %c12 = arith.constant 12 : index
    %c0_163 = arith.constant 0 : index
    %c0_164 = arith.constant 0 : index
    %424 = vector.load %arg7[%c12, %c0_163, %c0_164] : memref<28x1x32xf32, #tpu.memory_space<vmem>>, vector<1x1x32xf32>
    %425 = vector.shape_cast %424 : vector<1x1x32xf32> to vector<1x32xf32>
    %cst_165 = arith.constant dense<0.000000e+00> : vector<16xf32>
    %426 = vector.multi_reduction <add>, %421, %cst_165 [1] : vector<16x32xf32> to vector<16xf32>
    %427 = vector.shape_cast %426 : vector<16xf32> to vector<16x1xf32>
    %cst_166 = arith.constant 3.200000e+01 : f32
    %428 = vector.broadcast %cst_166 : f32 to vector<16x1xf32>
    %429 = arith.divf %427, %428 : vector<16x1xf32>
    %430 = vector.broadcast %429 : vector<16x1xf32> to vector<16x32xf32>
    %431 = arith.subf %421, %430 : vector<16x32xf32>
    %432 = arith.mulf %431, %431 : vector<16x32xf32>
    %cst_167 = arith.constant dense<0.000000e+00> : vector<16xf32>
    %433 = vector.multi_reduction <add>, %432, %cst_167 [1] : vector<16x32xf32> to vector<16xf32>
    %434 = vector.shape_cast %433 : vector<16xf32> to vector<16x1xf32>
    %cst_168 = arith.constant 3.200000e+01 : f32
    %435 = vector.broadcast %cst_168 : f32 to vector<16x1xf32>
    %436 = arith.divf %434, %435 : vector<16x1xf32>
    %437 = vector.broadcast %429 : vector<16x1xf32> to vector<16x32xf32>
    %438 = arith.subf %421, %437 : vector<16x32xf32>
    %cst_169 = arith.constant 9.99999974E-6 : f32
    %439 = vector.broadcast %cst_169 : f32 to vector<16x1xf32>
    %440 = arith.addf %436, %439 : vector<16x1xf32>
    %441 = math.rsqrt %440 : vector<16x1xf32>
    %442 = vector.broadcast %441 : vector<16x1xf32> to vector<16x32xf32>
    %443 = arith.mulf %438, %442 : vector<16x32xf32>
    %444 = vector.broadcast %423 : vector<1x32xf32> to vector<16x32xf32>
    %445 = arith.mulf %443, %444 : vector<16x32xf32>
    %446 = vector.broadcast %425 : vector<1x32xf32> to vector<16x32xf32>
    %447 = arith.addf %445, %446 : vector<16x32xf32>
    %448 = arith.addf %447, %2 : vector<16x32xf32>
    %c13 = arith.constant 13 : index
    %c0_170 = arith.constant 0 : index
    %c0_171 = arith.constant 0 : index
    %449 = vector.load %arg7[%c13, %c0_170, %c0_171] : memref<28x1x32xf32, #tpu.memory_space<vmem>>, vector<1x1x32xf32>
    %450 = vector.shape_cast %449 : vector<1x1x32xf32> to vector<1x32xf32>
    %c14 = arith.constant 14 : index
    %c0_172 = arith.constant 0 : index
    %c0_173 = arith.constant 0 : index
    %451 = vector.load %arg7[%c14, %c0_172, %c0_173] : memref<28x1x32xf32, #tpu.memory_space<vmem>>, vector<1x1x32xf32>
    %452 = vector.shape_cast %451 : vector<1x1x32xf32> to vector<1x32xf32>
    %c15 = arith.constant 15 : index
    %c0_174 = arith.constant 0 : index
    %c0_175 = arith.constant 0 : index
    %453 = vector.load %arg7[%c15, %c0_174, %c0_175] : memref<28x1x32xf32, #tpu.memory_space<vmem>>, vector<1x1x32xf32>
    %454 = vector.shape_cast %453 : vector<1x1x32xf32> to vector<1x32xf32>
    %c8_176 = arith.constant 8 : index
    %c0_177 = arith.constant 0 : index
    %c0_178 = arith.constant 0 : index
    %455 = vector.load %arg4[%c8_176, %c0_177, %c0_178] : memref<16x32x32xf32, #tpu.memory_space<vmem>>, vector<1x32x32xf32>
    %456 = vector.shape_cast %455 : vector<1x32x32xf32> to vector<32x32xf32>
    %cst_179 = arith.constant dense<0.000000e+00> : vector<16x32xf32>
    %457 = tpu.matmul %448, %456, %cst_179 {dimension_numbers = #tpu.dot_dimension_numbers<[1], [0], [0], [1], [0, 0, 1, 1], [], []>} : vector<16x32xf32>, vector<32x32xf32>, vector<16x32xf32> -> vector<16x32xf32>
    %458 = vector.broadcast %450 : vector<1x32xf32> to vector<16x32xf32>
    %459 = arith.addf %457, %458 : vector<16x32xf32>
    %c9_180 = arith.constant 9 : index
    %c0_181 = arith.constant 0 : index
    %c0_182 = arith.constant 0 : index
    %460 = vector.load %arg4[%c9_180, %c0_181, %c0_182] : memref<16x32x32xf32, #tpu.memory_space<vmem>>, vector<1x32x32xf32>
    %461 = vector.shape_cast %460 : vector<1x32x32xf32> to vector<32x32xf32>
    %cst_183 = arith.constant dense<0.000000e+00> : vector<16x32xf32>
    %462 = tpu.matmul %448, %461, %cst_183 {dimension_numbers = #tpu.dot_dimension_numbers<[1], [0], [0], [1], [0, 0, 1, 1], [], []>} : vector<16x32xf32>, vector<32x32xf32>, vector<16x32xf32> -> vector<16x32xf32>
    %c10_184 = arith.constant 10 : index
    %c0_185 = arith.constant 0 : index
    %c0_186 = arith.constant 0 : index
    %463 = vector.load %arg4[%c10_184, %c0_185, %c0_186] : memref<16x32x32xf32, #tpu.memory_space<vmem>>, vector<1x32x32xf32>
    %464 = vector.shape_cast %463 : vector<1x32x32xf32> to vector<32x32xf32>
    %cst_187 = arith.constant dense<0.000000e+00> : vector<16x32xf32>
    %465 = tpu.matmul %447, %464, %cst_187 {dimension_numbers = #tpu.dot_dimension_numbers<[1], [0], [0], [1], [0, 0, 1, 1], [], []>} : vector<16x32xf32>, vector<32x32xf32>, vector<16x32xf32> -> vector<16x32xf32>
    %466 = vector.broadcast %452 : vector<1x32xf32> to vector<16x32xf32>
    %467 = arith.addf %465, %466 : vector<16x32xf32>
    %c11_188 = arith.constant 11 : index
    %c0_189 = arith.constant 0 : index
    %c0_190 = arith.constant 0 : index
    %468 = vector.load %arg4[%c11_188, %c0_189, %c0_190] : memref<16x32x32xf32, #tpu.memory_space<vmem>>, vector<1x32x32xf32>
    %469 = vector.shape_cast %468 : vector<1x32x32xf32> to vector<32x32xf32>
    %470 = vector.extract_strided_slice %459 {offsets = [0, 0], sizes = [8, 32], strides = [1, 1]} : vector<16x32xf32> to vector<8x32xf32>
    %471 = vector.extract_strided_slice %462 {offsets = [0, 0], sizes = [8, 32], strides = [1, 1]} : vector<16x32xf32> to vector<8x32xf32>
    %472 = vector.extract_strided_slice %467 {offsets = [0, 0], sizes = [8, 32], strides = [1, 1]} : vector<16x32xf32> to vector<8x32xf32>
    %473 = vector.extract_strided_slice %470 {offsets = [0, 0], sizes = [8, 8], strides = [1, 1]} : vector<8x32xf32> to vector<8x8xf32>
    %474 = vector.extract_strided_slice %471 {offsets = [0, 0], sizes = [8, 8], strides = [1, 1]} : vector<8x32xf32> to vector<8x8xf32>
    %cst_191 = arith.constant dense<0.000000e+00> : vector<8x8xf32>
    %475 = tpu.matmul %473, %474, %cst_191 {dimension_numbers = #tpu.dot_dimension_numbers<[1], [1], [0], [0], [0, 0, 1, 0], [], []>} : vector<8x8xf32>, vector<8x8xf32>, vector<8x8xf32> -> vector<8x8xf32>
    %cst_192 = arith.constant dense<0xFF800000> : vector<8xf32>
    %476 = vector.multi_reduction <maximumf>, %475, %cst_192 [1] : vector<8x8xf32> to vector<8xf32>
    %477 = vector.shape_cast %476 : vector<8xf32> to vector<8x1xf32>
    %478 = vector.broadcast %477 : vector<8x1xf32> to vector<8x8xf32>
    %479 = arith.subf %475, %478 : vector<8x8xf32>
    %480 = math.exp %479 : vector<8x8xf32>
    %cst_193 = arith.constant dense<0.000000e+00> : vector<8xf32>
    %481 = vector.multi_reduction <add>, %480, %cst_193 [1] : vector<8x8xf32> to vector<8xf32>
    %482 = vector.shape_cast %481 : vector<8xf32> to vector<8x1xf32>
    %483 = tpu.reciprocal %482 {approx = true} : vector<8x1xf32> -> vector<8x1xf32>
    %484 = vector.broadcast %483 : vector<8x1xf32> to vector<8x8xf32>
    %485 = arith.mulf %480, %484 : vector<8x8xf32>
    %486 = vector.extract_strided_slice %472 {offsets = [0, 0], sizes = [8, 8], strides = [1, 1]} : vector<8x32xf32> to vector<8x8xf32>
    %cst_194 = arith.constant dense<0.000000e+00> : vector<8x8xf32>
    %487 = tpu.matmul %485, %486, %cst_194 {dimension_numbers = #tpu.dot_dimension_numbers<[1], [0], [0], [1], [0, 0, 1, 1], [], []>} : vector<8x8xf32>, vector<8x8xf32>, vector<8x8xf32> -> vector<8x8xf32>
    %488 = vector.extract_strided_slice %469 {offsets = [0, 0], sizes = [8, 32], strides = [1, 1]} : vector<32x32xf32> to vector<8x32xf32>
    %cst_195 = arith.constant dense<0.000000e+00> : vector<8x32xf32>
    %489 = tpu.matmul %487, %488, %cst_195 {dimension_numbers = #tpu.dot_dimension_numbers<[1], [0], [0], [1], [0, 0, 1, 1], [], []>} : vector<8x8xf32>, vector<8x32xf32>, vector<8x32xf32> -> vector<8x32xf32>
    %490 = vector.extract_strided_slice %470 {offsets = [0, 8], sizes = [8, 8], strides = [1, 1]} : vector<8x32xf32> to vector<8x8xf32>
    %491 = vector.extract_strided_slice %471 {offsets = [0, 8], sizes = [8, 8], strides = [1, 1]} : vector<8x32xf32> to vector<8x8xf32>
    %cst_196 = arith.constant dense<0.000000e+00> : vector<8x8xf32>
    %492 = tpu.matmul %490, %491, %cst_196 {dimension_numbers = #tpu.dot_dimension_numbers<[1], [1], [0], [0], [0, 0, 1, 0], [], []>} : vector<8x8xf32>, vector<8x8xf32>, vector<8x8xf32> -> vector<8x8xf32>
    %cst_197 = arith.constant dense<0xFF800000> : vector<8xf32>
    %493 = vector.multi_reduction <maximumf>, %492, %cst_197 [1] : vector<8x8xf32> to vector<8xf32>
    %494 = vector.shape_cast %493 : vector<8xf32> to vector<8x1xf32>
    %495 = vector.broadcast %494 : vector<8x1xf32> to vector<8x8xf32>
    %496 = arith.subf %492, %495 : vector<8x8xf32>
    %497 = math.exp %496 : vector<8x8xf32>
    %cst_198 = arith.constant dense<0.000000e+00> : vector<8xf32>
    %498 = vector.multi_reduction <add>, %497, %cst_198 [1] : vector<8x8xf32> to vector<8xf32>
    %499 = vector.shape_cast %498 : vector<8xf32> to vector<8x1xf32>
    %500 = tpu.reciprocal %499 {approx = true} : vector<8x1xf32> -> vector<8x1xf32>
    %501 = vector.broadcast %500 : vector<8x1xf32> to vector<8x8xf32>
    %502 = arith.mulf %497, %501 : vector<8x8xf32>
    %503 = vector.extract_strided_slice %472 {offsets = [0, 8], sizes = [8, 8], strides = [1, 1]} : vector<8x32xf32> to vector<8x8xf32>
    %cst_199 = arith.constant dense<0.000000e+00> : vector<8x8xf32>
    %504 = tpu.matmul %502, %503, %cst_199 {dimension_numbers = #tpu.dot_dimension_numbers<[1], [0], [0], [1], [0, 0, 1, 1], [], []>} : vector<8x8xf32>, vector<8x8xf32>, vector<8x8xf32> -> vector<8x8xf32>
    %505 = vector.extract_strided_slice %469 {offsets = [8, 0], sizes = [8, 32], strides = [1, 1]} : vector<32x32xf32> to vector<8x32xf32>
    %cst_200 = arith.constant dense<0.000000e+00> : vector<8x32xf32>
    %506 = tpu.matmul %504, %505, %cst_200 {dimension_numbers = #tpu.dot_dimension_numbers<[1], [0], [0], [1], [0, 0, 1, 1], [], []>} : vector<8x8xf32>, vector<8x32xf32>, vector<8x32xf32> -> vector<8x32xf32>
    %507 = arith.addf %489, %506 : vector<8x32xf32>
    %508 = vector.extract_strided_slice %470 {offsets = [0, 16], sizes = [8, 8], strides = [1, 1]} : vector<8x32xf32> to vector<8x8xf32>
    %509 = vector.extract_strided_slice %471 {offsets = [0, 16], sizes = [8, 8], strides = [1, 1]} : vector<8x32xf32> to vector<8x8xf32>
    %cst_201 = arith.constant dense<0.000000e+00> : vector<8x8xf32>
    %510 = tpu.matmul %508, %509, %cst_201 {dimension_numbers = #tpu.dot_dimension_numbers<[1], [1], [0], [0], [0, 0, 1, 0], [], []>} : vector<8x8xf32>, vector<8x8xf32>, vector<8x8xf32> -> vector<8x8xf32>
    %cst_202 = arith.constant dense<0xFF800000> : vector<8xf32>
    %511 = vector.multi_reduction <maximumf>, %510, %cst_202 [1] : vector<8x8xf32> to vector<8xf32>
    %512 = vector.shape_cast %511 : vector<8xf32> to vector<8x1xf32>
    %513 = vector.broadcast %512 : vector<8x1xf32> to vector<8x8xf32>
    %514 = arith.subf %510, %513 : vector<8x8xf32>
    %515 = math.exp %514 : vector<8x8xf32>
    %cst_203 = arith.constant dense<0.000000e+00> : vector<8xf32>
    %516 = vector.multi_reduction <add>, %515, %cst_203 [1] : vector<8x8xf32> to vector<8xf32>
    %517 = vector.shape_cast %516 : vector<8xf32> to vector<8x1xf32>
    %518 = tpu.reciprocal %517 {approx = true} : vector<8x1xf32> -> vector<8x1xf32>
    %519 = vector.broadcast %518 : vector<8x1xf32> to vector<8x8xf32>
    %520 = arith.mulf %515, %519 : vector<8x8xf32>
    %521 = vector.extract_strided_slice %472 {offsets = [0, 16], sizes = [8, 8], strides = [1, 1]} : vector<8x32xf32> to vector<8x8xf32>
    %cst_204 = arith.constant dense<0.000000e+00> : vector<8x8xf32>
    %522 = tpu.matmul %520, %521, %cst_204 {dimension_numbers = #tpu.dot_dimension_numbers<[1], [0], [0], [1], [0, 0, 1, 1], [], []>} : vector<8x8xf32>, vector<8x8xf32>, vector<8x8xf32> -> vector<8x8xf32>
    %523 = vector.extract_strided_slice %469 {offsets = [16, 0], sizes = [8, 32], strides = [1, 1]} : vector<32x32xf32> to vector<8x32xf32>
    %cst_205 = arith.constant dense<0.000000e+00> : vector<8x32xf32>
    %524 = tpu.matmul %522, %523, %cst_205 {dimension_numbers = #tpu.dot_dimension_numbers<[1], [0], [0], [1], [0, 0, 1, 1], [], []>} : vector<8x8xf32>, vector<8x32xf32>, vector<8x32xf32> -> vector<8x32xf32>
    %525 = arith.addf %507, %524 : vector<8x32xf32>
    %526 = vector.extract_strided_slice %470 {offsets = [0, 24], sizes = [8, 8], strides = [1, 1]} : vector<8x32xf32> to vector<8x8xf32>
    %527 = vector.extract_strided_slice %471 {offsets = [0, 24], sizes = [8, 8], strides = [1, 1]} : vector<8x32xf32> to vector<8x8xf32>
    %cst_206 = arith.constant dense<0.000000e+00> : vector<8x8xf32>
    %528 = tpu.matmul %526, %527, %cst_206 {dimension_numbers = #tpu.dot_dimension_numbers<[1], [1], [0], [0], [0, 0, 1, 0], [], []>} : vector<8x8xf32>, vector<8x8xf32>, vector<8x8xf32> -> vector<8x8xf32>
    %cst_207 = arith.constant dense<0xFF800000> : vector<8xf32>
    %529 = vector.multi_reduction <maximumf>, %528, %cst_207 [1] : vector<8x8xf32> to vector<8xf32>
    %530 = vector.shape_cast %529 : vector<8xf32> to vector<8x1xf32>
    %531 = vector.broadcast %530 : vector<8x1xf32> to vector<8x8xf32>
    %532 = arith.subf %528, %531 : vector<8x8xf32>
    %533 = math.exp %532 : vector<8x8xf32>
    %cst_208 = arith.constant dense<0.000000e+00> : vector<8xf32>
    %534 = vector.multi_reduction <add>, %533, %cst_208 [1] : vector<8x8xf32> to vector<8xf32>
    %535 = vector.shape_cast %534 : vector<8xf32> to vector<8x1xf32>
    %536 = tpu.reciprocal %535 {approx = true} : vector<8x1xf32> -> vector<8x1xf32>
    %537 = vector.broadcast %536 : vector<8x1xf32> to vector<8x8xf32>
    %538 = arith.mulf %533, %537 : vector<8x8xf32>
    %539 = vector.extract_strided_slice %472 {offsets = [0, 24], sizes = [8, 8], strides = [1, 1]} : vector<8x32xf32> to vector<8x8xf32>
    %cst_209 = arith.constant dense<0.000000e+00> : vector<8x8xf32>
    %540 = tpu.matmul %538, %539, %cst_209 {dimension_numbers = #tpu.dot_dimension_numbers<[1], [0], [0], [1], [0, 0, 1, 1], [], []>} : vector<8x8xf32>, vector<8x8xf32>, vector<8x8xf32> -> vector<8x8xf32>
    %541 = vector.extract_strided_slice %469 {offsets = [24, 0], sizes = [8, 32], strides = [1, 1]} : vector<32x32xf32> to vector<8x32xf32>
    %cst_210 = arith.constant dense<0.000000e+00> : vector<8x32xf32>
    %542 = tpu.matmul %540, %541, %cst_210 {dimension_numbers = #tpu.dot_dimension_numbers<[1], [0], [0], [1], [0, 0, 1, 1], [], []>} : vector<8x8xf32>, vector<8x32xf32>, vector<8x32xf32> -> vector<8x32xf32>
    %543 = arith.addf %525, %542 : vector<8x32xf32>
    %544 = vector.extract_strided_slice %459 {offsets = [8, 0], sizes = [8, 32], strides = [1, 1]} : vector<16x32xf32> to vector<8x32xf32>
    %545 = vector.extract_strided_slice %462 {offsets = [8, 0], sizes = [8, 32], strides = [1, 1]} : vector<16x32xf32> to vector<8x32xf32>
    %546 = vector.extract_strided_slice %467 {offsets = [8, 0], sizes = [8, 32], strides = [1, 1]} : vector<16x32xf32> to vector<8x32xf32>
    %547 = vector.extract_strided_slice %544 {offsets = [0, 0], sizes = [8, 8], strides = [1, 1]} : vector<8x32xf32> to vector<8x8xf32>
    %548 = vector.extract_strided_slice %545 {offsets = [0, 0], sizes = [8, 8], strides = [1, 1]} : vector<8x32xf32> to vector<8x8xf32>
    %cst_211 = arith.constant dense<0.000000e+00> : vector<8x8xf32>
    %549 = tpu.matmul %547, %548, %cst_211 {dimension_numbers = #tpu.dot_dimension_numbers<[1], [1], [0], [0], [0, 0, 1, 0], [], []>} : vector<8x8xf32>, vector<8x8xf32>, vector<8x8xf32> -> vector<8x8xf32>
    %cst_212 = arith.constant dense<0xFF800000> : vector<8xf32>
    %550 = vector.multi_reduction <maximumf>, %549, %cst_212 [1] : vector<8x8xf32> to vector<8xf32>
    %551 = vector.shape_cast %550 : vector<8xf32> to vector<8x1xf32>
    %552 = vector.broadcast %551 : vector<8x1xf32> to vector<8x8xf32>
    %553 = arith.subf %549, %552 : vector<8x8xf32>
    %554 = math.exp %553 : vector<8x8xf32>
    %cst_213 = arith.constant dense<0.000000e+00> : vector<8xf32>
    %555 = vector.multi_reduction <add>, %554, %cst_213 [1] : vector<8x8xf32> to vector<8xf32>
    %556 = vector.shape_cast %555 : vector<8xf32> to vector<8x1xf32>
    %557 = tpu.reciprocal %556 {approx = true} : vector<8x1xf32> -> vector<8x1xf32>
    %558 = vector.broadcast %557 : vector<8x1xf32> to vector<8x8xf32>
    %559 = arith.mulf %554, %558 : vector<8x8xf32>
    %560 = vector.extract_strided_slice %546 {offsets = [0, 0], sizes = [8, 8], strides = [1, 1]} : vector<8x32xf32> to vector<8x8xf32>
    %cst_214 = arith.constant dense<0.000000e+00> : vector<8x8xf32>
    %561 = tpu.matmul %559, %560, %cst_214 {dimension_numbers = #tpu.dot_dimension_numbers<[1], [0], [0], [1], [0, 0, 1, 1], [], []>} : vector<8x8xf32>, vector<8x8xf32>, vector<8x8xf32> -> vector<8x8xf32>
    %562 = vector.extract_strided_slice %469 {offsets = [0, 0], sizes = [8, 32], strides = [1, 1]} : vector<32x32xf32> to vector<8x32xf32>
    %cst_215 = arith.constant dense<0.000000e+00> : vector<8x32xf32>
    %563 = tpu.matmul %561, %562, %cst_215 {dimension_numbers = #tpu.dot_dimension_numbers<[1], [0], [0], [1], [0, 0, 1, 1], [], []>} : vector<8x8xf32>, vector<8x32xf32>, vector<8x32xf32> -> vector<8x32xf32>
    %564 = vector.extract_strided_slice %544 {offsets = [0, 8], sizes = [8, 8], strides = [1, 1]} : vector<8x32xf32> to vector<8x8xf32>
    %565 = vector.extract_strided_slice %545 {offsets = [0, 8], sizes = [8, 8], strides = [1, 1]} : vector<8x32xf32> to vector<8x8xf32>
    %cst_216 = arith.constant dense<0.000000e+00> : vector<8x8xf32>
    %566 = tpu.matmul %564, %565, %cst_216 {dimension_numbers = #tpu.dot_dimension_numbers<[1], [1], [0], [0], [0, 0, 1, 0], [], []>} : vector<8x8xf32>, vector<8x8xf32>, vector<8x8xf32> -> vector<8x8xf32>
    %cst_217 = arith.constant dense<0xFF800000> : vector<8xf32>
    %567 = vector.multi_reduction <maximumf>, %566, %cst_217 [1] : vector<8x8xf32> to vector<8xf32>
    %568 = vector.shape_cast %567 : vector<8xf32> to vector<8x1xf32>
    %569 = vector.broadcast %568 : vector<8x1xf32> to vector<8x8xf32>
    %570 = arith.subf %566, %569 : vector<8x8xf32>
    %571 = math.exp %570 : vector<8x8xf32>
    %cst_218 = arith.constant dense<0.000000e+00> : vector<8xf32>
    %572 = vector.multi_reduction <add>, %571, %cst_218 [1] : vector<8x8xf32> to vector<8xf32>
    %573 = vector.shape_cast %572 : vector<8xf32> to vector<8x1xf32>
    %574 = tpu.reciprocal %573 {approx = true} : vector<8x1xf32> -> vector<8x1xf32>
    %575 = vector.broadcast %574 : vector<8x1xf32> to vector<8x8xf32>
    %576 = arith.mulf %571, %575 : vector<8x8xf32>
    %577 = vector.extract_strided_slice %546 {offsets = [0, 8], sizes = [8, 8], strides = [1, 1]} : vector<8x32xf32> to vector<8x8xf32>
    %cst_219 = arith.constant dense<0.000000e+00> : vector<8x8xf32>
    %578 = tpu.matmul %576, %577, %cst_219 {dimension_numbers = #tpu.dot_dimension_numbers<[1], [0], [0], [1], [0, 0, 1, 1], [], []>} : vector<8x8xf32>, vector<8x8xf32>, vector<8x8xf32> -> vector<8x8xf32>
    %579 = vector.extract_strided_slice %469 {offsets = [8, 0], sizes = [8, 32], strides = [1, 1]} : vector<32x32xf32> to vector<8x32xf32>
    %cst_220 = arith.constant dense<0.000000e+00> : vector<8x32xf32>
    %580 = tpu.matmul %578, %579, %cst_220 {dimension_numbers = #tpu.dot_dimension_numbers<[1], [0], [0], [1], [0, 0, 1, 1], [], []>} : vector<8x8xf32>, vector<8x32xf32>, vector<8x32xf32> -> vector<8x32xf32>
    %581 = arith.addf %563, %580 : vector<8x32xf32>
    %582 = vector.extract_strided_slice %544 {offsets = [0, 16], sizes = [8, 8], strides = [1, 1]} : vector<8x32xf32> to vector<8x8xf32>
    %583 = vector.extract_strided_slice %545 {offsets = [0, 16], sizes = [8, 8], strides = [1, 1]} : vector<8x32xf32> to vector<8x8xf32>
    %cst_221 = arith.constant dense<0.000000e+00> : vector<8x8xf32>
    %584 = tpu.matmul %582, %583, %cst_221 {dimension_numbers = #tpu.dot_dimension_numbers<[1], [1], [0], [0], [0, 0, 1, 0], [], []>} : vector<8x8xf32>, vector<8x8xf32>, vector<8x8xf32> -> vector<8x8xf32>
    %cst_222 = arith.constant dense<0xFF800000> : vector<8xf32>
    %585 = vector.multi_reduction <maximumf>, %584, %cst_222 [1] : vector<8x8xf32> to vector<8xf32>
    %586 = vector.shape_cast %585 : vector<8xf32> to vector<8x1xf32>
    %587 = vector.broadcast %586 : vector<8x1xf32> to vector<8x8xf32>
    %588 = arith.subf %584, %587 : vector<8x8xf32>
    %589 = math.exp %588 : vector<8x8xf32>
    %cst_223 = arith.constant dense<0.000000e+00> : vector<8xf32>
    %590 = vector.multi_reduction <add>, %589, %cst_223 [1] : vector<8x8xf32> to vector<8xf32>
    %591 = vector.shape_cast %590 : vector<8xf32> to vector<8x1xf32>
    %592 = tpu.reciprocal %591 {approx = true} : vector<8x1xf32> -> vector<8x1xf32>
    %593 = vector.broadcast %592 : vector<8x1xf32> to vector<8x8xf32>
    %594 = arith.mulf %589, %593 : vector<8x8xf32>
    %595 = vector.extract_strided_slice %546 {offsets = [0, 16], sizes = [8, 8], strides = [1, 1]} : vector<8x32xf32> to vector<8x8xf32>
    %cst_224 = arith.constant dense<0.000000e+00> : vector<8x8xf32>
    %596 = tpu.matmul %594, %595, %cst_224 {dimension_numbers = #tpu.dot_dimension_numbers<[1], [0], [0], [1], [0, 0, 1, 1], [], []>} : vector<8x8xf32>, vector<8x8xf32>, vector<8x8xf32> -> vector<8x8xf32>
    %597 = vector.extract_strided_slice %469 {offsets = [16, 0], sizes = [8, 32], strides = [1, 1]} : vector<32x32xf32> to vector<8x32xf32>
    %cst_225 = arith.constant dense<0.000000e+00> : vector<8x32xf32>
    %598 = tpu.matmul %596, %597, %cst_225 {dimension_numbers = #tpu.dot_dimension_numbers<[1], [0], [0], [1], [0, 0, 1, 1], [], []>} : vector<8x8xf32>, vector<8x32xf32>, vector<8x32xf32> -> vector<8x32xf32>
    %599 = arith.addf %581, %598 : vector<8x32xf32>
    %600 = vector.extract_strided_slice %544 {offsets = [0, 24], sizes = [8, 8], strides = [1, 1]} : vector<8x32xf32> to vector<8x8xf32>
    %601 = vector.extract_strided_slice %545 {offsets = [0, 24], sizes = [8, 8], strides = [1, 1]} : vector<8x32xf32> to vector<8x8xf32>
    %cst_226 = arith.constant dense<0.000000e+00> : vector<8x8xf32>
    %602 = tpu.matmul %600, %601, %cst_226 {dimension_numbers = #tpu.dot_dimension_numbers<[1], [1], [0], [0], [0, 0, 1, 0], [], []>} : vector<8x8xf32>, vector<8x8xf32>, vector<8x8xf32> -> vector<8x8xf32>
    %cst_227 = arith.constant dense<0xFF800000> : vector<8xf32>
    %603 = vector.multi_reduction <maximumf>, %602, %cst_227 [1] : vector<8x8xf32> to vector<8xf32>
    %604 = vector.shape_cast %603 : vector<8xf32> to vector<8x1xf32>
    %605 = vector.broadcast %604 : vector<8x1xf32> to vector<8x8xf32>
    %606 = arith.subf %602, %605 : vector<8x8xf32>
    %607 = math.exp %606 : vector<8x8xf32>
    %cst_228 = arith.constant dense<0.000000e+00> : vector<8xf32>
    %608 = vector.multi_reduction <add>, %607, %cst_228 [1] : vector<8x8xf32> to vector<8xf32>
    %609 = vector.shape_cast %608 : vector<8xf32> to vector<8x1xf32>
    %610 = tpu.reciprocal %609 {approx = true} : vector<8x1xf32> -> vector<8x1xf32>
    %611 = vector.broadcast %610 : vector<8x1xf32> to vector<8x8xf32>
    %612 = arith.mulf %607, %611 : vector<8x8xf32>
    %613 = vector.extract_strided_slice %546 {offsets = [0, 24], sizes = [8, 8], strides = [1, 1]} : vector<8x32xf32> to vector<8x8xf32>
    %cst_229 = arith.constant dense<0.000000e+00> : vector<8x8xf32>
    %614 = tpu.matmul %612, %613, %cst_229 {dimension_numbers = #tpu.dot_dimension_numbers<[1], [0], [0], [1], [0, 0, 1, 1], [], []>} : vector<8x8xf32>, vector<8x8xf32>, vector<8x8xf32> -> vector<8x8xf32>
    %615 = vector.extract_strided_slice %469 {offsets = [24, 0], sizes = [8, 32], strides = [1, 1]} : vector<32x32xf32> to vector<8x32xf32>
    %cst_230 = arith.constant dense<0.000000e+00> : vector<8x32xf32>
    %616 = tpu.matmul %614, %615, %cst_230 {dimension_numbers = #tpu.dot_dimension_numbers<[1], [0], [0], [1], [0, 0, 1, 1], [], []>} : vector<8x8xf32>, vector<8x32xf32>, vector<8x32xf32> -> vector<8x32xf32>
    %617 = arith.addf %599, %616 : vector<8x32xf32>
    %618 = tpu.concatenate %543, %617 in 0 : vector<8x32xf32>, vector<8x32xf32> -> vector<16x32xf32>
    %619 = vector.broadcast %454 : vector<1x32xf32> to vector<16x32xf32>
    %620 = arith.addf %618, %619 : vector<16x32xf32>
    %621 = arith.addf %447, %620 : vector<16x32xf32>
    %c20 = arith.constant 20 : index
    %c0_231 = arith.constant 0 : index
    %c0_232 = arith.constant 0 : index
    %622 = vector.load %arg7[%c20, %c0_231, %c0_232] : memref<28x1x32xf32, #tpu.memory_space<vmem>>, vector<1x1x32xf32>
    %623 = vector.shape_cast %622 : vector<1x1x32xf32> to vector<1x32xf32>
    %c21 = arith.constant 21 : index
    %c0_233 = arith.constant 0 : index
    %c0_234 = arith.constant 0 : index
    %624 = vector.load %arg7[%c21, %c0_233, %c0_234] : memref<28x1x32xf32, #tpu.memory_space<vmem>>, vector<1x1x32xf32>
    %625 = vector.shape_cast %624 : vector<1x1x32xf32> to vector<1x32xf32>
    %cst_235 = arith.constant dense<0.000000e+00> : vector<16xf32>
    %626 = vector.multi_reduction <add>, %621, %cst_235 [1] : vector<16x32xf32> to vector<16xf32>
    %627 = vector.shape_cast %626 : vector<16xf32> to vector<16x1xf32>
    %cst_236 = arith.constant 3.200000e+01 : f32
    %628 = vector.broadcast %cst_236 : f32 to vector<16x1xf32>
    %629 = arith.divf %627, %628 : vector<16x1xf32>
    %630 = vector.broadcast %629 : vector<16x1xf32> to vector<16x32xf32>
    %631 = arith.subf %621, %630 : vector<16x32xf32>
    %632 = arith.mulf %631, %631 : vector<16x32xf32>
    %cst_237 = arith.constant dense<0.000000e+00> : vector<16xf32>
    %633 = vector.multi_reduction <add>, %632, %cst_237 [1] : vector<16x32xf32> to vector<16xf32>
    %634 = vector.shape_cast %633 : vector<16xf32> to vector<16x1xf32>
    %cst_238 = arith.constant 3.200000e+01 : f32
    %635 = vector.broadcast %cst_238 : f32 to vector<16x1xf32>
    %636 = arith.divf %634, %635 : vector<16x1xf32>
    %637 = vector.broadcast %629 : vector<16x1xf32> to vector<16x32xf32>
    %638 = arith.subf %621, %637 : vector<16x32xf32>
    %cst_239 = arith.constant 9.99999974E-6 : f32
    %639 = vector.broadcast %cst_239 : f32 to vector<16x1xf32>
    %640 = arith.addf %636, %639 : vector<16x1xf32>
    %641 = math.rsqrt %640 : vector<16x1xf32>
    %642 = vector.broadcast %641 : vector<16x1xf32> to vector<16x32xf32>
    %643 = arith.mulf %638, %642 : vector<16x32xf32>
    %644 = vector.broadcast %623 : vector<1x32xf32> to vector<16x32xf32>
    %645 = arith.mulf %643, %644 : vector<16x32xf32>
    %646 = vector.broadcast %625 : vector<1x32xf32> to vector<16x32xf32>
    %647 = arith.addf %645, %646 : vector<16x32xf32>
    %648 = arith.addf %647, %2 : vector<16x32xf32>
    %c16 = arith.constant 16 : index
    %c0_240 = arith.constant 0 : index
    %c0_241 = arith.constant 0 : index
    %649 = vector.load %arg7[%c16, %c0_240, %c0_241] : memref<28x1x32xf32, #tpu.memory_space<vmem>>, vector<1x1x32xf32>
    %650 = vector.shape_cast %649 : vector<1x1x32xf32> to vector<1x32xf32>
    %c17 = arith.constant 17 : index
    %c0_242 = arith.constant 0 : index
    %c0_243 = arith.constant 0 : index
    %651 = vector.load %arg7[%c17, %c0_242, %c0_243] : memref<28x1x32xf32, #tpu.memory_space<vmem>>, vector<1x1x32xf32>
    %652 = vector.shape_cast %651 : vector<1x1x32xf32> to vector<1x32xf32>
    %c18 = arith.constant 18 : index
    %c0_244 = arith.constant 0 : index
    %c0_245 = arith.constant 0 : index
    %653 = vector.load %arg7[%c18, %c0_244, %c0_245] : memref<28x1x32xf32, #tpu.memory_space<vmem>>, vector<1x1x32xf32>
    %654 = vector.shape_cast %653 : vector<1x1x32xf32> to vector<1x32xf32>
    %c12_246 = arith.constant 12 : index
    %c0_247 = arith.constant 0 : index
    %c0_248 = arith.constant 0 : index
    %655 = vector.load %arg4[%c12_246, %c0_247, %c0_248] : memref<16x32x32xf32, #tpu.memory_space<vmem>>, vector<1x32x32xf32>
    %656 = vector.shape_cast %655 : vector<1x32x32xf32> to vector<32x32xf32>
    %cst_249 = arith.constant dense<0.000000e+00> : vector<16x32xf32>
    %657 = tpu.matmul %648, %656, %cst_249 {dimension_numbers = #tpu.dot_dimension_numbers<[1], [0], [0], [1], [0, 0, 1, 1], [], []>} : vector<16x32xf32>, vector<32x32xf32>, vector<16x32xf32> -> vector<16x32xf32>
    %658 = vector.broadcast %650 : vector<1x32xf32> to vector<16x32xf32>
    %659 = arith.addf %657, %658 : vector<16x32xf32>
    %c13_250 = arith.constant 13 : index
    %c0_251 = arith.constant 0 : index
    %c0_252 = arith.constant 0 : index
    %660 = vector.load %arg4[%c13_250, %c0_251, %c0_252] : memref<16x32x32xf32, #tpu.memory_space<vmem>>, vector<1x32x32xf32>
    %661 = vector.shape_cast %660 : vector<1x32x32xf32> to vector<32x32xf32>
    %cst_253 = arith.constant dense<0.000000e+00> : vector<32x32xf32>
    %662 = tpu.matmul %4, %661, %cst_253 {dimension_numbers = #tpu.dot_dimension_numbers<[1], [0], [0], [1], [0, 0, 1, 1], [], []>} : vector<32x32xf32>, vector<32x32xf32>, vector<32x32xf32> -> vector<32x32xf32>
    %c14_254 = arith.constant 14 : index
    %c0_255 = arith.constant 0 : index
    %c0_256 = arith.constant 0 : index
    %663 = vector.load %arg4[%c14_254, %c0_255, %c0_256] : memref<16x32x32xf32, #tpu.memory_space<vmem>>, vector<1x32x32xf32>
    %664 = vector.shape_cast %663 : vector<1x32x32xf32> to vector<32x32xf32>
    %cst_257 = arith.constant dense<0.000000e+00> : vector<32x32xf32>
    %665 = tpu.matmul %1, %664, %cst_257 {dimension_numbers = #tpu.dot_dimension_numbers<[1], [0], [0], [1], [0, 0, 1, 1], [], []>} : vector<32x32xf32>, vector<32x32xf32>, vector<32x32xf32> -> vector<32x32xf32>
    %666 = vector.broadcast %652 : vector<1x32xf32> to vector<32x32xf32>
    %667 = arith.addf %665, %666 : vector<32x32xf32>
    %c15_258 = arith.constant 15 : index
    %c0_259 = arith.constant 0 : index
    %c0_260 = arith.constant 0 : index
    %668 = vector.load %arg4[%c15_258, %c0_259, %c0_260] : memref<16x32x32xf32, #tpu.memory_space<vmem>>, vector<1x32x32xf32>
    %669 = vector.shape_cast %668 : vector<1x32x32xf32> to vector<32x32xf32>
    %670 = vector.extract_strided_slice %659 {offsets = [0, 0], sizes = [8, 32], strides = [1, 1]} : vector<16x32xf32> to vector<8x32xf32>
    %671 = vector.extract_strided_slice %662 {offsets = [0, 0], sizes = [16, 32], strides = [1, 1]} : vector<32x32xf32> to vector<16x32xf32>
    %672 = vector.extract_strided_slice %667 {offsets = [0, 0], sizes = [16, 32], strides = [1, 1]} : vector<32x32xf32> to vector<16x32xf32>
    %673 = vector.extract_strided_slice %670 {offsets = [0, 0], sizes = [8, 8], strides = [1, 1]} : vector<8x32xf32> to vector<8x8xf32>
    %674 = vector.extract_strided_slice %671 {offsets = [0, 0], sizes = [16, 8], strides = [1, 1]} : vector<16x32xf32> to vector<16x8xf32>
    %cst_261 = arith.constant dense<0.000000e+00> : vector<8x16xf32>
    %675 = tpu.matmul %673, %674, %cst_261 {dimension_numbers = #tpu.dot_dimension_numbers<[1], [1], [0], [0], [0, 0, 1, 0], [], []>} : vector<8x8xf32>, vector<16x8xf32>, vector<8x16xf32> -> vector<8x16xf32>
    %cst_262 = arith.constant dense<0xFF800000> : vector<8xf32>
    %676 = vector.multi_reduction <maximumf>, %675, %cst_262 [1] : vector<8x16xf32> to vector<8xf32>
    %677 = vector.shape_cast %676 : vector<8xf32> to vector<8x1xf32>
    %678 = vector.broadcast %677 : vector<8x1xf32> to vector<8x16xf32>
    %679 = arith.subf %675, %678 : vector<8x16xf32>
    %680 = math.exp %679 : vector<8x16xf32>
    %cst_263 = arith.constant dense<0.000000e+00> : vector<8xf32>
    %681 = vector.multi_reduction <add>, %680, %cst_263 [1] : vector<8x16xf32> to vector<8xf32>
    %682 = vector.shape_cast %681 : vector<8xf32> to vector<8x1xf32>
    %683 = tpu.reciprocal %682 {approx = true} : vector<8x1xf32> -> vector<8x1xf32>
    %684 = vector.broadcast %683 : vector<8x1xf32> to vector<8x16xf32>
    %685 = arith.mulf %680, %684 : vector<8x16xf32>
    %686 = vector.extract_strided_slice %672 {offsets = [0, 0], sizes = [16, 8], strides = [1, 1]} : vector<16x32xf32> to vector<16x8xf32>
    %cst_264 = arith.constant dense<0.000000e+00> : vector<8x8xf32>
    %687 = tpu.matmul %685, %686, %cst_264 {dimension_numbers = #tpu.dot_dimension_numbers<[1], [0], [0], [1], [0, 0, 1, 1], [], []>} : vector<8x16xf32>, vector<16x8xf32>, vector<8x8xf32> -> vector<8x8xf32>
    %688 = vector.extract_strided_slice %669 {offsets = [0, 0], sizes = [8, 32], strides = [1, 1]} : vector<32x32xf32> to vector<8x32xf32>
    %cst_265 = arith.constant dense<0.000000e+00> : vector<8x32xf32>
    %689 = tpu.matmul %687, %688, %cst_265 {dimension_numbers = #tpu.dot_dimension_numbers<[1], [0], [0], [1], [0, 0, 1, 1], [], []>} : vector<8x8xf32>, vector<8x32xf32>, vector<8x32xf32> -> vector<8x32xf32>
    %690 = vector.extract_strided_slice %670 {offsets = [0, 8], sizes = [8, 8], strides = [1, 1]} : vector<8x32xf32> to vector<8x8xf32>
    %691 = vector.extract_strided_slice %671 {offsets = [0, 8], sizes = [16, 8], strides = [1, 1]} : vector<16x32xf32> to vector<16x8xf32>
    %cst_266 = arith.constant dense<0.000000e+00> : vector<8x16xf32>
    %692 = tpu.matmul %690, %691, %cst_266 {dimension_numbers = #tpu.dot_dimension_numbers<[1], [1], [0], [0], [0, 0, 1, 0], [], []>} : vector<8x8xf32>, vector<16x8xf32>, vector<8x16xf32> -> vector<8x16xf32>
    %cst_267 = arith.constant dense<0xFF800000> : vector<8xf32>
    %693 = vector.multi_reduction <maximumf>, %692, %cst_267 [1] : vector<8x16xf32> to vector<8xf32>
    %694 = vector.shape_cast %693 : vector<8xf32> to vector<8x1xf32>
    %695 = vector.broadcast %694 : vector<8x1xf32> to vector<8x16xf32>
    %696 = arith.subf %692, %695 : vector<8x16xf32>
    %697 = math.exp %696 : vector<8x16xf32>
    %cst_268 = arith.constant dense<0.000000e+00> : vector<8xf32>
    %698 = vector.multi_reduction <add>, %697, %cst_268 [1] : vector<8x16xf32> to vector<8xf32>
    %699 = vector.shape_cast %698 : vector<8xf32> to vector<8x1xf32>
    %700 = tpu.reciprocal %699 {approx = true} : vector<8x1xf32> -> vector<8x1xf32>
    %701 = vector.broadcast %700 : vector<8x1xf32> to vector<8x16xf32>
    %702 = arith.mulf %697, %701 : vector<8x16xf32>
    %703 = vector.extract_strided_slice %672 {offsets = [0, 8], sizes = [16, 8], strides = [1, 1]} : vector<16x32xf32> to vector<16x8xf32>
    %cst_269 = arith.constant dense<0.000000e+00> : vector<8x8xf32>
    %704 = tpu.matmul %702, %703, %cst_269 {dimension_numbers = #tpu.dot_dimension_numbers<[1], [0], [0], [1], [0, 0, 1, 1], [], []>} : vector<8x16xf32>, vector<16x8xf32>, vector<8x8xf32> -> vector<8x8xf32>
    %705 = vector.extract_strided_slice %669 {offsets = [8, 0], sizes = [8, 32], strides = [1, 1]} : vector<32x32xf32> to vector<8x32xf32>
    %cst_270 = arith.constant dense<0.000000e+00> : vector<8x32xf32>
    %706 = tpu.matmul %704, %705, %cst_270 {dimension_numbers = #tpu.dot_dimension_numbers<[1], [0], [0], [1], [0, 0, 1, 1], [], []>} : vector<8x8xf32>, vector<8x32xf32>, vector<8x32xf32> -> vector<8x32xf32>
    %707 = arith.addf %689, %706 : vector<8x32xf32>
    %708 = vector.extract_strided_slice %670 {offsets = [0, 16], sizes = [8, 8], strides = [1, 1]} : vector<8x32xf32> to vector<8x8xf32>
    %709 = vector.extract_strided_slice %671 {offsets = [0, 16], sizes = [16, 8], strides = [1, 1]} : vector<16x32xf32> to vector<16x8xf32>
    %cst_271 = arith.constant dense<0.000000e+00> : vector<8x16xf32>
    %710 = tpu.matmul %708, %709, %cst_271 {dimension_numbers = #tpu.dot_dimension_numbers<[1], [1], [0], [0], [0, 0, 1, 0], [], []>} : vector<8x8xf32>, vector<16x8xf32>, vector<8x16xf32> -> vector<8x16xf32>
    %cst_272 = arith.constant dense<0xFF800000> : vector<8xf32>
    %711 = vector.multi_reduction <maximumf>, %710, %cst_272 [1] : vector<8x16xf32> to vector<8xf32>
    %712 = vector.shape_cast %711 : vector<8xf32> to vector<8x1xf32>
    %713 = vector.broadcast %712 : vector<8x1xf32> to vector<8x16xf32>
    %714 = arith.subf %710, %713 : vector<8x16xf32>
    %715 = math.exp %714 : vector<8x16xf32>
    %cst_273 = arith.constant dense<0.000000e+00> : vector<8xf32>
    %716 = vector.multi_reduction <add>, %715, %cst_273 [1] : vector<8x16xf32> to vector<8xf32>
    %717 = vector.shape_cast %716 : vector<8xf32> to vector<8x1xf32>
    %718 = tpu.reciprocal %717 {approx = true} : vector<8x1xf32> -> vector<8x1xf32>
    %719 = vector.broadcast %718 : vector<8x1xf32> to vector<8x16xf32>
    %720 = arith.mulf %715, %719 : vector<8x16xf32>
    %721 = vector.extract_strided_slice %672 {offsets = [0, 16], sizes = [16, 8], strides = [1, 1]} : vector<16x32xf32> to vector<16x8xf32>
    %cst_274 = arith.constant dense<0.000000e+00> : vector<8x8xf32>
    %722 = tpu.matmul %720, %721, %cst_274 {dimension_numbers = #tpu.dot_dimension_numbers<[1], [0], [0], [1], [0, 0, 1, 1], [], []>} : vector<8x16xf32>, vector<16x8xf32>, vector<8x8xf32> -> vector<8x8xf32>
    %723 = vector.extract_strided_slice %669 {offsets = [16, 0], sizes = [8, 32], strides = [1, 1]} : vector<32x32xf32> to vector<8x32xf32>
    %cst_275 = arith.constant dense<0.000000e+00> : vector<8x32xf32>
    %724 = tpu.matmul %722, %723, %cst_275 {dimension_numbers = #tpu.dot_dimension_numbers<[1], [0], [0], [1], [0, 0, 1, 1], [], []>} : vector<8x8xf32>, vector<8x32xf32>, vector<8x32xf32> -> vector<8x32xf32>
    %725 = arith.addf %707, %724 : vector<8x32xf32>
    %726 = vector.extract_strided_slice %670 {offsets = [0, 24], sizes = [8, 8], strides = [1, 1]} : vector<8x32xf32> to vector<8x8xf32>
    %727 = vector.extract_strided_slice %671 {offsets = [0, 24], sizes = [16, 8], strides = [1, 1]} : vector<16x32xf32> to vector<16x8xf32>
    %cst_276 = arith.constant dense<0.000000e+00> : vector<8x16xf32>
    %728 = tpu.matmul %726, %727, %cst_276 {dimension_numbers = #tpu.dot_dimension_numbers<[1], [1], [0], [0], [0, 0, 1, 0], [], []>} : vector<8x8xf32>, vector<16x8xf32>, vector<8x16xf32> -> vector<8x16xf32>
    %cst_277 = arith.constant dense<0xFF800000> : vector<8xf32>
    %729 = vector.multi_reduction <maximumf>, %728, %cst_277 [1] : vector<8x16xf32> to vector<8xf32>
    %730 = vector.shape_cast %729 : vector<8xf32> to vector<8x1xf32>
    %731 = vector.broadcast %730 : vector<8x1xf32> to vector<8x16xf32>
    %732 = arith.subf %728, %731 : vector<8x16xf32>
    %733 = math.exp %732 : vector<8x16xf32>
    %cst_278 = arith.constant dense<0.000000e+00> : vector<8xf32>
    %734 = vector.multi_reduction <add>, %733, %cst_278 [1] : vector<8x16xf32> to vector<8xf32>
    %735 = vector.shape_cast %734 : vector<8xf32> to vector<8x1xf32>
    %736 = tpu.reciprocal %735 {approx = true} : vector<8x1xf32> -> vector<8x1xf32>
    %737 = vector.broadcast %736 : vector<8x1xf32> to vector<8x16xf32>
    %738 = arith.mulf %733, %737 : vector<8x16xf32>
    %739 = vector.extract_strided_slice %672 {offsets = [0, 24], sizes = [16, 8], strides = [1, 1]} : vector<16x32xf32> to vector<16x8xf32>
    %cst_279 = arith.constant dense<0.000000e+00> : vector<8x8xf32>
    %740 = tpu.matmul %738, %739, %cst_279 {dimension_numbers = #tpu.dot_dimension_numbers<[1], [0], [0], [1], [0, 0, 1, 1], [], []>} : vector<8x16xf32>, vector<16x8xf32>, vector<8x8xf32> -> vector<8x8xf32>
    %741 = vector.extract_strided_slice %669 {offsets = [24, 0], sizes = [8, 32], strides = [1, 1]} : vector<32x32xf32> to vector<8x32xf32>
    %cst_280 = arith.constant dense<0.000000e+00> : vector<8x32xf32>
    %742 = tpu.matmul %740, %741, %cst_280 {dimension_numbers = #tpu.dot_dimension_numbers<[1], [0], [0], [1], [0, 0, 1, 1], [], []>} : vector<8x8xf32>, vector<8x32xf32>, vector<8x32xf32> -> vector<8x32xf32>
    %743 = arith.addf %725, %742 : vector<8x32xf32>
    %744 = vector.extract_strided_slice %659 {offsets = [8, 0], sizes = [8, 32], strides = [1, 1]} : vector<16x32xf32> to vector<8x32xf32>
    %745 = vector.extract_strided_slice %662 {offsets = [16, 0], sizes = [16, 32], strides = [1, 1]} : vector<32x32xf32> to vector<16x32xf32>
    %746 = vector.extract_strided_slice %667 {offsets = [16, 0], sizes = [16, 32], strides = [1, 1]} : vector<32x32xf32> to vector<16x32xf32>
    %747 = vector.extract_strided_slice %744 {offsets = [0, 0], sizes = [8, 8], strides = [1, 1]} : vector<8x32xf32> to vector<8x8xf32>
    %748 = vector.extract_strided_slice %745 {offsets = [0, 0], sizes = [16, 8], strides = [1, 1]} : vector<16x32xf32> to vector<16x8xf32>
    %cst_281 = arith.constant dense<0.000000e+00> : vector<8x16xf32>
    %749 = tpu.matmul %747, %748, %cst_281 {dimension_numbers = #tpu.dot_dimension_numbers<[1], [1], [0], [0], [0, 0, 1, 0], [], []>} : vector<8x8xf32>, vector<16x8xf32>, vector<8x16xf32> -> vector<8x16xf32>
    %cst_282 = arith.constant dense<0xFF800000> : vector<8xf32>
    %750 = vector.multi_reduction <maximumf>, %749, %cst_282 [1] : vector<8x16xf32> to vector<8xf32>
    %751 = vector.shape_cast %750 : vector<8xf32> to vector<8x1xf32>
    %752 = vector.broadcast %751 : vector<8x1xf32> to vector<8x16xf32>
    %753 = arith.subf %749, %752 : vector<8x16xf32>
    %754 = math.exp %753 : vector<8x16xf32>
    %cst_283 = arith.constant dense<0.000000e+00> : vector<8xf32>
    %755 = vector.multi_reduction <add>, %754, %cst_283 [1] : vector<8x16xf32> to vector<8xf32>
    %756 = vector.shape_cast %755 : vector<8xf32> to vector<8x1xf32>
    %757 = tpu.reciprocal %756 {approx = true} : vector<8x1xf32> -> vector<8x1xf32>
    %758 = vector.broadcast %757 : vector<8x1xf32> to vector<8x16xf32>
    %759 = arith.mulf %754, %758 : vector<8x16xf32>
    %760 = vector.extract_strided_slice %746 {offsets = [0, 0], sizes = [16, 8], strides = [1, 1]} : vector<16x32xf32> to vector<16x8xf32>
    %cst_284 = arith.constant dense<0.000000e+00> : vector<8x8xf32>
    %761 = tpu.matmul %759, %760, %cst_284 {dimension_numbers = #tpu.dot_dimension_numbers<[1], [0], [0], [1], [0, 0, 1, 1], [], []>} : vector<8x16xf32>, vector<16x8xf32>, vector<8x8xf32> -> vector<8x8xf32>
    %762 = vector.extract_strided_slice %669 {offsets = [0, 0], sizes = [8, 32], strides = [1, 1]} : vector<32x32xf32> to vector<8x32xf32>
    %cst_285 = arith.constant dense<0.000000e+00> : vector<8x32xf32>
    %763 = tpu.matmul %761, %762, %cst_285 {dimension_numbers = #tpu.dot_dimension_numbers<[1], [0], [0], [1], [0, 0, 1, 1], [], []>} : vector<8x8xf32>, vector<8x32xf32>, vector<8x32xf32> -> vector<8x32xf32>
    %764 = vector.extract_strided_slice %744 {offsets = [0, 8], sizes = [8, 8], strides = [1, 1]} : vector<8x32xf32> to vector<8x8xf32>
    %765 = vector.extract_strided_slice %745 {offsets = [0, 8], sizes = [16, 8], strides = [1, 1]} : vector<16x32xf32> to vector<16x8xf32>
    %cst_286 = arith.constant dense<0.000000e+00> : vector<8x16xf32>
    %766 = tpu.matmul %764, %765, %cst_286 {dimension_numbers = #tpu.dot_dimension_numbers<[1], [1], [0], [0], [0, 0, 1, 0], [], []>} : vector<8x8xf32>, vector<16x8xf32>, vector<8x16xf32> -> vector<8x16xf32>
    %cst_287 = arith.constant dense<0xFF800000> : vector<8xf32>
    %767 = vector.multi_reduction <maximumf>, %766, %cst_287 [1] : vector<8x16xf32> to vector<8xf32>
    %768 = vector.shape_cast %767 : vector<8xf32> to vector<8x1xf32>
    %769 = vector.broadcast %768 : vector<8x1xf32> to vector<8x16xf32>
    %770 = arith.subf %766, %769 : vector<8x16xf32>
    %771 = math.exp %770 : vector<8x16xf32>
    %cst_288 = arith.constant dense<0.000000e+00> : vector<8xf32>
    %772 = vector.multi_reduction <add>, %771, %cst_288 [1] : vector<8x16xf32> to vector<8xf32>
    %773 = vector.shape_cast %772 : vector<8xf32> to vector<8x1xf32>
    %774 = tpu.reciprocal %773 {approx = true} : vector<8x1xf32> -> vector<8x1xf32>
    %775 = vector.broadcast %774 : vector<8x1xf32> to vector<8x16xf32>
    %776 = arith.mulf %771, %775 : vector<8x16xf32>
    %777 = vector.extract_strided_slice %746 {offsets = [0, 8], sizes = [16, 8], strides = [1, 1]} : vector<16x32xf32> to vector<16x8xf32>
    %cst_289 = arith.constant dense<0.000000e+00> : vector<8x8xf32>
    %778 = tpu.matmul %776, %777, %cst_289 {dimension_numbers = #tpu.dot_dimension_numbers<[1], [0], [0], [1], [0, 0, 1, 1], [], []>} : vector<8x16xf32>, vector<16x8xf32>, vector<8x8xf32> -> vector<8x8xf32>
    %779 = vector.extract_strided_slice %669 {offsets = [8, 0], sizes = [8, 32], strides = [1, 1]} : vector<32x32xf32> to vector<8x32xf32>
    %cst_290 = arith.constant dense<0.000000e+00> : vector<8x32xf32>
    %780 = tpu.matmul %778, %779, %cst_290 {dimension_numbers = #tpu.dot_dimension_numbers<[1], [0], [0], [1], [0, 0, 1, 1], [], []>} : vector<8x8xf32>, vector<8x32xf32>, vector<8x32xf32> -> vector<8x32xf32>
    %781 = arith.addf %763, %780 : vector<8x32xf32>
    %782 = vector.extract_strided_slice %744 {offsets = [0, 16], sizes = [8, 8], strides = [1, 1]} : vector<8x32xf32> to vector<8x8xf32>
    %783 = vector.extract_strided_slice %745 {offsets = [0, 16], sizes = [16, 8], strides = [1, 1]} : vector<16x32xf32> to vector<16x8xf32>
    %cst_291 = arith.constant dense<0.000000e+00> : vector<8x16xf32>
    %784 = tpu.matmul %782, %783, %cst_291 {dimension_numbers = #tpu.dot_dimension_numbers<[1], [1], [0], [0], [0, 0, 1, 0], [], []>} : vector<8x8xf32>, vector<16x8xf32>, vector<8x16xf32> -> vector<8x16xf32>
    %cst_292 = arith.constant dense<0xFF800000> : vector<8xf32>
    %785 = vector.multi_reduction <maximumf>, %784, %cst_292 [1] : vector<8x16xf32> to vector<8xf32>
    %786 = vector.shape_cast %785 : vector<8xf32> to vector<8x1xf32>
    %787 = vector.broadcast %786 : vector<8x1xf32> to vector<8x16xf32>
    %788 = arith.subf %784, %787 : vector<8x16xf32>
    %789 = math.exp %788 : vector<8x16xf32>
    %cst_293 = arith.constant dense<0.000000e+00> : vector<8xf32>
    %790 = vector.multi_reduction <add>, %789, %cst_293 [1] : vector<8x16xf32> to vector<8xf32>
    %791 = vector.shape_cast %790 : vector<8xf32> to vector<8x1xf32>
    %792 = tpu.reciprocal %791 {approx = true} : vector<8x1xf32> -> vector<8x1xf32>
    %793 = vector.broadcast %792 : vector<8x1xf32> to vector<8x16xf32>
    %794 = arith.mulf %789, %793 : vector<8x16xf32>
    %795 = vector.extract_strided_slice %746 {offsets = [0, 16], sizes = [16, 8], strides = [1, 1]} : vector<16x32xf32> to vector<16x8xf32>
    %cst_294 = arith.constant dense<0.000000e+00> : vector<8x8xf32>
    %796 = tpu.matmul %794, %795, %cst_294 {dimension_numbers = #tpu.dot_dimension_numbers<[1], [0], [0], [1], [0, 0, 1, 1], [], []>} : vector<8x16xf32>, vector<16x8xf32>, vector<8x8xf32> -> vector<8x8xf32>
    %797 = vector.extract_strided_slice %669 {offsets = [16, 0], sizes = [8, 32], strides = [1, 1]} : vector<32x32xf32> to vector<8x32xf32>
    %cst_295 = arith.constant dense<0.000000e+00> : vector<8x32xf32>
    %798 = tpu.matmul %796, %797, %cst_295 {dimension_numbers = #tpu.dot_dimension_numbers<[1], [0], [0], [1], [0, 0, 1, 1], [], []>} : vector<8x8xf32>, vector<8x32xf32>, vector<8x32xf32> -> vector<8x32xf32>
    %799 = arith.addf %781, %798 : vector<8x32xf32>
    %800 = vector.extract_strided_slice %744 {offsets = [0, 24], sizes = [8, 8], strides = [1, 1]} : vector<8x32xf32> to vector<8x8xf32>
    %801 = vector.extract_strided_slice %745 {offsets = [0, 24], sizes = [16, 8], strides = [1, 1]} : vector<16x32xf32> to vector<16x8xf32>
    %cst_296 = arith.constant dense<0.000000e+00> : vector<8x16xf32>
    %802 = tpu.matmul %800, %801, %cst_296 {dimension_numbers = #tpu.dot_dimension_numbers<[1], [1], [0], [0], [0, 0, 1, 0], [], []>} : vector<8x8xf32>, vector<16x8xf32>, vector<8x16xf32> -> vector<8x16xf32>
    %cst_297 = arith.constant dense<0xFF800000> : vector<8xf32>
    %803 = vector.multi_reduction <maximumf>, %802, %cst_297 [1] : vector<8x16xf32> to vector<8xf32>
    %804 = vector.shape_cast %803 : vector<8xf32> to vector<8x1xf32>
    %805 = vector.broadcast %804 : vector<8x1xf32> to vector<8x16xf32>
    %806 = arith.subf %802, %805 : vector<8x16xf32>
    %807 = math.exp %806 : vector<8x16xf32>
    %cst_298 = arith.constant dense<0.000000e+00> : vector<8xf32>
    %808 = vector.multi_reduction <add>, %807, %cst_298 [1] : vector<8x16xf32> to vector<8xf32>
    %809 = vector.shape_cast %808 : vector<8xf32> to vector<8x1xf32>
    %810 = tpu.reciprocal %809 {approx = true} : vector<8x1xf32> -> vector<8x1xf32>
    %811 = vector.broadcast %810 : vector<8x1xf32> to vector<8x16xf32>
    %812 = arith.mulf %807, %811 : vector<8x16xf32>
    %813 = vector.extract_strided_slice %746 {offsets = [0, 24], sizes = [16, 8], strides = [1, 1]} : vector<16x32xf32> to vector<16x8xf32>
    %cst_299 = arith.constant dense<0.000000e+00> : vector<8x8xf32>
    %814 = tpu.matmul %812, %813, %cst_299 {dimension_numbers = #tpu.dot_dimension_numbers<[1], [0], [0], [1], [0, 0, 1, 1], [], []>} : vector<8x16xf32>, vector<16x8xf32>, vector<8x8xf32> -> vector<8x8xf32>
    %815 = vector.extract_strided_slice %669 {offsets = [24, 0], sizes = [8, 32], strides = [1, 1]} : vector<32x32xf32> to vector<8x32xf32>
    %cst_300 = arith.constant dense<0.000000e+00> : vector<8x32xf32>
    %816 = tpu.matmul %814, %815, %cst_300 {dimension_numbers = #tpu.dot_dimension_numbers<[1], [0], [0], [1], [0, 0, 1, 1], [], []>} : vector<8x8xf32>, vector<8x32xf32>, vector<8x32xf32> -> vector<8x32xf32>
    %817 = arith.addf %799, %816 : vector<8x32xf32>
    %818 = tpu.concatenate %743, %817 in 0 : vector<8x32xf32>, vector<8x32xf32> -> vector<16x32xf32>
    %819 = vector.broadcast %654 : vector<1x32xf32> to vector<16x32xf32>
    %820 = arith.addf %818, %819 : vector<16x32xf32>
    %821 = arith.addf %647, %820 : vector<16x32xf32>
    %c22 = arith.constant 22 : index
    %c0_301 = arith.constant 0 : index
    %c0_302 = arith.constant 0 : index
    %822 = vector.load %arg7[%c22, %c0_301, %c0_302] : memref<28x1x32xf32, #tpu.memory_space<vmem>>, vector<1x1x32xf32>
    %823 = vector.shape_cast %822 : vector<1x1x32xf32> to vector<1x32xf32>
    %c23 = arith.constant 23 : index
    %c0_303 = arith.constant 0 : index
    %c0_304 = arith.constant 0 : index
    %824 = vector.load %arg7[%c23, %c0_303, %c0_304] : memref<28x1x32xf32, #tpu.memory_space<vmem>>, vector<1x1x32xf32>
    %825 = vector.shape_cast %824 : vector<1x1x32xf32> to vector<1x32xf32>
    %cst_305 = arith.constant dense<0.000000e+00> : vector<16xf32>
    %826 = vector.multi_reduction <add>, %821, %cst_305 [1] : vector<16x32xf32> to vector<16xf32>
    %827 = vector.shape_cast %826 : vector<16xf32> to vector<16x1xf32>
    %cst_306 = arith.constant 3.200000e+01 : f32
    %828 = vector.broadcast %cst_306 : f32 to vector<16x1xf32>
    %829 = arith.divf %827, %828 : vector<16x1xf32>
    %830 = vector.broadcast %829 : vector<16x1xf32> to vector<16x32xf32>
    %831 = arith.subf %821, %830 : vector<16x32xf32>
    %832 = arith.mulf %831, %831 : vector<16x32xf32>
    %cst_307 = arith.constant dense<0.000000e+00> : vector<16xf32>
    %833 = vector.multi_reduction <add>, %832, %cst_307 [1] : vector<16x32xf32> to vector<16xf32>
    %834 = vector.shape_cast %833 : vector<16xf32> to vector<16x1xf32>
    %cst_308 = arith.constant 3.200000e+01 : f32
    %835 = vector.broadcast %cst_308 : f32 to vector<16x1xf32>
    %836 = arith.divf %834, %835 : vector<16x1xf32>
    %837 = vector.broadcast %829 : vector<16x1xf32> to vector<16x32xf32>
    %838 = arith.subf %821, %837 : vector<16x32xf32>
    %cst_309 = arith.constant 9.99999974E-6 : f32
    %839 = vector.broadcast %cst_309 : f32 to vector<16x1xf32>
    %840 = arith.addf %836, %839 : vector<16x1xf32>
    %841 = math.rsqrt %840 : vector<16x1xf32>
    %842 = vector.broadcast %841 : vector<16x1xf32> to vector<16x32xf32>
    %843 = arith.mulf %838, %842 : vector<16x32xf32>
    %844 = vector.broadcast %823 : vector<1x32xf32> to vector<16x32xf32>
    %845 = arith.mulf %843, %844 : vector<16x32xf32>
    %846 = vector.broadcast %825 : vector<1x32xf32> to vector<16x32xf32>
    %847 = arith.addf %845, %846 : vector<16x32xf32>
    %c1_310 = arith.constant 1 : index
    %c0_311 = arith.constant 0 : index
    %c0_312 = arith.constant 0 : index
    %848 = vector.load %arg5[%c1_310, %c0_311, %c0_312] : memref<2x32x64xf32, #tpu.memory_space<vmem>>, vector<1x32x64xf32>
    %849 = vector.shape_cast %848 : vector<1x32x64xf32> to vector<32x64xf32>
    %cst_313 = arith.constant dense<0.000000e+00> : vector<16x64xf32>
    %850 = tpu.matmul %847, %849, %cst_313 {dimension_numbers = #tpu.dot_dimension_numbers<[1], [0], [0], [1], [0, 0, 1, 1], [], []>} : vector<16x32xf32>, vector<32x64xf32>, vector<16x64xf32> -> vector<16x64xf32>
    %c1_314 = arith.constant 1 : index
    %c0_315 = arith.constant 0 : index
    %c0_316 = arith.constant 0 : index
    %851 = vector.load %arg8[%c1_314, %c0_315, %c0_316] : memref<2x1x64xf32, #tpu.memory_space<vmem>>, vector<1x1x64xf32>
    %852 = vector.shape_cast %851 : vector<1x1x64xf32> to vector<1x64xf32>
    %853 = vector.broadcast %852 : vector<1x64xf32> to vector<16x64xf32>
    %854 = arith.addf %850, %853 : vector<16x64xf32>
    %cst_317 = arith.constant 0.000000e+00 : f32
    %855 = vector.broadcast %cst_317 : f32 to vector<16x64xf32>
    %856 = arith.maximumf %854, %855 : vector<16x64xf32>
    %c1_318 = arith.constant 1 : index
    %c0_319 = arith.constant 0 : index
    %c0_320 = arith.constant 0 : index
    %857 = vector.load %arg6[%c1_318, %c0_319, %c0_320] : memref<2x64x32xf32, #tpu.memory_space<vmem>>, vector<1x64x32xf32>
    %858 = vector.shape_cast %857 : vector<1x64x32xf32> to vector<64x32xf32>
    %cst_321 = arith.constant dense<0.000000e+00> : vector<16x32xf32>
    %859 = tpu.matmul %856, %858, %cst_321 {dimension_numbers = #tpu.dot_dimension_numbers<[1], [0], [0], [1], [0, 0, 1, 1], [], []>} : vector<16x64xf32>, vector<64x32xf32>, vector<16x32xf32> -> vector<16x32xf32>
    %c19 = arith.constant 19 : index
    %c0_322 = arith.constant 0 : index
    %c0_323 = arith.constant 0 : index
    %860 = vector.load %arg7[%c19, %c0_322, %c0_323] : memref<28x1x32xf32, #tpu.memory_space<vmem>>, vector<1x1x32xf32>
    %861 = vector.shape_cast %860 : vector<1x1x32xf32> to vector<1x32xf32>
    %862 = vector.broadcast %861 : vector<1x32xf32> to vector<16x32xf32>
    %863 = arith.addf %859, %862 : vector<16x32xf32>
    %864 = arith.addf %847, %863 : vector<16x32xf32>
    %c24 = arith.constant 24 : index
    %c0_324 = arith.constant 0 : index
    %c0_325 = arith.constant 0 : index
    %865 = vector.load %arg7[%c24, %c0_324, %c0_325] : memref<28x1x32xf32, #tpu.memory_space<vmem>>, vector<1x1x32xf32>
    %866 = vector.shape_cast %865 : vector<1x1x32xf32> to vector<1x32xf32>
    %c25 = arith.constant 25 : index
    %c0_326 = arith.constant 0 : index
    %c0_327 = arith.constant 0 : index
    %867 = vector.load %arg7[%c25, %c0_326, %c0_327] : memref<28x1x32xf32, #tpu.memory_space<vmem>>, vector<1x1x32xf32>
    %868 = vector.shape_cast %867 : vector<1x1x32xf32> to vector<1x32xf32>
    %cst_328 = arith.constant dense<0.000000e+00> : vector<16xf32>
    %869 = vector.multi_reduction <add>, %864, %cst_328 [1] : vector<16x32xf32> to vector<16xf32>
    %870 = vector.shape_cast %869 : vector<16xf32> to vector<16x1xf32>
    %cst_329 = arith.constant 3.200000e+01 : f32
    %871 = vector.broadcast %cst_329 : f32 to vector<16x1xf32>
    %872 = arith.divf %870, %871 : vector<16x1xf32>
    %873 = vector.broadcast %872 : vector<16x1xf32> to vector<16x32xf32>
    %874 = arith.subf %864, %873 : vector<16x32xf32>
    %875 = arith.mulf %874, %874 : vector<16x32xf32>
    %cst_330 = arith.constant dense<0.000000e+00> : vector<16xf32>
    %876 = vector.multi_reduction <add>, %875, %cst_330 [1] : vector<16x32xf32> to vector<16xf32>
    %877 = vector.shape_cast %876 : vector<16xf32> to vector<16x1xf32>
    %cst_331 = arith.constant 3.200000e+01 : f32
    %878 = vector.broadcast %cst_331 : f32 to vector<16x1xf32>
    %879 = arith.divf %877, %878 : vector<16x1xf32>
    %880 = vector.broadcast %872 : vector<16x1xf32> to vector<16x32xf32>
    %881 = arith.subf %864, %880 : vector<16x32xf32>
    %cst_332 = arith.constant 9.99999974E-6 : f32
    %882 = vector.broadcast %cst_332 : f32 to vector<16x1xf32>
    %883 = arith.addf %879, %882 : vector<16x1xf32>
    %884 = math.rsqrt %883 : vector<16x1xf32>
    %885 = vector.broadcast %884 : vector<16x1xf32> to vector<16x32xf32>
    %886 = arith.mulf %881, %885 : vector<16x32xf32>
    %887 = vector.broadcast %866 : vector<1x32xf32> to vector<16x32xf32>
    %888 = arith.mulf %886, %887 : vector<16x32xf32>
    %889 = vector.broadcast %868 : vector<1x32xf32> to vector<16x32xf32>
    %890 = arith.addf %888, %889 : vector<16x32xf32>
    %c26 = arith.constant 26 : index
    %c0_333 = arith.constant 0 : index
    %c0_334 = arith.constant 0 : index
    %891 = vector.load %arg7[%c26, %c0_333, %c0_334] : memref<28x1x32xf32, #tpu.memory_space<vmem>>, vector<1x1x32xf32>
    %892 = vector.shape_cast %891 : vector<1x1x32xf32> to vector<1x32xf32>
    %c27 = arith.constant 27 : index
    %c0_335 = arith.constant 0 : index
    %c0_336 = arith.constant 0 : index
    %893 = vector.load %arg7[%c27, %c0_335, %c0_336] : memref<28x1x32xf32, #tpu.memory_space<vmem>>, vector<1x1x32xf32>
    %894 = vector.shape_cast %893 : vector<1x1x32xf32> to vector<1x32xf32>
    %cst_337 = arith.constant dense<0.000000e+00> : vector<16xf32>
    %895 = vector.multi_reduction <add>, %890, %cst_337 [1] : vector<16x32xf32> to vector<16xf32>
    %896 = vector.shape_cast %895 : vector<16xf32> to vector<16x1xf32>
    %cst_338 = arith.constant 3.200000e+01 : f32
    %897 = vector.broadcast %cst_338 : f32 to vector<16x1xf32>
    %898 = arith.divf %896, %897 : vector<16x1xf32>
    %899 = vector.broadcast %898 : vector<16x1xf32> to vector<16x32xf32>
    %900 = arith.subf %890, %899 : vector<16x32xf32>
    %901 = arith.mulf %900, %900 : vector<16x32xf32>
    %cst_339 = arith.constant dense<0.000000e+00> : vector<16xf32>
    %902 = vector.multi_reduction <add>, %901, %cst_339 [1] : vector<16x32xf32> to vector<16xf32>
    %903 = vector.shape_cast %902 : vector<16xf32> to vector<16x1xf32>
    %cst_340 = arith.constant 3.200000e+01 : f32
    %904 = vector.broadcast %cst_340 : f32 to vector<16x1xf32>
    %905 = arith.divf %903, %904 : vector<16x1xf32>
    %906 = vector.broadcast %898 : vector<16x1xf32> to vector<16x32xf32>
    %907 = arith.subf %890, %906 : vector<16x32xf32>
    %cst_341 = arith.constant 9.99999974E-6 : f32
    %908 = vector.broadcast %cst_341 : f32 to vector<16x1xf32>
    %909 = arith.addf %905, %908 : vector<16x1xf32>
    %910 = math.rsqrt %909 : vector<16x1xf32>
    %911 = vector.broadcast %910 : vector<16x1xf32> to vector<16x32xf32>
    %912 = arith.mulf %907, %911 : vector<16x32xf32>
    %913 = vector.broadcast %892 : vector<1x32xf32> to vector<16x32xf32>
    %914 = arith.mulf %912, %913 : vector<16x32xf32>
    %915 = vector.broadcast %894 : vector<1x32xf32> to vector<16x32xf32>
    %916 = arith.addf %914, %915 : vector<16x32xf32>
    %c0_342 = arith.constant 0 : index
    %c0_343 = arith.constant 0 : index
    %917 = vector.load %arg9[%c0_342, %c0_343] : memref<16x32xf32, #tpu.memory_space<vmem>>, vector<16x32xf32>
    tpu.vector_store %arg9[%c0_342, %c0_343], %916 {strides = array<i32>} : memref<16x32xf32, #tpu.memory_space<vmem>>, vector<16x32xf32>,
    return
  }
}

</mosaic_0001>

<bundles_post_ra>
// kernel: transformer_decoder.1
= control target key start
LH: loop header
LB: loop body
LE: loop exit
PB: predicated region body
PF: predicated region fallthrough
CT: control target
= control target key end

     0   :  { %14 = vsyncpa [#allocation3], 0  ;;  %s11592_s30 = smov [#allocation2]   ;;  %s12875_s0 = inlined_call_operand.vmem [shape: f32[16,32], index: 0, kind: input, shape index: {}]   ;;  %s12876_s1 = inlined_call_operand.vmem [shape: f32[32,32], index: 1, kind: input, shape index: {}]   ;;  %s12877_s2 = inlined_call_operand.vmem [shape: f32[16,32], index: 2, kind: input, shape index: {}]   ;;  %s12878_s3 = inlined_call_operand.vmem [shape: f32[32,32], index: 3, kind: input, shape index: {}]   ;;  %s12879_s4 = inlined_call_operand.hbm [shape: f32[16,32,32], index: 4, kind: input, shape index: {}]   ;;  %s12880_s5 = inlined_call_operand.vmem [shape: f32[2,32,64], index: 5, kind: input, shape index: {}]   ;;  %s12881_s6 = inlined_call_operand.vmem [shape: f32[2,64,32], index: 6, kind: input, shape index: {}]   ;;  %s12882_s7 = inlined_call_operand.vmem [shape: f32[28,1,32], index: 7, kind: input, shape index: {}]   ;;  %s12883_s8 = inlined_call_operand.vmem [shape: f32[2,1,64], index: 8, kind: input, shape index: {}]   ;;  %s12884_s9 = inlined_call_operand.vmem [shape: f32[16,32], index: 9, kind: output, shape index: {}]  }
   0x1   :  { %s28_s10 = sshll.u32 %s11592_s30, 4  ;;  %s11568_s13 = scalar_lea.hbm %s12879_s4, 8192  ;;  %s29_s10 = int_to_ptr.vmem [resolvable:$true] %s28_s10 }
   0x2   :  { %p11569_p0 = scmp.ne.s32.totalorder %s12879_s4, %s11568_s13  ;;  %p11572_p1 = scmp.lt.u32.totalorder %s11568_s13, %s12879_s4 }
   0x4   :  { %p11574_p2 = pnand %p11572_p1, %p11569_p0 }
   0x6   :  { %11577 = shalt.err (!%p11574_p2)
}
   0x7   :  { %s11578_s18 = scalar_lea.vmem %s29_s10, 8192  ;;  %p11583_p4 = scmp.lt.s32.totalorder %s29_s10, %s29_s10 }
   0x8   :  { %p11579_p3 = scmp.ne.s32.totalorder %s29_s10, %s11578_s18  ;;  %p11584_p5 = scmp.lt.s32.totalorder %s11578_s18, %s11578_s18 }
   0xa   :  { %p11585_p6 = por %p11584_p5, %p11583_p4 }
   0xc   :  { %p11586_p7 = pnand %p11585_p6, %p11579_p3 }
   0xe   :  { %11589 = shalt.err (!%p11586_p7)
}
   0xf   :  { %s11593_s19 = smov 128   ;;  %s11594_s20 = smov 8  }
  0x10   :  { %34 = dma.hbm_to_vmem [thread:$0]  %s12879_s4, 8192, %s29_s10, [#allocation3], %s11593_s19, %s11593_s19, %s11594_s20  }
  0x11   :  { %11590 = dma.done.wait [#allocation3], 8192  }
  0x12   :  { %11591 = vsyncadd [#allocation3], 4294959104  ;;  %v162_v0 = vld [vmem:[#allocation2 + $0x20] sm:$0xff]  ;;  %v163_v1 = vld [vmem:[#allocation2 + $0x28] sm:$0xff]  ;;  %vm79_vm0 = vcmask 261120   ;;  %v11595_v24 = vmov 0.0  }
  0x13   :  { %v69_v2 = vld [vmem:[#allocation2] sm:$0xff]  ;;  %v11029_v3 = vpack.c.bf16 %v163_v1, %v162_v0  ;;  %v70_v4 = vld [vmem:[#allocation2 + $0x8] sm:$0xff]  ;;  %v164_v5 = vld [vmem:[#allocation2 + $0x30] sm:$0xff]  ;;  %vm11596_vm1 = vmmov 0   ;;  %vm338_vm2 = vcmask 64512   ;;  %s11597_s10 = smov 120  }
  0x14   :  { %v165_v6 = vld [vmem:[#allocation2 + $0x38] sm:$0xff]  ;;  %v11021_v7 = vpack.c.bf16 %v70_v4, %v69_v2  ;;  %v71_v9 = vld [vmem:[#allocation2 + $0x10] sm:$0xff]  ;;  %v11666_v11 = vld [vmem:[%s12875_s0] sm:$0xff]  ;;  %s11598_s13 = smov 112   ;;  %s11599_s14 = smov 104   ;;  %vm2690_vm4 = vcmask 130048  }
  0x15   :  { %v11033_v8 = vpack.c.bf16 %v165_v6, %v164_v5  ;;  %v72_v10 = vld [vmem:[#allocation2 + $0x18] sm:$0xff]  ;;  %11030 = vmatprep.subr.bf16.mxu1 %v11029_v3  ;;  %v11671_v13 = vld [vmem:[%s12877_s2] sm:$0xff]  ;;  %v11676_v14 = vld [vmem:[%s12875_s0 + $0x8] sm:$0xff]  ;;  %vm4728_vm5 = vcmask 523264  }
  0x16   :  { %v11025_v12 = vpack.c.bf16 %v72_v10, %v71_v9  ;;  %11022 = vmatprep.subr.bf16.mxu0 %v11021_v7  ;;  %11032 = vmatpush3.bf16.msra.mxu1 %v11029_v3  ;;  %v62_v15 = vadd.f32 %v11671_v13, %v11666_v11  ;;  %v11683_v16 = vld [vmem:[%s12877_s2 + $0x8] sm:$0xff]  ;;  %v242_v17 = vld [vmem:[#allocation2 + $0x40] sm:$0xff]  ;;  %v244_v21 = vld [vmem:[#allocation2 + $0x50] sm:$0xff] }
  0x17   :  { %v243_v18 = vld [vmem:[#allocation2 + $0x48] sm:$0xff]  ;;  %11024 = vmatpush3.bf16.msra.mxu0 %v11021_v7  ;;  %11034 = vmatprep.subr.bf16.mxu1 %v11033_v8  ;;  %v63_v20 = vadd.f32 %v11683_v16, %v11676_v14  ;;  %v245_v22 = vld [vmem:[#allocation2 + $0x58] sm:$0xff]  ;;  %v9685_v25 = vld [vmem:[%s12882_s7] ss:$0 sm:$0xff] }
  0x18   :  { %11026 = vmatprep.subr.bf16.mxu0 %v11025_v12  ;;  %10292 = vmatprep.mubr.msk.f32.mxu1 %vm79_vm0, %v62_v15  ;;  %v11037_v19 = vpack.c.bf16 %v243_v18, %v242_v17  ;;  %v11041_v23 = vpack.c.bf16 %v245_v22, %v244_v21  ;;  %v9690_v32 = vld [vmem:[%s12882_s7 + $0x1] ss:$0 sm:$0xff]  ;;  %v11748_v58 = vld [vmem:[#allocation2 + $0x68] sm:$0xff]  ;;  %vm11951_vm3 = vmpackc.low %vm338_vm2, %vm338_vm2 }
  0x19   :  { %10281 = vmatprep.mubr.msk.f32.mxu0 %vm79_vm0, %v62_v15  ;;  %v11753_v63 = vld [vmem:[#allocation2 + $0x60] sm:$0xff] }
  0x1a   :  { %11036 = vmatpush3.bf16.msra.mxu1 %v11033_v8 }
  0x1b   :  { %11028 = vmatpush3.bf16.msra.mxu0 %v11025_v12  ;;  %10311 = vmatprep.subr.mxu1 %v11595_v24 }
  0x1c   :  { %11038 = vmatprep.subr.bf16.mxu0 %v11037_v19 }
  0x1d   :  { %10293 = vmatmul.mubr.msk.f32.vlgmr.msra.gmra.mrb[0].mxu1 %vm79_vm0, %v63_v20 }
  0x1e   :  { %10282 = vmatmul.mubr.msk.f32.vlgmr.msra.gmra.mrb[0].mxu0 %vm79_vm0, %v63_v20  ;;  %10313 = vmatprep.mubr.msk.f32.mxu1 %vm11596_vm1, %v11595_v24 }
  0x1f   :  { %11040 = vmatpush3.bf16.msra.mxu0 %v11037_v19  ;;  %10303 = vmatprep.mubr.msk.f32.mxu0 %vm79_vm0, %v11666_v11 }
  0x20   :  { %11042 = vmatprep.subr.bf16.mxu0 %v11041_v23 }
  0x23   :  { %11044 = vmatpush3.bf16.msra.mxu0 %v11041_v23 }
  0x24   :  { %10306 = vmatprep.subr.mxu0 %v11595_v24 }
  0x26   :  { %10304 = vmatmul.mubr.msk.f32.vlgmr.msra.gmra.mrb[2].mxu0 %vm79_vm0, %v11676_v14 }
  0x27   :  { %10308 = vmatprep.mubr.msk.f32.mxu0 %vm11596_vm1, %v11595_v24 }
  0xf0   :  { %v11704_v26 = vpop.f32.mrb[0].mxu1 }
  0xf1   :  { %v10283_v27 = vpop.f32.mrb[0].mxu0  ;;  %v232_v28 = vpop.f32.mrb[1].mxu1 }
  0xf2   :  { %v11706_v29 = vadd.f32 %v10283_v27, %v9685_v25  ;;  %501 = vrot.lane.b32.xlu0 %v232_v28, %s11597_s10  ;;  %v152_v30 = vpop.f32.mrb[1].mxu0  ;;  %10307 = vmatpush3.xpose.msk.msra.mxu0 %vm338_vm2, %v232_v28 }
  0xf3   :  { %v11710_v31 = vadd.f32 %v9685_v25, %v152_v30  ;;  %10316 = vmatprep.subr.mxu0 %v11595_v24  ;;  %v11780_v25 = vld [vmem:[#allocation2 + $0x70] sm:$0xff] }
  0xf5   :  { %10309 = vmatmul.mubr.msk.f32.vlgmr.msra.gmra.mrb[4].mxu0 %vm338_vm2, %v11710_v31 }
  0xf6   :  { %499 = vrot.lane.b32.xlu0 %v11710_v31, %s11597_s10  ;;  %10318 = vmatprep.mubr.msk.f32.mxu0 %vm11596_vm1, %v11595_v24 }
  0xf9   :  { %v10305_v33 = vpop.f32.mrb[2].mxu0 }
  0xfa   :  { %v11722_v34 = vadd.f32 %v10305_v33, %v9690_v32  ;;  %v324_v35 = vpop.f32.mrb[3].mxu0 }
  0xfb   :  { %v11724_v36 = vadd.f32 %v9690_v32, %v324_v35 }
  0xfd   :  { %10312 = vmatpush3.msra.mxu1 %v11724_v36 }
  0xfe   :  { %10321 = vmatprep.subr.mxu1 %v11595_v24 }
 0x164   :  { %v502_v37 = vpop.permute.xlu0 %501 }
 0x165   :  { %10317 = vmatpush3.xpose.msk.msra.mxu0 %vm338_vm2, %v502_v37 }
 0x166   :  { %10326 = vmatprep.subr.mxu0 %v11595_v24 }
 0x168   :  { %v500_v38 = vpop.permute.xlu0 %499 }
 0x169   :  { %10319 = vmatmul.mubr.msk.f32.vlgmr.msra.gmra.mrb[6].mxu0 %vm338_vm2, %v500_v38 }
 0x16a   :  { %10328 = vmatprep.mubr.msk.f32.mxu0 %vm11596_vm1, %v11595_v24  ;;  %10327 = vmatpush3.msra.mxu0 %v11748_v58 }
 0x16b   :  { %10336 = vmatprep.subr.mxu0 %v11595_v24 }
 0x1c8   :  { %v411_v39 = vpop.f32.mrb[4].mxu0 }
 0x1c9   :  { %v10310_v40 = vpop.f32.mrb[5].mxu0  ;;  %v415_v41 = vsel %vm338_vm2, %v411_v39, -inf }
 0x1ca   :  { %416 = vmax.xlane.f32.xlu1 %v415_v41 }
 0x23c   :  { %v573_v42 = vpop.f32.mrb[6].mxu0 }
 0x23d   :  { %v10320_v43 = vpop.f32.mrb[7].mxu0  ;;  %v577_v44 = vsel %vm338_vm2, %v573_v42, -inf }
 0x23e   :  { %578 = vmax.xlane.f32.xlu1 %v577_v44 }
 0x257   :  { %v417_v45 = vpop.xlane.xlu1 %416 }
 0x258   :  { %v418_v46 = vsub.f32 %v411_v39, %v417_v45  ;;  %v11800_v45 = vld [vmem:[#allocation2 + $0x78] sm:$0xff] }
 0x25a   :  { %v419_v47 = vmul.f32 1.442695, %v418_v46 }
 0x25c   :  { %11406 = vpow2.f32 %v419_v47 }
 0x266   :  { %v11407_v48 = vpop.eup %11406 }
 0x267   :  { %v421_v49 = vsel %vm338_vm2, %v11407_v48, 0.0 }
 0x268   :  { %422 = vadd.xlane.f32.xlu0 %v421_v49 }
 0x27e   :  { %900 = vrot.lane.b32.xlu0 %v11724_v36, %s11598_s13 }
 0x282   :  { %1052 = vrot.lane.b32.xlu0 %v232_v28, %s11599_s14 }
 0x2cb   :  { %v579_v50 = vpop.xlane.xlu1 %578 }
 0x2cc   :  { %v580_v51 = vsub.f32 %v573_v42, %v579_v50 }
 0x2ce   :  { %v581_v52 = vmul.f32 1.442695, %v580_v51 }
 0x2d0   :  { %11408 = vpow2.f32 %v581_v52 }
 0x2da   :  { %v11409_v53 = vpop.eup %11408 }
 0x2db   :  { %v583_v54 = vsel %vm338_vm2, %v11409_v53, 0.0 }
 0x2dc   :  { %584 = vadd.xlane.f32.xlu1 %v583_v54 }
 0x2ed   :  { %589 = vrot.lane.b32.xlu1 %v11724_v36, %s11597_s10 }
 0x2f1   :  { %813 = vrot.lane.b32.xlu1 %v232_v28, %s11598_s13 }
 0x2f5   :  { %v423_v55 = vpop.xlane.xlu0 %422  ;;  %811 = vrot.lane.b32.xlu1 %v11710_v31, %s11598_s13 }
 0x2f6   :  { %11410 = vrcp.f32 %v423_v55 }
 0x2f9   :  { %v901_v1 = vpop.permute.xlu0 %900 }
 0x2fd   :  { %v1053_v27 = vpop.permute.xlu0 %1052 }
 0x300   :  { %v11411_v56 = vpop.eup %11410 }
 0x301   :  { %v425_v57 = vmul.f32 %v11411_v56, %v11407_v48 }
 0x303   :  { %10314 = vmatmul.mubr.msk.f32.vlgmr.msra.gmra.mrb[2].mxu1 %vm338_vm2, %v425_v57 }
 0x304   :  { %10323 = vmatprep.mubr.msk.f32.mxu1 %vm11596_vm1, %v11595_v24 }
 0x369   :  { %v585_v59 = vpop.xlane.xlu1 %584 }
 0x36a   :  { %11412 = vrcp.f32 %v585_v59 }
 0x36d   :  { %v590_v60 = vpop.permute.xlu1 %589 }
 0x36e   :  { %10322 = vmatpush3.msra.mxu1 %v590_v60 }
 0x36f   :  { %10331 = vmatprep.subr.mxu1 %v11595_v24 }
 0x371   :  { %v814_v3 = vpop.permute.xlu1 %813 }
 0x374   :  { %v11413_v61 = vpop.eup %11412 }
 0x375   :  { %v587_v62 = vmul.f32 %v11413_v61, %v11409_v53  ;;  %v812_v6 = vpop.permute.xlu1 %811 }
 0x377   :  { %10324 = vmatmul.mubr.msk.f32.vlgmr.msra.gmra.mrb[4].mxu1 %vm338_vm2, %v587_v62 }
 0x378   :  { %10332 = vmatpush3.msra.mxu1 %v11753_v63  ;;  %10333 = vmatprep.mubr.msk.f32.mxu1 %vm11596_vm1, %v11595_v24 }
 0x379   :  { %10341 = vmatprep.subr.mxu1 %v11595_v24 }
 0x3d6   :  { %v495_v0 = vpop.f32.mrb[2].mxu1 }
 0x3d7   :  { %v10315_v2 = vpop.f32.mrb[3].mxu1  ;;  %10334 = vmatmul.mubr.msk.f32.vlgmr.msra.gmra.mrb[6].mxu1 %vm338_vm2, %v495_v0 }
 0x3d8   :  { %10342 = vmatpush3.msra.mxu1 %v901_v1  ;;  %10343 = vmatprep.mubr.msk.f32.mxu1 %vm11596_vm1, %v11595_v24 }
 0x3d9   :  { %10351 = vmatprep.subr.mxu1 %v11595_v24 }
 0x44a   :  { %v661_v4 = vpop.f32.mrb[4].mxu1 }
 0x44b   :  { %v10325_v5 = vpop.f32.mrb[5].mxu1  ;;  %10329 = vmatmul.mubr.msk.f32.vlgmr.msra.gmra.mrb[8].mxu0 %vm338_vm2, %v661_v4 }
 0x44c   :  { %10337 = vmatpush3.xpose.msk.msra.mxu0 %vm338_vm2, %v814_v3  ;;  %10338 = vmatprep.mubr.msk.f32.mxu0 %vm11596_vm1, %v11595_v24 }
 0x44d   :  { %10346 = vmatprep.subr.mxu0 %v11595_v24 }
 0x44f   :  { %10339 = vmatmul.mubr.msk.f32.vlgmr.msra.gmra.mrb[10].mxu0 %vm338_vm2, %v812_v6 }
 0x450   :  { %10348 = vmatprep.mubr.msk.f32.mxu0 %vm11596_vm1, %v11595_v24  ;;  %10347 = vmatpush3.msra.mxu0 %v11780_v25 }
 0x451   :  { %10356 = vmatprep.subr.mxu0 %v11595_v24 }
 0x4aa   :  { %v807_v7 = vpop.f32.mrb[6].mxu1 }
 0x4ab   :  { %v10335_v8 = vpop.f32.mrb[7].mxu1 }
 0x51e   :  { %v734_v9 = vpop.f32.mrb[8].mxu0 }
 0x51f   :  { %v808_v10 = vadd.f32 %v807_v7, %v734_v9  ;;  %v10330_v12 = vpop.f32.mrb[9].mxu0 }
 0x522   :  { %v885_v15 = vpop.f32.mrb[10].mxu0 }
 0x523   :  { %v10340_v17 = vpop.f32.mrb[11].mxu0  ;;  %v889_v18 = vsel %vm338_vm2, %v885_v15, -inf }
 0x524   :  { %890 = vmax.xlane.f32.xlu1 %v889_v18 }
 0x535   :  { %1139 = vrot.lane.b32.xlu1 %v11724_v36, %s11599_s14 }
 0x539   :  { %1451 = vrot.lane.b32.xlu1 %v11704_v26, %s11597_s10 }
 0x5b1   :  { %v891_v19 = vpop.xlane.xlu1 %890 }
 0x5b2   :  { %v892_v20 = vsub.f32 %v885_v15, %v891_v19 }
 0x5b4   :  { %v893_v21 = vmul.f32 1.442695, %v892_v20 }
 0x5b5   :  { %v1140_v35 = vpop.permute.xlu1 %1139 }
 0x5b6   :  { %11414 = vpow2.f32 %v893_v21 }
 0x5b9   :  { %v1452_v49 = vpop.permute.xlu1 %1451 }
 0x5c0   :  { %v11415_v22 = vpop.eup %11414 }
 0x5c1   :  { %v895_v23 = vsel %vm338_vm2, %v11415_v22, 0.0 }
 0x5c2   :  { %896 = vadd.xlane.f32.xlu0 %v895_v23 }
 0x5d8   :  { %1050 = vrot.lane.b32.xlu0 %v11710_v31, %s11599_s14 }
 0x64f   :  { %v897_v28 = vpop.xlane.xlu0 %896 }
 0x650   :  { %11416 = vrcp.f32 %v897_v28 }
 0x653   :  { %v1051_v31 = vpop.permute.xlu0 %1050 }
 0x65a   :  { %v11417_v30 = vpop.eup %11416 }
 0x65b   :  { %v899_v32 = vmul.f32 %v11417_v30, %v11415_v22 }
 0x65d   :  { %10344 = vmatmul.mubr.msk.f32.vlgmr.msra.gmra.mrb[8].mxu1 %vm338_vm2, %v899_v32 }
 0x65e   :  { %10352 = vmatpush3.xpose.msk.msra.mxu1 %vm338_vm2, %v1053_v27  ;;  %10353 = vmatprep.mubr.msk.f32.mxu1 %vm11596_vm1, %v11595_v24 }
 0x65f   :  { %10361 = vmatprep.subr.mxu1 %v11595_v24 }
 0x661   :  { %10354 = vmatmul.mubr.msk.f32.vlgmr.msra.gmra.mrb[10].mxu1 %vm338_vm2, %v1051_v31 }
 0x662   :  { %10363 = vmatprep.mubr.msk.f32.mxu1 %vm11596_vm1, %v11595_v24  ;;  %10362 = vmatpush3.msra.mxu1 %v11800_v45 }
 0x663   :  { %10371 = vmatprep.subr.mxu1 %v11595_v24 }
 0x730   :  { %v972_v33 = vpop.f32.mrb[8].mxu1 }
 0x731   :  { %v10345_v36 = vpop.f32.mrb[9].mxu1  ;;  %10349 = vmatmul.mubr.msk.f32.vlgmr.msra.gmra.mrb[12].mxu0 %vm338_vm2, %v972_v33 }
 0x732   :  { %10357 = vmatpush3.msra.mxu0 %v1140_v35  ;;  %10358 = vmatprep.mubr.msk.f32.mxu0 %vm11596_vm1, %v11595_v24 }
 0x733   :  { %10366 = vmatprep.subr.mxu0 %v11595_v24 }
 0x734   :  { %v1124_v37 = vpop.f32.mrb[10].mxu1 }
 0x735   :  { %v10355_v38 = vpop.f32.mrb[11].mxu1  ;;  %v1128_v39 = vsel %vm338_vm2, %v1124_v37, -inf }
 0x736   :  { %1129 = vmax.xlane.f32.xlu0 %v1128_v39 }
 0x7c3   :  { %v1130_v40 = vpop.xlane.xlu0 %1129 }
 0x7c4   :  { %v1131_v41 = vsub.f32 %v1124_v37, %v1130_v40 }
 0x7c6   :  { %v1132_v42 = vmul.f32 1.442695, %v1131_v41 }
 0x7c8   :  { %11418 = vpow2.f32 %v1132_v42 }
 0x7d2   :  { %v11419_v43 = vpop.eup %11418 }
 0x7d3   :  { %v1134_v44 = vsel %vm338_vm2, %v11419_v43, 0.0 }
 0x7d4   :  { %1135 = vadd.xlane.f32.xlu1 %v1134_v44 }
 0x7e5   :  { %1449 = vrot.lane.b32.xlu1 %v11706_v29, %s11597_s10 }
 0x804   :  { %v1045_v46 = vpop.f32.mrb[12].mxu0 }
 0x805   :  { %v1049_v47 = vadd.f32 %v1045_v46, %v808_v10  ;;  %v10350_v48 = vpop.f32.mrb[13].mxu0 }
 0x861   :  { %v1136_v50 = vpop.xlane.xlu1 %1135 }
 0x862   :  { %11420 = vrcp.f32 %v1136_v50 }
 0x865   :  { %v1450_v53 = vpop.permute.xlu1 %1449 }
 0x86c   :  { %v11421_v51 = vpop.eup %11420 }
 0x86d   :  { %v1138_v52 = vmul.f32 %v11421_v51, %v11419_v43 }
 0x86f   :  { %10359 = vmatmul.mubr.msk.f32.vlgmr.msra.gmra.mrb[14].mxu0 %vm338_vm2, %v1138_v52 }
 0x870   :  { %10367 = vmatpush3.xpose.msk.msra.mxu0 %vm338_vm2, %v11704_v26  ;;  %10368 = vmatprep.mubr.msk.f32.mxu0 %vm11596_vm1, %v11595_v24 }
 0x871   :  { %10376 = vmatprep.subr.mxu0 %v11595_v24 }
 0x873   :  { %10369 = vmatmul.mubr.msk.f32.vlgmr.msra.gmra.mrb[16].mxu0 %vm338_vm2, %v11706_v29 }
 0x874   :  { %10377 = vmatpush3.xpose.msk.msra.mxu0 %vm338_vm2, %v1452_v49  ;;  %10378 = vmatprep.mubr.msk.f32.mxu0 %vm11596_vm1, %v11595_v24 }
 0x875   :  { %10386 = vmatprep.subr.mxu0 %v11595_v24 }
 0x877   :  { %10379 = vmatmul.mubr.msk.f32.vlgmr.msra.gmra.mrb[18].mxu0 %vm338_vm2, %v1450_v53 }
 0x878   :  { %10387 = vmatpush3.msra.mxu0 %v11748_v58  ;;  %10388 = vmatprep.mubr.msk.f32.mxu0 %vm11596_vm1, %v11595_v24 }
 0x879   :  { %10396 = vmatprep.subr.mxu0 %v11595_v24 }
 0x942   :  { %v1211_v54 = vpop.f32.mrb[14].mxu0 }
 0x943   :  { %v10360_v55 = vpop.f32.mrb[15].mxu0  ;;  %10364 = vmatmul.mubr.msk.f32.vlgmr.msra.gmra.mrb[12].mxu1 %vm338_vm2, %v1211_v54 }
 0x944   :  { %10372 = vmatpush3.msra.mxu1 %v11722_v34  ;;  %10373 = vmatprep.mubr.msk.f32.mxu1 %vm11596_vm1, %v11595_v24 }
 0x945   :  { %10381 = vmatprep.subr.mxu1 %v11595_v24 }
 0x946   :  { %v1361_v56 = vpop.f32.mrb[16].mxu0 }
 0x947   :  { %v10370_v57 = vpop.f32.mrb[17].mxu0  ;;  %v1365_v58 = vsel %vm338_vm2, %v1361_v56, -inf }
 0x948   :  { %1366 = vmax.xlane.f32.xlu1 %v1365_v58  ;;  %v9725_v58 = vld [vmem:[%s12882_s7 + $0x2] ss:$0 sm:$0xff] }
 0x94a   :  { %v1523_v59 = vpop.f32.mrb[18].mxu0 }
 0x94b   :  { %v10380_v60 = vpop.f32.mrb[19].mxu0  ;;  %v1527_v61 = vsel %vm338_vm2, %v1523_v59, -inf }
 0x94c   :  { %1528 = vmax.xlane.f32.xlu0 %v1527_v61 }
 0x959   :  { %1761 = vrot.lane.b32.xlu1 %v11706_v29, %s11598_s13 }
 0x9d5   :  { %v1367_v62 = vpop.xlane.xlu1 %1366 }
 0x9d6   :  { %v1368_v0 = vsub.f32 %v1361_v56, %v1367_v62 }
 0x9d8   :  { %v1369_v1 = vmul.f32 1.442695, %v1368_v0 }
 0x9d9   :  { %v1529_v2 = vpop.xlane.xlu0 %1528 }
 0x9da   :  { %11422 = vpow2.f32 %v1369_v1  ;;  %v1530_v3 = vsub.f32 %v1523_v59, %v1529_v2 }
 0x9dc   :  { %v1531_v4 = vmul.f32 1.442695, %v1530_v3 }
 0x9de   :  { %11424 = vpow2.f32 %v1531_v4 }
 0x9e4   :  { %v11423_v5 = vpop.eup %11422 }
 0x9e5   :  { %v1371_v6 = vsel %vm338_vm2, %v11423_v5, 0.0 }
 0x9e6   :  { %1372 = vadd.xlane.f32.xlu0 %v1371_v6 }
 0x9e8   :  { %v11425_v7 = vpop.eup %11424 }
 0x9e9   :  { %v1533_v8 = vsel %vm338_vm2, %v11425_v7, 0.0 }
 0x9ea   :  { %1534 = vadd.xlane.f32.xlu0 %v1533_v8 }
 0xa00   :  { %1539 = vrot.lane.b32.xlu0 %v11722_v34, %s11597_s10 }
 0xa04   :  { %1763 = vrot.lane.b32.xlu0 %v11704_v26, %s11598_s13 }
 0xa16   :  { %v1284_v9 = vpop.f32.mrb[12].mxu1 }
 0xa17   :  { %v11836_v10 = vadd.f32 %v1284_v9, %v1049_v47  ;;  %v10365_v12 = vpop.f32.mrb[13].mxu1 }
 0xa19   :  { %v2245_v59 = vadd.f32 %v9725_v58, %v11836_v10 }
 0xa1b   :  { %v2247_v62 = vadd.f32 %v2245_v59, %v11666_v11 }
 0xa73   :  { %v1373_v15 = vpop.xlane.xlu0 %1372 }
 0xa74   :  { %11426 = vrcp.f32 %v1373_v15 }
 0xa77   :  { %v1535_v17 = vpop.xlane.xlu0 %1534 }
 0xa78   :  { %11428 = vrcp.f32 %v1535_v17 }
 0xa7b   :  { %v1540_v20 = vpop.permute.xlu0 %1539 }
 0xa7e   :  { %v11427_v18 = vpop.eup %11426 }
 0xa7f   :  { %v1375_v19 = vmul.f32 %v11427_v18, %v11423_v5  ;;  %v1764_v30 = vpop.permute.xlu0 %1763  ;;  %v11896_v18 = vld [vmem:[%s12882_s7 + $0x7] ss:$0 sm:$0xff] }
 0xa81   :  { %10374 = vmatmul.mubr.msk.f32.vlgmr.msra.gmra.mrb[14].mxu1 %vm338_vm2, %v1375_v19 }
 0xa82   :  { %v11429_v21 = vpop.eup %11428  ;;  %10382 = vmatpush3.msra.mxu1 %v1540_v20  ;;  %10383 = vmatprep.mubr.msk.f32.mxu1 %vm11596_vm1, %v11595_v24  ;;  %v9729_v20 = vld [vmem:[%s12882_s7 + $0x8] ss:$0 sm:$0xff] }
 0xa83   :  { %v1537_v22 = vmul.f32 %v11429_v21, %v11425_v7  ;;  %10391 = vmatprep.subr.mxu1 %v11595_v24 }
 0xa85   :  { %10384 = vmatmul.mubr.msk.f32.vlgmr.msra.gmra.mrb[16].mxu1 %vm338_vm2, %v1537_v22 }
 0xa86   :  { %10392 = vmatpush3.msra.mxu1 %v11753_v63  ;;  %10393 = vmatprep.mubr.msk.f32.mxu1 %vm11596_vm1, %v11595_v24  ;;  %v1762_v63 = vpop.permute.xlu1 %1761 }
 0xa87   :  { %10401 = vmatprep.subr.mxu1 %v11595_v24 }
 0xb54   :  { %v1445_v23 = vpop.f32.mrb[14].mxu1 }
 0xb55   :  { %v10375_v27 = vpop.f32.mrb[15].mxu1  ;;  %10394 = vmatmul.mubr.msk.f32.vlgmr.msra.gmra.mrb[18].mxu1 %vm338_vm2, %v1445_v23 }
 0xb56   :  { %10403 = vmatprep.mubr.msk.f32.mxu1 %vm11596_vm1, %v11595_v24 }
 0xb58   :  { %v1611_v28 = vpop.f32.mrb[16].mxu1 }
 0xb59   :  { %v10385_v32 = vpop.f32.mrb[17].mxu1  ;;  %10389 = vmatmul.mubr.msk.f32.vlgmr.msra.gmra.mrb[20].mxu0 %vm338_vm2, %v1611_v28 }
 0xb5a   :  { %10397 = vmatpush3.xpose.msk.msra.mxu0 %vm338_vm2, %v1764_v30  ;;  %10398 = vmatprep.mubr.msk.f32.mxu0 %vm11596_vm1, %v11595_v24 }
 0xb5b   :  { %10406 = vmatprep.subr.mxu0 %v11595_v24 }
 0xb5d   :  { %10399 = vmatmul.mubr.msk.f32.vlgmr.msra.gmra.mrb[22].mxu0 %vm338_vm2, %v1762_v63 }
 0xb5e   :  { %10407 = vmatpush3.msra.mxu0 %v11780_v25  ;;  %10408 = vmatprep.mubr.msk.f32.mxu0 %vm11596_vm1, %v11595_v24 }
 0xb5f   :  { %10416 = vmatprep.subr.mxu0 %v11595_v24 }
 0xc28   :  { %v1757_v31 = vpop.f32.mrb[18].mxu1 }
 0xc29   :  { %v10395_v33 = vpop.f32.mrb[19].mxu1 }
 0xc2c   :  { %v1684_v35 = vpop.f32.mrb[20].mxu0 }
 0xc2d   :  { %v1758_v36 = vadd.f32 %v1757_v31, %v1684_v35  ;;  %v10390_v37 = vpop.f32.mrb[21].mxu0 }
 0xc30   :  { %v1835_v38 = vpop.f32.mrb[22].mxu0 }
 0xc31   :  { %v10400_v39 = vpop.f32.mrb[23].mxu0  ;;  %v1839_v40 = vsel %vm338_vm2, %v1835_v38, -inf }
 0xc32   :  { %1840 = vmax.xlane.f32.xlu0 %v1839_v40  ;;  %v2397_v40 = vld [vmem:[#allocation2 + $0xa0] sm:$0xff] }
 0xc48   :  { %1850 = vrot.lane.b32.xlu0 %v11722_v34, %s11598_s13 }
 0xc4c   :  { %2000 = vrot.lane.b32.xlu0 %v11706_v29, %s11599_s14 }
 0xcbf   :  { %v1841_v25 = vpop.xlane.xlu0 %1840 }
 0xcc0   :  { %v1842_v41 = vsub.f32 %v1835_v38, %v1841_v25  ;;  %v2398_v25 = vld [vmem:[#allocation2 + $0xa8] sm:$0xff] }
 0xcc2   :  { %v1843_v42 = vmul.f32 1.442695, %v1842_v41  ;;  %v11053_v41 = vpack.c.bf16 %v2398_v25, %v2397_v40 }
 0xcc3   :  { %v1851_v43 = vpop.permute.xlu0 %1850 }
 0xcc4   :  { %11430 = vpow2.f32 %v1843_v42  ;;  %10402 = vmatpush3.msra.mxu1 %v1851_v43  ;;  %v2399_v42 = vld [vmem:[#allocation2 + $0xb0] sm:$0xff]  ;;  %v2400_v43 = vld [vmem:[#allocation2 + $0xb8] sm:$0xff] }
 0xcc5   :  { %10411 = vmatprep.subr.mxu1 %v11595_v24 }
 0xcc7   :  { %v2001_v50 = vpop.permute.xlu0 %2000 }
 0xcce   :  { %v11431_v44 = vpop.eup %11430 }
 0xccf   :  { %v1845_v46 = vsel %vm338_vm2, %v11431_v44, 0.0 }
 0xcd0   :  { %1846 = vadd.xlane.f32.xlu1 %v1845_v46  ;;  %v54_v46 = vld [vmem:[%s12878_s3] sm:$0xff] }
 0xce1   :  { %2002 = vrot.lane.b32.xlu1 %v11704_v26, %s11599_s14 }
 0xd5d   :  { %v1847_v47 = vpop.xlane.xlu1 %1846 }
 0xd5e   :  { %11432 = vrcp.f32 %v1847_v47 }
 0xd61   :  { %v2003_v29 = vpop.permute.xlu1 %2002 }
 0xd68   :  { %v11433_v48 = vpop.eup %11432 }
 0xd69   :  { %v1849_v49 = vmul.f32 %v11433_v48, %v11431_v44  ;;  %v11057_v44 = vpack.c.bf16 %v2400_v43, %v2399_v42  ;;  %v49_v48 = vld [vmem:[%s12876_s1 + $0x8] sm:$0xff] }
 0xd6b   :  { %10404 = vmatmul.mubr.msk.f32.vlgmr.msra.gmra.mrb[20].mxu1 %vm338_vm2, %v1849_v49  ;;  %v55_v49 = vld [vmem:[%s12878_s3 + $0x8] sm:$0xff] }
 0xd6c   :  { %10412 = vmatpush3.xpose.msk.msra.mxu1 %vm338_vm2, %v2003_v29  ;;  %10413 = vmatprep.mubr.msk.f32.mxu1 %vm11596_vm1, %v11595_v24  ;;  %v11925_v29 = vadd.f32 %v55_v49, %v49_v48 }
 0xd6d   :  { %10421 = vmatprep.subr.mxu1 %v11595_v24 }
 0xd6f   :  { %10414 = vmatmul.mubr.msk.f32.vlgmr.msra.gmra.mrb[22].mxu1 %vm338_vm2, %v2001_v50  ;;  %v2305_v50 = vld [vmem:[#allocation2 + $0x80] sm:$0xff] }
 0xd70   :  { %10422 = vmatpush3.msra.mxu1 %v11800_v45  ;;  %10423 = vmatprep.mubr.msk.f32.mxu1 %vm11596_vm1, %v11595_v24 }
 0xd71   :  { %11054 = vmatprep.subr.bf16.mxu1 %v11053_v41 }
 0xe3e   :  { %v1922_v26 = vpop.f32.mrb[20].mxu1 }
 0xe3f   :  { %v10405_v51 = vpop.f32.mrb[21].mxu1  ;;  %10409 = vmatmul.mubr.msk.f32.vlgmr.msra.gmra.mrb[24].mxu0 %vm338_vm2, %v1922_v26  ;;  %v2306_v26 = vld [vmem:[#allocation2 + $0x88] sm:$0xff] }
 0xe40   :  { %10418 = vmatprep.mubr.msk.f32.mxu0 %vm11596_vm1, %v11595_v24  ;;  %v11045_v51 = vpack.c.bf16 %v2306_v26, %v2305_v50 }
 0xe42   :  { %v2074_v52 = vpop.f32.mrb[22].mxu1 }
 0xe43   :  { %v10415_v53 = vpop.f32.mrb[23].mxu1  ;;  %v2078_v54 = vsel %vm338_vm2, %v2074_v52, -inf }
 0xe44   :  { %2079 = vmax.xlane.f32.xlu0 %v2078_v54  ;;  %v2308_v53 = vld [vmem:[#allocation2 + $0x98] sm:$0xff] }
 0xe5a   :  { %2089 = vrot.lane.b32.xlu0 %v11722_v34, %s11599_s14  ;;  %v2253_v34 = vsel %vm79_vm0, %v2247_v62, 0.0 }
 0xed1   :  { %v2080_v55 = vpop.xlane.xlu0 %2079 }
 0xed2   :  { %v2081_v45 = vsub.f32 %v2074_v52, %v2080_v55  ;;  %v2307_v52 = vld [vmem:[#allocation2 + $0x90] sm:$0xff]  ;;  %v11600_v55 = vmov 0.0|0.0  }
 0xed3   :  { %v11049_v54 = vpack.c.bf16 %v2308_v53, %v2307_v52 }
 0xed4   :  { %v2082_v56 = vmul.f32 1.442695, %v2081_v45  ;;  %v50_v45 = vld [vmem:[%s12876_s1 + $0x10] sm:$0xff] }
 0xed5   :  { %v2090_v57 = vpop.permute.xlu0 %2089 }
 0xed6   :  { %11434 = vpow2.f32 %v2082_v56  ;;  %10417 = vmatpush3.msra.mxu0 %v2090_v57  ;;  %v56_v56 = vld [vmem:[%s12878_s3 + $0x10] sm:$0xff] }
 0xed7   :  { %11046 = vmatprep.subr.bf16.mxu0 %v11045_v51  ;;  %v11938_v57 = vadd.f32 %v56_v56, %v50_v45 }
 0xee0   :  { %v11435_v60 = vpop.eup %11434 }
 0xee1   :  { %v2084_v61 = vsel %vm338_vm2, %v11435_v60, 0.0 }
 0xee2   :  { %2085 = vadd.xlane.f32.xlu1 %v2084_v61 }
 0xee6   :  { %2254 = vadd.xlane.f32.xlu1 %v2253_v34 }
 0xf12   :  { %v1995_v0 = vpop.f32.mrb[24].mxu0 }
 0xf13   :  { %v1999_v1 = vadd.f32 %v1995_v0, %v1758_v36  ;;  %v10410_v2 = vpop.f32.mrb[25].mxu0 }
 0xf6f   :  { %v2086_v3 = vpop.xlane.xlu1 %2085 }
 0xf70   :  { %11436 = vrcp.f32 %v2086_v3 }
 0xf73   :  { %v2255_v4 = vpop.xlane.xlu1 %2254 }
 0xf74   :  { %v2260_v5 = vmul.f32 0.03125, %v2255_v4 }
 0xf76   :  { %v2262_v6 = vsub.f32 %v2247_v62, %v2260_v5 }
 0xf78   :  { %v2264_v7 = vmul.f32 %v2262_v6, %v2262_v6 }
 0xf7a   :  { %v11437_v8 = vpop.eup %11436  ;;  %v2266_v9 = vsel %vm79_vm0, %v2264_v7, 0.0  ;;  %v57_v7 = vld [vmem:[%s12878_s3 + $0x18] sm:$0xff] }
 0xf7b   :  { %2267 = vadd.xlane.f32.xlu0 %v2266_v9  ;;  %v2088_v10 = vmul.f32 %v11437_v8, %v11435_v60  ;;  %v2499_v9 = vld [vmem:[#allocation2 + $0xc0] sm:$0xff] }
 0xf7d   :  { %10419 = vmatmul.mubr.msk.f32.vlgmr.msra.gmra.mrb[26].mxu0 %vm338_vm2, %v2088_v10  ;;  %v2500_v10 = vld [vmem:[#allocation2 + $0xc8] sm:$0xff] }
 0xf7e   :  { %11048 = vmatpush3.bf16.msra.mxu0 %v11045_v51 }
 0xf7f   :  { %11050 = vmatprep.subr.bf16.mxu0 %v11049_v54 }
 0xf82   :  { %11052 = vmatpush3.bf16.msra.mxu0 %v11049_v54 }
0x1008   :  { %v2268_v11 = vpop.xlane.xlu0 %2267 }
0x1009   :  { %v2272_v12 = vmul.f32 0.03125, %v2268_v11  ;;  %v2501_v11 = vld [vmem:[#allocation2 + $0xd0] sm:$0xff] }
0x100b   :  { %v2274_v15 = vadd.f32 1e-05, %v2272_v12  ;;  %v11061_v12 = vpack.c.bf16 %v2500_v10, %v2499_v9 }
0x100d   :  { %11438 = vrsqrt.f32 %v2274_v15  ;;  %v2502_v15 = vld [vmem:[#allocation2 + $0xd8] sm:$0xff]  ;;  %11062 = vmatprep.subr.bf16.mxu0 %v11061_v12 }
0x1017   :  { %v11439_v17 = vpop.eup %11438 }
0x1018   :  { %v2278_v19 = vmul.f32 %v11439_v17, %v2262_v6  ;;  %v11065_v17 = vpack.c.bf16 %v2502_v15, %v2501_v11 }
0x101a   :  { %v2286_v21 = vmul.f32 %v11896_v18, %v2278_v19 }
0x101c   :  { %v11902_v22 = vadd.f32 %v9729_v20, %v2286_v21 }
0x101e   :  { %v2296_v23 = vadd.f32 %v11902_v22, %v11671_v13 }
0x1020   :  { %10434 = vmatprep.mubr.msk.f32.mxu0 %vm79_vm0, %v2296_v23  ;;  %v9733_v23 = vld [vmem:[%s12882_s7 + $0x3] ss:$0 sm:$0xff] }
0x1050   :  { %v2161_v27 = vpop.f32.mrb[26].mxu0 }
0x1051   :  { %v10420_v28 = vpop.f32.mrb[27].mxu0  ;;  %10424 = vmatmul.mubr.msk.f32.vlgmr.msra.gmra.mrb[24].mxu1 %vm338_vm2, %v2161_v27 }
0x1052   :  { %11056 = vmatpush3.bf16.msra.mxu1 %v11053_v41 }
0x1053   :  { %11058 = vmatprep.subr.bf16.mxu1 %v11057_v44 }
0x1056   :  { %11060 = vmatpush3.bf16.msra.mxu1 %v11057_v44 }
0x1057   :  { %11069 = vmatprep.subr.bf16.mxu1 %v11600_v55 }
0x1124   :  { %v2234_v30 = vpop.f32.mrb[24].mxu1 }
0x1125   :  { %v2238_v32 = vadd.f32 %v2234_v30, %v1999_v1  ;;  %v10425_v63 = vpop.f32.mrb[25].mxu1 }
0x1127   :  { %v2246_v31 = vadd.f32 %v9725_v58, %v2238_v32 }
0x1129   :  { %v2248_v33 = vadd.f32 %v2246_v31, %v11676_v14  ;;  %v48_v14 = vld [vmem:[%s12876_s1] sm:$0xff] }
0x112a   :  { %v11917_v47 = vadd.f32 %v54_v46, %v48_v14 }
0x112b   :  { %v2256_v35 = vsel %vm79_vm0, %v2248_v33, 0.0 }
0x112c   :  { %2257 = vadd.xlane.f32.xlu1 %v2256_v35  ;;  %10445 = vmatprep.mubr.msk.f32.mxu1 %vm79_vm0, %v11917_v47 }
0x112d   :  { %10446 = vmatmul.mubr.msk.f32.vlgmr.msra.gmra.mrb[26].mxu1 %vm79_vm0, %v11925_v29 }
0x112e   :  { %10448 = vmatprep.mubr.msk.f32.mxu1 %vm79_vm0, %v11938_v57 }
0x11b9   :  { %v2258_v36 = vpop.xlane.xlu1 %2257 }
0x11ba   :  { %v2261_v37 = vmul.f32 0.03125, %v2258_v36  ;;  %v9740_v36 = vld [vmem:[%s12882_s7 + $0x4] ss:$0 sm:$0xff] }
0x11bc   :  { %v2263_v38 = vsub.f32 %v2248_v33, %v2261_v37 }
0x11be   :  { %v2265_v39 = vmul.f32 %v2263_v38, %v2263_v38 }
0x11c0   :  { %v2269_v13 = vsel %vm79_vm0, %v2265_v39, 0.0 }
0x11c1   :  { %2270 = vadd.xlane.f32.xlu1 %v2269_v13 }
0x1200   :  { %v10447_v2 = vpop.f32.mrb[26].mxu1 }
0x1201   :  { %v2479_v3 = vpop.f32.mrb[27].mxu1 }
0x1202   :  { %v11070_v5 = vpack.c.bf16 %v10447_v2, %v2479_v3  ;;  %v11955_v6 = vpack.i.bf16 %v10447_v2, %v2479_v3 }
0x1204   :  { %11287 = vrot.lane.b32.xlu1 %v11955_v6, %s11597_s10  ;;  %11072 = vmatpush3.bf16.xpose.msk.msra.mxu1 %vm11951_vm3, %v11070_v5 }
0x1205   :  { %11073 = vmatprep.subr.bf16.mxu1 %v11600_v55 }
0x124e   :  { %v2271_v58 = vpop.xlane.xlu1 %2270 }
0x124f   :  { %v2273_v59 = vmul.f32 0.03125, %v2271_v58 }
0x1251   :  { %v2275_v60 = vadd.f32 1e-05, %v2273_v59 }
0x1253   :  { %11440 = vrsqrt.f32 %v2275_v60 }
0x125d   :  { %v11441_v61 = vpop.eup %11440 }
0x125e   :  { %v2279_v62 = vmul.f32 %v11441_v61, %v2263_v38 }
0x1260   :  { %v2287_v34 = vmul.f32 %v11896_v18, %v2279_v62 }
0x1262   :  { %v11943_v0 = vadd.f32 %v9729_v20, %v2287_v34 }
0x1264   :  { %v2297_v1 = vadd.f32 %v11943_v0, %v11683_v16  ;;  %v51_v16 = vld [vmem:[%s12876_s1 + $0x18] sm:$0xff] }
0x1265   :  { %v11968_v8 = vadd.f32 %v57_v7, %v51_v16 }
0x1266   :  { %10435 = vmatmul.mubr.msk.f32.vlgmr.msra.gmra.mrb[28].mxu0 %vm79_vm0, %v2297_v1 }
0x1267   :  { %10459 = vmatprep.mubr.msk.f32.mxu0 %vm79_vm0, %v48_v14  ;;  %10449 = vmatmul.mubr.msk.f32.gmra.mrb[28].mxu1 %vm79_vm0, %v11968_v8 }
0x1268   :  { %10469 = vmatprep.mubr.msk.f32.mxu1 %vm11596_vm1, %v11595_v24  ;;  %11064 = vmatpush3.bf16.msra.mxu0 %v11061_v12 }
0x1269   :  { %11066 = vmatprep.subr.bf16.mxu0 %v11065_v17 }
0x126c   :  { %11068 = vmatpush3.bf16.msra.mxu0 %v11065_v17  ;;  %v12041_v17 = vld [vmem:[#allocation2 + $0xe0] sm:$0xff] }
0x126d   :  { %11076 = vmatprep.subr.bf16.mxu0 %v11600_v55 }
0x126f   :  { %10460 = vmatmul.mubr.msk.f32.vlgmr.msra.gmra.mrb[30].mxu0 %vm79_vm0, %v49_v48 }
0x1270   :  { %10462 = vmatprep.mubr.msk.f32.mxu0 %vm79_vm0, %v50_v45 }
0x1273   :  { %10463 = vmatmul.mubr.msk.f32.gmra.mrb[32].mxu0 %vm79_vm0, %v51_v16  ;;  %v12036_v16 = vld [vmem:[#allocation2 + $0xe8] sm:$0xff] }
0x1274   :  { %10483 = vmatprep.mubr.msk.f32.mxu0 %vm11596_vm1, %v11595_v24 }
0x1276   :  { %v11288_v18 = vpop.permute.xlu1 %11287 }
0x1277   :  { %v11290_v19 = vunpack.i.h.bf16 %v11288_v18  ;;  %v11289_v20 = vunpack.i.l.bf16 %v11288_v18 }
0x1279   :  { %v11077_v21 = vpack.c.bf16 %v11290_v19, %v11289_v20 }
0x127b   :  { %11079 = vmatpush3.bf16.xpose.msk.msra.mxu0 %vm11951_vm3, %v11077_v21 }
0x127c   :  { %10493 = vmatprep.subr.mxu0 %v11595_v24 }
0x1339   :  { %v10436_v27 = vpop.f32.mrb[28].mxu0 }
0x133a   :  { %v11986_v28 = vadd.f32 %v10436_v27, %v9733_v23  ;;  %v2387_v30 = vpop.f32.mrb[29].mxu0  ;;  %v11992_v63 = vpop.f32.mrb[28].mxu1 }
0x133b   :  { %v2388_v32 = vadd.f32 %v9733_v23, %v2387_v30  ;;  %v11994_v31 = vpop.f32.mrb[29].mxu1 }
0x133c   :  { %v11098_v33 = vpack.c.bf16 %v11992_v63, %v11994_v31  ;;  %v12011_v44 = vpack.i.bf16 %v11992_v63, %v11994_v31 }
0x133d   :  { %2775 = vrot.lane.b32.xlu1 %v2388_v32, %s11597_s10  ;;  %10470 = vmatmul.mubr.msk.f32.vlgmr.msra.gmra.mrb[30].mxu1 %vm338_vm2, %v2388_v32 }
0x133e   :  { %10476 = vmatprep.mubr.msk.f32.mxu1 %vm11596_vm1, %v11595_v24 }
0x1342   :  { %v10461_v35 = vpop.f32.mrb[30].mxu0 }
0x1343   :  { %v2593_v37 = vadd.f32 %v10461_v35, %v9740_v36  ;;  %v2587_v38 = vpop.f32.mrb[31].mxu0 }
0x1344   :  { %v2588_v39 = vadd.f32 %v9740_v36, %v2587_v38 }
0x1346   :  { %v10464_v13 = vpop.f32.mrb[32].mxu0  ;;  %v11074_v42 = vpack.c.bf16 %v2593_v37, %v2588_v39  ;;  %v12025_v1 = vpack.i.bf16 %v2593_v37, %v2588_v39 }
0x1347   :  { %v12001_v40 = vadd.f32 %v10464_v13, %v9740_v36  ;;  %v2597_v25 = vpop.f32.mrb[33].mxu0 }
0x1348   :  { %v12003_v41 = vadd.f32 %v9740_v36, %v2597_v25  ;;  %11075 = vmatpush3.bf16.msra.mxu1 %v11074_v42 }
0x1349   :  { %11080 = vmatprep.subr.bf16.mxu1 %v11600_v55 }
0x134a   :  { %v11102_v14 = vpack.c.bf16 %v12001_v40, %v12003_v41  ;;  %v12017_v46 = vpack.i.bf16 %v12001_v40, %v12003_v41 }
0x13af   :  { %v2776_v43 = vpop.permute.xlu1 %2775 }
0x13b0   :  { %10484 = vmatmul.mubr.msk.f32.vlgmr.msra.gmra.mrb[34].mxu0 %vm338_vm2, %v2776_v43 }
0x13b1   :  { %10495 = vmatprep.mubr.msk.f32.mxu0 %vm11596_vm1, %v11595_v24  ;;  %10494 = vmatpush3.msra.mxu0 %v12036_v16 }
0x13b2   :  { %11083 = vmatprep.subr.bf16.mxu0 %v11600_v55 }
0x1410   :  { %v2686_v48 = vpop.f32.mrb[30].mxu1 }
0x1411   :  { %v10471_v49 = vpop.f32.mrb[31].mxu1  ;;  %v2691_v50 = vsel %vm2690_vm4, %v2686_v48, -inf }
0x1412   :  { %2692 = vmax.xlane.f32.xlu1 %v2691_v50 }
0x1423   :  { %11297 = vrot.lane.b32.xlu1 %v11955_v6, %s11598_s13 }
0x1483   :  { %v2853_v26 = vpop.f32.mrb[34].mxu0 }
0x1484   :  { %v10485_v51 = vpop.f32.mrb[35].mxu0  ;;  %v2857_v52 = vsel %vm2690_vm4, %v2853_v26, -inf }
0x1485   :  { %2858 = vmax.xlane.f32.xlu0 %v2857_v52 }
0x149f   :  { %v2693_v53 = vpop.xlane.xlu1 %2692 }
0x14a0   :  { %v2694_v54 = vsub.f32 %v2686_v48, %v2693_v53 }
0x14a2   :  { %v2695_v45 = vmul.f32 1.442695, %v2694_v54 }
0x14a3   :  { %v11298_v20 = vpop.permute.xlu1 %11297 }
0x14a4   :  { %11442 = vpow2.f32 %v2695_v45  ;;  %v11300_v23 = vunpack.i.h.bf16 %v11298_v20  ;;  %v11299_v27 = vunpack.i.l.bf16 %v11298_v20 }
0x14a6   :  { %v11084_v30 = vpack.c.bf16 %v11300_v23, %v11299_v27  ;;  %v12096_v23 = vld [vmem:[#allocation2 + $0xf0] sm:$0xff] }
0x14ae   :  { %v11443_v56 = vpop.eup %11442 }
0x14af   :  { %v2697_v58 = vsel %vm2690_vm4, %v11443_v56, 0.0 }
0x14b0   :  { %2698 = vadd.xlane.f32.xlu0 %v2697_v58 }
0x1512   :  { %v2859_v59 = vpop.xlane.xlu0 %2858 }
0x1513   :  { %v2860_v60 = vsub.f32 %v2853_v26, %v2859_v59 }
0x1515   :  { %v2861_v61 = vmul.f32 1.442695, %v2860_v60 }
0x1517   :  { %11444 = vpow2.f32 %v2861_v61 }
0x1521   :  { %v11445_v62 = vpop.eup %11444 }
0x1522   :  { %v2863_v34 = vsel %vm2690_vm4, %v11445_v62, 0.0 }
0x1523   :  { %2864 = vadd.xlane.f32.xlu0 %v2863_v34 }
0x1539   :  { %11292 = vrot.lane.b32.xlu0 %v12025_v1, %s11597_s10 }
0x153d   :  { %3095 = vrot.lane.b32.xlu0 %v2388_v32, %s11598_s13  ;;  %v2699_v2 = vpop.xlane.xlu0 %2698 }
0x153e   :  { %11446 = vrcp.f32 %v2699_v2 }
0x1541   :  { %11302 = vrot.lane.b32.xlu0 %v11955_v6, %s11599_s14 }
0x1545   :  { %3341 = vrot.lane.b32.xlu0 %v2388_v32, %s11599_s14 }
0x1548   :  { %v11447_v3 = vpop.eup %11446 }
0x1549   :  { %v2701_v5 = vmul.f32 %v11447_v3, %v11443_v56 }
0x154b   :  { %10477 = vmatmul.mubr.msk.f32.vlgmr.msra.gmra.mrb[32].mxu1 %vm2690_vm4, %v2701_v5 }
0x154c   :  { %10490 = vmatprep.mubr.msk.f32.mxu1 %vm11596_vm1, %v11595_v24 }
0x15b0   :  { %v2865_v7 = vpop.xlane.xlu0 %2864 }
0x15b1   :  { %11448 = vrcp.f32 %v2865_v7 }
0x15b4   :  { %v11293_v9 = vpop.permute.xlu0 %11292 }
0x15b5   :  { %v11295_v10 = vunpack.i.h.bf16 %v11293_v9  ;;  %v11294_v6 = vunpack.i.l.bf16 %v11293_v9 }
0x15b7   :  { %v11081_v11 = vpack.c.bf16 %v11295_v10, %v11294_v6 }
0x15b8   :  { %v3096_v21 = vpop.permute.xlu0 %3095 }
0x15b9   :  { %11082 = vmatpush3.bf16.msra.mxu1 %v11081_v11 }
0x15ba   :  { %10498 = vmatprep.subr.mxu1 %v11595_v24 }
0x15bb   :  { %v11449_v12 = vpop.eup %11448 }
0x15bc   :  { %v2867_v15 = vmul.f32 %v11449_v12, %v11445_v62  ;;  %v11303_v35 = vpop.permute.xlu0 %11302 }
0x15bd   :  { %v11305_v37 = vunpack.i.h.bf16 %v11303_v35  ;;  %v11304_v38 = vunpack.i.l.bf16 %v11303_v35 }
0x15be   :  { %10491 = vmatmul.mubr.msk.f32.vlgmr.msra.gmra.mrb[34].mxu1 %vm2690_vm4, %v2867_v15 }
0x15bf   :  { %10499 = vmatpush3.msra.mxu1 %v12041_v17  ;;  %10500 = vmatprep.mubr.msk.f32.mxu1 %vm11596_vm1, %v11595_v24  ;;  %v11091_v39 = vpack.c.bf16 %v11305_v37, %v11304_v38 }
0x15c0   :  { %11087 = vmatprep.subr.bf16.mxu1 %v11600_v55  ;;  %v3342_v13 = vpop.permute.xlu0 %3341 }
0x161e   :  { %v2771_v18 = vpop.f32.mrb[32].mxu1 }
0x161f   :  { %v10478_v19 = vpop.f32.mrb[33].mxu1  ;;  %10501 = vmatmul.mubr.msk.f32.vlgmr.msra.gmra.mrb[36].mxu1 %vm338_vm2, %v2771_v18 }
0x1620   :  { %10514 = vmatprep.mubr.msk.f32.mxu1 %vm11596_vm1, %v11595_v24 }
0x1691   :  { %v2945_v32 = vpop.f32.mrb[34].mxu1 }
0x1692   :  { %v10492_v36 = vpop.f32.mrb[35].mxu1  ;;  %10496 = vmatmul.mubr.msk.f32.vlgmr.msra.gmra.mrb[36].mxu0 %vm338_vm2, %v2945_v32 }
0x1693   :  { %11086 = vmatpush3.bf16.xpose.msk.msra.mxu0 %vm11951_vm3, %v11084_v30  ;;  %10507 = vmatprep.mubr.msk.f32.mxu0 %vm11596_vm1, %v11595_v24 }
0x1694   :  { %11090 = vmatprep.subr.bf16.mxu0 %v11600_v55 }
0x169a   :  { %10508 = vmatmul.mubr.msk.f32.vlgmr.msra.gmra.mrb[38].mxu0 %vm338_vm2, %v3096_v21 }
0x169b   :  { %11093 = vmatpush3.bf16.xpose.msk.msra.mxu0 %vm11951_vm3, %v11091_v39  ;;  %10526 = vmatprep.mubr.msk.f32.mxu0 %vm11596_vm1, %v11595_v24 }
0x169c   :  { %11097 = vmatprep.subr.bf16.mxu0 %v11600_v55 }
0x16a2   :  { %10527 = vmatmul.mubr.msk.f32.vlgmr.msra.gmra.mrb[40].mxu0 %vm338_vm2, %v3342_v13  ;;  %v12107_v13 = vld [vmem:[#allocation2 + $0xf8] sm:$0xff] }
0x16a3   :  { %11100 = vmatpush3.bf16.xpose.msk.msra.mxu0 %vm11951_vm3, %v11098_v33  ;;  %10545 = vmatprep.mubr.msk.f32.mxu0 %vm11596_vm1, %v11595_v24 }
0x16a4   :  { %11108 = vmatprep.subr.bf16.mxu0 %v11600_v55 }
0x16aa   :  { %10546 = vmatmul.mubr.msk.f32.vlgmr.msra.gmra.mrb[42].mxu0 %vm338_vm2, %v11986_v28 }
0x16ab   :  { %10566 = vmatprep.mubr.msk.f32.mxu0 %vm11596_vm1, %v11595_v24 }
0x16f2   :  { %v3091_v25 = vpop.f32.mrb[36].mxu1 }
0x16f3   :  { %v10502_v42 = vpop.f32.mrb[37].mxu1 }
0x1765   :  { %v3018_v43 = vpop.f32.mrb[36].mxu0 }
0x1766   :  { %v12076_v48 = vadd.f32 %v3091_v25, %v3018_v43  ;;  %v10497_v63 = vpop.f32.mrb[37].mxu0 }
0x176d   :  { %v3173_v31 = vpop.f32.mrb[38].mxu0 }
0x176e   :  { %v10509_v49 = vpop.f32.mrb[39].mxu0  ;;  %v3177_v33 = vsel %vm2690_vm4, %v3173_v31, -inf }
0x176f   :  { %3178 = vmax.xlane.f32.xlu0 %v3177_v33 }
0x1775   :  { %v3419_v50 = vpop.f32.mrb[40].mxu0 }
0x1776   :  { %v10528_v26 = vpop.f32.mrb[41].mxu0  ;;  %v3423_v2 = vsel %vm2690_vm4, %v3419_v50, -inf }
0x177d   :  { %v3662_v51 = vpop.f32.mrb[42].mxu0 }
0x177e   :  { %v10547_v52 = vpop.f32.mrb[43].mxu0  ;;  %v3666_v53 = vsel %vm2690_vm4, %v3662_v51, -inf }
0x1785   :  { %11307 = vrot.lane.b32.xlu0 %v12025_v1, %s11598_s13 }
0x17a4   :  { %3667 = vmax.xlane.f32.xlu0 %v3666_v53 }
0x17ba   :  { %11317 = vrot.lane.b32.xlu0 %v12011_v44, %s11597_s10 }
0x17fc   :  { %v3179_v54 = vpop.xlane.xlu0 %3178 }
0x17fd   :  { %v3180_v45 = vsub.f32 %v3173_v31, %v3179_v54 }
0x17ff   :  { %v3181_v56 = vmul.f32 1.442695, %v3180_v45 }
0x1800   :  { %v11308_v58 = vpop.permute.xlu0 %11307 }
0x1801   :  { %11450 = vpow2.f32 %v3181_v56  ;;  %v11310_v59 = vunpack.i.h.bf16 %v11308_v58  ;;  %v11309_v60 = vunpack.i.l.bf16 %v11308_v58 }
0x1803   :  { %v11088_v61 = vpack.c.bf16 %v11310_v59, %v11309_v60 }
0x1805   :  { %11089 = vmatpush3.bf16.msra.mxu1 %v11088_v61 }
0x1806   :  { %10517 = vmatprep.subr.mxu1 %v11595_v24 }
0x180b   :  { %v11451_v62 = vpop.eup %11450 }
0x180c   :  { %v3183_v34 = vsel %vm2690_vm4, %v11451_v62, 0.0 }
0x180d   :  { %3184 = vadd.xlane.f32.xlu1 %v3183_v34 }
0x1811   :  { %3424 = vmax.xlane.f32.xlu1 %v3423_v2 }
0x1831   :  { %v3668_v15 = vpop.xlane.xlu0 %3667 }
0x1832   :  { %v3669_v18 = vsub.f32 %v3662_v51, %v3668_v15 }
0x1834   :  { %v3670_v19 = vmul.f32 1.442695, %v3669_v18 }
0x189a   :  { %v3185_v3 = vpop.xlane.xlu1 %3184 }
0x189b   :  { %11452 = vrcp.f32 %v3185_v3 }
0x189e   :  { %v3425_v5 = vpop.xlane.xlu1 %3424 }
0x189f   :  { %v3426_v7 = vsub.f32 %v3419_v50, %v3425_v5  ;;  %v11318_v50 = vpop.permute.xlu0 %11317 }
0x18a0   :  { %v11320_v51 = vunpack.i.h.bf16 %v11318_v50  ;;  %v11319_v52 = vunpack.i.l.bf16 %v11318_v50 }
0x18a1   :  { %v3427_v9 = vmul.f32 1.442695, %v3426_v7 }
0x18a3   :  { %11454 = vpow2.f32 %v3427_v9 }
0x18a4   :  { %11456 = vpow2.f32 %v3670_v19 }
0x18a5   :  { %v11453_v10 = vpop.eup %11452 }
0x18a6   :  { %v3187_v6 = vmul.f32 %v11453_v10, %v11451_v62 }
0x18a8   :  { %10515 = vmatmul.mubr.msk.f32.vlgmr.msra.gmra.mrb[38].mxu1 %vm2690_vm4, %v3187_v6 }
0x18a9   :  { %10519 = vmatprep.mubr.msk.f32.mxu1 %vm11596_vm1, %v11595_v24  ;;  %10518 = vmatpush3.msra.mxu1 %v12096_v23 }
0x18aa   :  { %11094 = vmatprep.subr.bf16.mxu1 %v11600_v55 }
0x18ad   :  { %v11455_v11 = vpop.eup %11454 }
0x18ae   :  { %v3429_v12 = vsel %vm2690_vm4, %v11455_v11, 0.0  ;;  %v11457_v20 = vpop.eup %11456 }
0x18af   :  { %3430 = vadd.xlane.f32.xlu1 %v3429_v12  ;;  %v3672_v21 = vsel %vm2690_vm4, %v11457_v20, 0.0 }
0x18c0   :  { %11312 = vrot.lane.b32.xlu1 %v12025_v1, %s11599_s14 }
0x18e4   :  { %3673 = vadd.xlane.f32.xlu1 %v3672_v21 }
0x18f5   :  { %3750 = vrot.lane.b32.xlu1 %v11986_v28, %s11597_s10 }
0x193c   :  { %v3431_v27 = vpop.xlane.xlu1 %3430 }
0x193d   :  { %11458 = vrcp.f32 %v3431_v27 }
0x1940   :  { %v11313_v1 = vpop.permute.xlu1 %11312 }
0x1941   :  { %v11315_v30 = vunpack.i.h.bf16 %v11313_v1  ;;  %v11314_v32 = vunpack.i.l.bf16 %v11313_v1 }
0x1943   :  { %v11095_v36 = vpack.c.bf16 %v11315_v30, %v11314_v32 }
0x1947   :  { %v11459_v35 = vpop.eup %11458 }
0x1948   :  { %v3433_v39 = vmul.f32 %v11459_v35, %v11455_v11 }
0x1971   :  { %v3674_v25 = vpop.xlane.xlu1 %3673 }
0x1972   :  { %11460 = vrcp.f32 %v3674_v25 }
0x1975   :  { %v3751_v40 = vpop.permute.xlu1 %3750 }
0x197b   :  { %v3263_v37 = vpop.f32.mrb[38].mxu1 }
0x197c   :  { %v10516_v38 = vpop.f32.mrb[39].mxu1  ;;  %10520 = vmatmul.mubr.msk.f32.vlgmr.msra.gmra.mrb[40].mxu1 %vm338_vm2, %v3263_v37  ;;  %v11461_v31 = vpop.eup %11460 }
0x197d   :  { %11096 = vmatpush3.bf16.msra.mxu1 %v11095_v36  ;;  %10533 = vmatprep.mubr.msk.f32.mxu1 %vm11596_vm1, %v11595_v24  ;;  %v3676_v26 = vmul.f32 %v11461_v31, %v11457_v20 }
0x197e   :  { %10536 = vmatprep.subr.mxu1 %v11595_v24 }
0x1980   :  { %10534 = vmatmul.mubr.msk.f32.vlgmr.msra.gmra.mrb[42].mxu1 %vm2690_vm4, %v3433_v39 }
0x1981   :  { %10538 = vmatprep.mubr.msk.f32.mxu1 %vm11596_vm1, %v11595_v24  ;;  %10537 = vmatpush3.msra.mxu1 %v12107_v13 }
0x1982   :  { %11101 = vmatprep.subr.bf16.mxu1 %v11600_v55 }
0x1a4f   :  { %v3336_v42 = vpop.f32.mrb[40].mxu1 }
0x1a50   :  { %v3340_v43 = vadd.f32 %v3336_v42, %v12076_v48  ;;  %v10521_v63 = vpop.f32.mrb[41].mxu1  ;;  %v11105_v48 = vpack.c.bf16 %v11320_v51, %v11319_v52 }
0x1a53   :  { %v3509_v49 = vpop.f32.mrb[42].mxu1 }
0x1a54   :  { %v10535_v33 = vpop.f32.mrb[43].mxu1  ;;  %10539 = vmatmul.mubr.msk.f32.vlgmr.msra.gmra.mrb[44].mxu1 %vm338_vm2, %v3509_v49 }
0x1a55   :  { %11103 = vmatpush3.bf16.msra.mxu1 %v11102_v14  ;;  %10552 = vmatprep.mubr.msk.f32.mxu1 %vm11596_vm1, %v11595_v24 }
0x1a56   :  { %11104 = vmatprep.subr.bf16.mxu1 %v11600_v55 }
0x1a58   :  { %10553 = vmatmul.mubr.msk.f32.vlgmr.msra.gmra.mrb[46].mxu1 %vm2690_vm4, %v3676_v26 }
0x1a59   :  { %10559 = vmatprep.mubr.msk.f32.mxu1 %vm11596_vm1, %v11595_v24 }
0x1a5e   :  { %11107 = vmatpush3.bf16.xpose.msk.msra.mxu1 %vm11951_vm3, %v11105_v48 }
0x1a5f   :  { %10574 = vmatprep.subr.mxu1 %v11595_v24 }
0x1a65   :  { %10560 = vmatmul.mubr.msk.f32.vlgmr.msra.gmra.mrb[48].mxu1 %vm338_vm2, %v3751_v40 }
0x1a66   :  { %10575 = vmatpush3.msra.mxu1 %v12041_v17  ;;  %10576 = vmatprep.mubr.msk.f32.mxu1 %vm11596_vm1, %v11595_v24 }
0x1a67   :  { %11115 = vmatprep.subr.bf16.mxu1 %v11600_v55 }
0x1b27   :  { %v3582_v41 = vpop.f32.mrb[44].mxu1 }
0x1b28   :  { %v12130_v14 = vadd.f32 %v3582_v41, %v3340_v43  ;;  %v10540_v53 = vpop.f32.mrb[45].mxu1 }
0x1b29   :  { %v9785_v53 = vld [vmem:[%s12882_s7 + $0x5] ss:$0 sm:$0xff] }
0x1b2b   :  { %v3746_v54 = vpop.f32.mrb[46].mxu1 }
0x1b2c   :  { %v10554_v45 = vpop.f32.mrb[47].mxu1  ;;  %10577 = vmatmul.mubr.msk.f32.vlgmr.msra.gmra.mrb[50].mxu1 %vm338_vm2, %v3746_v54  ;;  %v4568_v54 = vadd.f32 %v9785_v53, %v12130_v14 }
0x1b2d   :  { %10590 = vmatprep.mubr.msk.f32.mxu1 %vm11596_vm1, %v11595_v24 }
0x1b2e   :  { %v4570_v45 = vadd.f32 %v4568_v54, %v11902_v22  ;;  %v4714_v54 = vld [vmem:[%s12881_s6 + $0x10] sm:$0xff] }
0x1b38   :  { %v3828_v56 = vpop.f32.mrb[48].mxu1 }
0x1b39   :  { %v10561_v58 = vpop.f32.mrb[49].mxu1  ;;  %v3832_v17 = vsel %vm2690_vm4, %v3828_v56, -inf }
0x1b3a   :  { %3833 = vmax.xlane.f32.xlu0 %v3832_v17 }
0x1b50   :  { %11322 = vrot.lane.b32.xlu0 %v12017_v46, %s11597_s10 }
0x1b54   :  { %4070 = vrot.lane.b32.xlu0 %v11986_v28, %s11598_s13 }
0x1b58   :  { %11332 = vrot.lane.b32.xlu0 %v12011_v44, %s11599_s14 }
0x1b5c   :  { %4316 = vrot.lane.b32.xlu0 %v11986_v28, %s11599_s14 }
0x1bc7   :  { %v3834_v59 = vpop.xlane.xlu0 %3833 }
0x1bc8   :  { %v3835_v60 = vsub.f32 %v3828_v56, %v3834_v59  ;;  %v4576_v56 = vsel %vm79_vm0, %v4570_v45, 0.0 }
0x1bca   :  { %v3836_v61 = vmul.f32 1.442695, %v3835_v60 }
0x1bcb   :  { %v11323_v62 = vpop.permute.xlu0 %11322 }
0x1bcc   :  { %11462 = vpow2.f32 %v3836_v61  ;;  %v11325_v34 = vunpack.i.h.bf16 %v11323_v62  ;;  %v11324_v2 = vunpack.i.l.bf16 %v11323_v62 }
0x1bce   :  { %v11109_v3 = vpack.c.bf16 %v11325_v34, %v11324_v2 }
0x1bcf   :  { %v4071_v15 = vpop.permute.xlu0 %4070 }
0x1bd0   :  { %11110 = vmatpush3.bf16.msra.mxu0 %v11109_v3 }
0x1bd1   :  { %10569 = vmatprep.subr.mxu0 %v11595_v24 }
0x1bd3   :  { %v11333_v21 = vpop.permute.xlu0 %11332 }
0x1bd4   :  { %v11334_v1 = vunpack.i.l.bf16 %v11333_v21 }
0x1bd6   :  { %v11463_v5 = vpop.eup %11462 }
0x1bd7   :  { %v3838_v7 = vsel %vm2690_vm4, %v11463_v5, 0.0  ;;  %v4317_v32 = vpop.permute.xlu0 %4316 }
0x1bd8   :  { %3839 = vadd.xlane.f32.xlu1 %v3838_v7 }
0x1be9   :  { %11327 = vrot.lane.b32.xlu1 %v12011_v44, %s11598_s13 }
0x1bff   :  { %v4066_v9 = vpop.f32.mrb[50].mxu1 }
0x1c00   :  { %v10578_v28 = vpop.f32.mrb[51].mxu1 }
0x1c65   :  { %v3840_v10 = vpop.xlane.xlu1 %3839 }
0x1c66   :  { %11464 = vrcp.f32 %v3840_v10 }
0x1c69   :  { %v11328_v12 = vpop.permute.xlu1 %11327 }
0x1c6a   :  { %v11330_v18 = vunpack.i.h.bf16 %v11328_v12  ;;  %v11329_v19 = vunpack.i.l.bf16 %v11328_v12  ;;  %v12196_v12 = vld [vmem:[%s12882_s7 + $0xa] ss:$0 sm:$0xff] }
0x1c6c   :  { %v11112_v44 = vpack.c.bf16 %v11330_v18, %v11329_v19 }
0x1c70   :  { %v11465_v6 = vpop.eup %11464 }
0x1c71   :  { %v3842_v11 = vmul.f32 %v11465_v6, %v11463_v5 }
0x1c73   :  { %10567 = vmatmul.mubr.msk.f32.vlgmr.msra.gmra.mrb[44].mxu0 %vm2690_vm4, %v3842_v11 }
0x1c74   :  { %10570 = vmatpush3.msra.mxu0 %v12036_v16  ;;  %10571 = vmatprep.mubr.msk.f32.mxu0 %vm11596_vm1, %v11595_v24  ;;  %v11335_v16 = vunpack.i.h.bf16 %v11333_v21 }
0x1c75   :  { %11111 = vmatprep.subr.bf16.mxu0 %v11600_v55 }
0x1c76   :  { %v11119_v30 = vpack.c.bf16 %v11335_v16, %v11334_v1 }
0x1d46   :  { %v3920_v20 = vpop.f32.mrb[44].mxu0 }
0x1d47   :  { %v10568_v27 = vpop.f32.mrb[45].mxu0  ;;  %10572 = vmatmul.mubr.msk.f32.vlgmr.msra.gmra.mrb[46].mxu0 %vm338_vm2, %v3920_v20 }
0x1d48   :  { %11114 = vmatpush3.bf16.xpose.msk.msra.mxu0 %vm11951_vm3, %v11112_v44  ;;  %10583 = vmatprep.mubr.msk.f32.mxu0 %vm11596_vm1, %v11595_v24 }
0x1d49   :  { %11118 = vmatprep.subr.bf16.mxu0 %v11600_v55 }
0x1d4f   :  { %10584 = vmatmul.mubr.msk.f32.vlgmr.msra.gmra.mrb[48].mxu0 %vm338_vm2, %v4071_v15 }
0x1d50   :  { %11121 = vmatpush3.bf16.xpose.msk.msra.mxu0 %vm11951_vm3, %v11119_v30  ;;  %10602 = vmatprep.mubr.msk.f32.mxu0 %vm11596_vm1, %v11595_v24 }
0x1d57   :  { %10603 = vmatmul.mubr.msk.f32.vlgmr.msra.gmra.mrb[50].mxu0 %vm338_vm2, %v4317_v32 }
0x1e1a   :  { %v3993_v35 = vpop.f32.mrb[46].mxu0 }
0x1e1b   :  { %v12165_v36 = vadd.f32 %v4066_v9, %v3993_v35  ;;  %v10573_v37 = vpop.f32.mrb[47].mxu0 }
0x1e22   :  { %v4148_v38 = vpop.f32.mrb[48].mxu0 }
0x1e23   :  { %v10585_v39 = vpop.f32.mrb[49].mxu0  ;;  %v4152_v25 = vsel %vm2690_vm4, %v4148_v38, -inf }
0x1e24   :  { %4153 = vmax.xlane.f32.xlu1 %v4152_v25 }
0x1e2a   :  { %v4394_v42 = vpop.f32.mrb[50].mxu0 }
0x1e2b   :  { %v10604_v43 = vpop.f32.mrb[51].mxu0  ;;  %v4398_v63 = vsel %vm2690_vm4, %v4394_v42, -inf }
0x1e2c   :  { %4399 = vmax.xlane.f32.xlu1 %v4398_v63 }
0x1eb1   :  { %v4154_v31 = vpop.xlane.xlu1 %4153 }
0x1eb2   :  { %v4155_v49 = vsub.f32 %v4148_v38, %v4154_v31 }
0x1eb4   :  { %v4156_v33 = vmul.f32 1.442695, %v4155_v49 }
0x1eb6   :  { %11466 = vpow2.f32 %v4156_v33 }
0x1eb9   :  { %v4400_v50 = vpop.xlane.xlu1 %4399 }
0x1eba   :  { %v4401_v26 = vsub.f32 %v4394_v42, %v4400_v50 }
0x1ebc   :  { %v4402_v51 = vmul.f32 1.442695, %v4401_v26  ;;  %v4618_v26 = vld [vmem:[%s12880_s5] sm:$0xff] }
0x1ebe   :  { %11468 = vpow2.f32 %v4402_v51  ;;  %v4619_v51 = vld [vmem:[%s12880_s5 + $0x8] sm:$0xff] }
0x1ec0   :  { %v11467_v52 = vpop.eup %11466 }
0x1ec1   :  { %v4158_v48 = vsel %vm2690_vm4, %v11467_v52, 0.0 }
0x1ec2   :  { %4159 = vadd.xlane.f32.xlu0 %v4158_v48  ;;  %v4621_v48 = vld [vmem:[%s12880_s5 + $0x18] sm:$0xff] }
0x1ec8   :  { %v11469_v40 = vpop.eup %11468 }
0x1ec9   :  { %v4404_v41 = vsel %vm2690_vm4, %v11469_v40, 0.0 }
0x1eca   :  { %4405 = vadd.xlane.f32.xlu1 %v4404_v41  ;;  %v4712_v41 = vld [vmem:[%s12881_s6] sm:$0xff] }
0x1ed8   :  { %11337 = vrot.lane.b32.xlu0 %v12017_v46, %s11598_s13 }
0x1edb   :  { %11342 = vrot.lane.b32.xlu1 %v12017_v46, %s11599_s14 }
0x1ef7   :  { %4577 = vadd.xlane.f32.xlu0 %v4576_v56  ;;  %v4715_v56 = vld [vmem:[%s12881_s6 + $0x18] sm:$0xff] }
0x1f4f   :  { %v4160_v58 = vpop.xlane.xlu0 %4159 }
0x1f50   :  { %11470 = vrcp.f32 %v4160_v58  ;;  %v11137_v58 = vpack.c.bf16 %v4715_v56, %v4714_v54 }
0x1f53   :  { %v11338_v17 = vpop.permute.xlu0 %11337 }
0x1f54   :  { %v11340_v59 = vunpack.i.h.bf16 %v11338_v17  ;;  %v11339_v60 = vunpack.i.l.bf16 %v11338_v17  ;;  %v4716_v17 = vld [vmem:[%s12881_s6 + $0x20] sm:$0xff] }
0x1f56   :  { %v11116_v61 = vpack.c.bf16 %v11340_v59, %v11339_v60  ;;  %v4717_v59 = vld [vmem:[%s12881_s6 + $0x28] sm:$0xff] }
0x1f57   :  { %v4406_v28 = vpop.xlane.xlu1 %4405  ;;  %v11141_v60 = vpack.c.bf16 %v4717_v59, %v4716_v17 }
0x1f58   :  { %11117 = vmatpush3.bf16.msra.mxu1 %v11116_v61 }
0x1f59   :  { %10593 = vmatprep.subr.mxu1 %v11595_v24 }
0x1f5a   :  { %v11471_v46 = vpop.eup %11470 }
0x1f5b   :  { %v4162_v62 = vmul.f32 %v11471_v46, %v11467_v52  ;;  %v11343_v6 = vpop.permute.xlu1 %11342  ;;  %v11125_v52 = vpack.c.bf16 %v4619_v51, %v4618_v26  ;;  %v5041_v26 = vld [vmem:[#allocation2 + $0x150] sm:$0xff]  ;;  %v5042_v51 = vld [vmem:[#allocation2 + $0x158] sm:$0xff] }
0x1f5c   :  { %v11345_v18 = vunpack.i.h.bf16 %v11343_v6  ;;  %v11344_v19 = vunpack.i.l.bf16 %v11343_v6 }
0x1f5d   :  { %10591 = vmatmul.mubr.msk.f32.vlgmr.msra.gmra.mrb[52].mxu1 %vm2690_vm4, %v4162_v62  ;;  %11126 = vmatprep.subr.bf16.mxu0 %v11125_v52 }
0x1f5e   :  { %10594 = vmatpush3.msra.mxu1 %v12096_v23  ;;  %10595 = vmatprep.mubr.msk.f32.mxu1 %vm11596_vm1, %v11595_v24  ;;  %v12191_v23 = vld [vmem:[%s12882_s7 + $0x9] ss:$0 sm:$0xff]  ;;  %v11123_v21 = vpack.c.bf16 %v11345_v18, %v11344_v19 }
0x1f5f   :  { %11122 = vmatprep.subr.bf16.mxu1 %v11600_v55  ;;  %11128 = vmatpush3.bf16.msra.mxu0 %v11125_v52  ;;  %v4869_v52 = vld [vmem:[#allocation2 + $0x110] sm:$0xff] }
0x1f84   :  { %v4578_v22 = vpop.xlane.xlu0 %4577 }
0x1f85   :  { %v4582_v14 = vmul.f32 0.03125, %v4578_v22 }
0x1f87   :  { %v4584_v34 = vsub.f32 %v4570_v45, %v4582_v14 }
0x1f89   :  { %v4586_v2 = vmul.f32 %v4584_v34, %v4584_v34 }
0x1f8b   :  { %v4588_v3 = vsel %vm79_vm0, %v4586_v2, 0.0 }
0x1f8c   :  { %4589 = vadd.xlane.f32.xlu0 %v4588_v3  ;;  %v4718_v3 = vld [vmem:[%s12881_s6 + $0x30] sm:$0xff] }
0x2019   :  { %v4590_v5 = vpop.xlane.xlu0 %4589 }
0x201a   :  { %v4594_v7 = vmul.f32 0.03125, %v4590_v5  ;;  %v4719_v5 = vld [vmem:[%s12881_s6 + $0x38] sm:$0xff] }
0x201c   :  { %v4596_v9 = vadd.f32 1e-05, %v4594_v7  ;;  %v11145_v7 = vpack.c.bf16 %v4719_v5, %v4718_v3 }
0x201e   :  { %11472 = vrsqrt.f32 %v4596_v9  ;;  %v9790_v9 = vld [vmem:[%s12883_s8] ss:$0 sm:$0xff] }
0x201f   :  { %11474 = vrcp.f32 %v4406_v28 }
0x2028   :  { %v11473_v10 = vpop.eup %11472 }
0x2029   :  { %v4600_v11 = vmul.f32 %v11473_v10, %v4584_v34  ;;  %v11475_v20 = vpop.eup %11474 }
0x202a   :  { %v4408_v1 = vmul.f32 %v11475_v20, %v11469_v40 }
0x202b   :  { %v4608_v15 = vmul.f32 %v12191_v23, %v4600_v11 }
0x202d   :  { %v12200_v44 = vadd.f32 %v12196_v12, %v4608_v15  ;;  %v9794_v15 = vld [vmem:[%s12882_s7 + $0x6] ss:$0 sm:$0xff] }
0x202f   :  { %10625 = vmatprep.mubr.msk.f32.mxu0 %vm79_vm0, %v12200_v44 }
0x2030   :  { %v4238_v27 = vpop.f32.mrb[52].mxu1 }
0x2031   :  { %v10592_v16 = vpop.f32.mrb[53].mxu1  ;;  %10596 = vmatmul.mubr.msk.f32.vlgmr.msra.gmra.mrb[54].mxu1 %vm338_vm2, %v4238_v27 }
0x2032   :  { %11124 = vmatpush3.bf16.msra.mxu1 %v11123_v21  ;;  %10609 = vmatprep.mubr.msk.f32.mxu1 %vm11596_vm1, %v11595_v24 }
0x2033   :  { %10612 = vmatprep.subr.mxu1 %v11595_v24 }
0x2035   :  { %10610 = vmatmul.mubr.msk.f32.vlgmr.msra.gmra.mrb[56].mxu1 %vm2690_vm4, %v4408_v1 }
0x2036   :  { %10613 = vmatpush3.msra.mxu1 %v12107_v13  ;;  %10614 = vmatprep.mubr.msk.f32.mxu1 %vm11596_vm1, %v11595_v24 }
0x2104   :  { %v4311_v30 = vpop.f32.mrb[54].mxu1 }
0x2105   :  { %v4315_v32 = vadd.f32 %v4311_v30, %v12165_v36  ;;  %v10597_v35 = vpop.f32.mrb[55].mxu1 }
0x2108   :  { %v4484_v37 = vpop.f32.mrb[56].mxu1 }
0x2109   :  { %v10611_v38 = vpop.f32.mrb[57].mxu1  ;;  %10615 = vmatmul.mubr.msk.f32.vlgmr.msra.gmra.mrb[58].mxu1 %vm338_vm2, %v4484_v37 }
0x21dc   :  { %v4557_v39 = vpop.f32.mrb[58].mxu1 }
0x21dd   :  { %v4561_v25 = vadd.f32 %v4557_v39, %v4315_v32  ;;  %v10616_v42 = vpop.f32.mrb[59].mxu1 }
0x21df   :  { %v4569_v43 = vadd.f32 %v9785_v53, %v4561_v25  ;;  %v4713_v53 = vld [vmem:[%s12881_s6 + $0x8] sm:$0xff] }
0x21e0   :  { %v11133_v45 = vpack.c.bf16 %v4713_v53, %v4712_v41  ;;  %v4959_v41 = vld [vmem:[#allocation2 + $0x120] sm:$0xff]  ;;  %v4960_v53 = vld [vmem:[#allocation2 + $0x128] sm:$0xff] }
0x21e1   :  { %v4571_v63 = vadd.f32 %v4569_v43, %v11943_v0  ;;  %v4620_v0 = vld [vmem:[%s12880_s5 + $0x10] sm:$0xff]  ;;  %v11157_v54 = vpack.c.bf16 %v4960_v53, %v4959_v41 }
0x21e2   :  { %v11129_v40 = vpack.c.bf16 %v4621_v48, %v4620_v0  ;;  %11134 = vmatprep.subr.bf16.mxu1 %v11133_v45  ;;  %v11169_v0 = vpack.c.bf16 %v5042_v51, %v5041_v26  ;;  %v4870_v48 = vld [vmem:[#allocation2 + $0x118] sm:$0xff] }
0x21e3   :  { %v4579_v31 = vsel %vm79_vm0, %v4571_v63, 0.0  ;;  %11136 = vmatpush3.bf16.msra.mxu1 %v11133_v45 }
0x21e4   :  { %4580 = vadd.xlane.f32.xlu1 %v4579_v31  ;;  %11130 = vmatprep.subr.bf16.mxu0 %v11129_v40 }
0x21e5   :  { %11132 = vmatpush3.bf16.msra.mxu0 %v11129_v40  ;;  %11138 = vmatprep.subr.bf16.mxu1 %v11137_v58  ;;  %v11153_v40 = vpack.c.bf16 %v4870_v48, %v4869_v52 }
0x21e7   :  { %11140 = vmatpush3.bf16.msra.mxu1 %v11137_v58 }
0x21e8   :  { %11142 = vmatprep.subr.bf16.mxu1 %v11141_v60 }
0x21eb   :  { %11144 = vmatpush3.bf16.msra.mxu1 %v11141_v60 }
0x21ec   :  { %11146 = vmatprep.subr.bf16.mxu1 %v11145_v7 }
0x21ef   :  { %11148 = vmatpush3.bf16.msra.mxu1 %v11145_v7 }
0x2271   :  { %v4581_v13 = vpop.xlane.xlu1 %4580 }
0x2272   :  { %v4583_v49 = vmul.f32 0.03125, %v4581_v13  ;;  %v5040_v13 = vld [vmem:[#allocation2 + $0x148] sm:$0xff] }
0x2274   :  { %v4585_v33 = vsub.f32 %v4571_v63, %v4583_v49 }
0x2276   :  { %v4587_v50 = vmul.f32 %v4585_v33, %v4585_v33 }
0x2278   :  { %v4591_v36 = vsel %vm79_vm0, %v4587_v50, 0.0  ;;  %v4868_v50 = vld [vmem:[#allocation2 + $0x108] sm:$0xff] }
0x2279   :  { %4592 = vadd.xlane.f32.xlu0 %v4591_v36 }
0x2306   :  { %v4593_v61 = vpop.xlane.xlu0 %4592 }
0x2307   :  { %v4595_v46 = vmul.f32 0.03125, %v4593_v61 }
0x2309   :  { %v4597_v62 = vadd.f32 1e-05, %v4595_v46  ;;  %v9799_v46 = vld [vmem:[%s12882_s7 + $0xb] ss:$0 sm:$0xff] }
0x230b   :  { %11476 = vrsqrt.f32 %v4597_v62 }
0x2315   :  { %v11477_v22 = vpop.eup %11476 }
0x2316   :  { %v4601_v14 = vmul.f32 %v11477_v22, %v4585_v33  ;;  %v4867_v33 = vld [vmem:[#allocation2 + $0x100] sm:$0xff] }
0x2317   :  { %v11149_v36 = vpack.c.bf16 %v4868_v50, %v4867_v33 }
0x2318   :  { %v4609_v34 = vmul.f32 %v12191_v23, %v4601_v14  ;;  %v9800_v14 = vld [vmem:[%s12882_s7 + $0xc] ss:$0 sm:$0xff] }
0x2319   :  { %11150 = vmatprep.subr.bf16.mxu0 %v11149_v36 }
0x231a   :  { %v4617_v2 = vadd.f32 %v12196_v12, %v4609_v34 }
0x231c   :  { %10626 = vmatmul.mubr.msk.f32.vlgmr.msra.gmra.mrb[52].mxu0 %vm79_vm0, %v4617_v2 }
0x231d   :  { %11152 = vmatpush3.bf16.msra.mxu0 %v11149_v36 }
0x231e   :  { %11154 = vmatprep.subr.bf16.mxu0 %v11153_v40 }
0x2321   :  { %11156 = vmatpush3.bf16.msra.mxu0 %v11153_v40 }
0x2322   :  { %11158 = vmatprep.subr.bf16.mxu0 %v11157_v54 }
0x23ef   :  { %v10627_v28 = vpop.f32.mrb[52].mxu0 }
0x23f0   :  { %v4707_v10 = vadd.f32 %v10627_v28, %v9790_v9  ;;  %v4701_v23 = vpop.f32.mrb[53].mxu0  ;;  %v4962_v28 = vld [vmem:[#allocation2 + $0x138] sm:$0xff] }
0x23f1   :  { %v4702_v6 = vadd.f32 %v9790_v9, %v4701_v23  ;;  %v4961_v9 = vld [vmem:[#allocation2 + $0x130] sm:$0xff] }
0x23f2   :  { %v4711_v12 = vmax.f32 %v4707_v10, 0.0  ;;  %v12285_v10 = vld [vmem:[%s12877_s2] sm:$0xff] }
0x23f3   :  { %v4710_v11 = vmax.f32 %v4702_v6, 0.0  ;;  %v12294_v6 = vld [vmem:[%s12877_s2 + $0x8] sm:$0xff] }
0x23f5   :  { %10644 = vmatprep.mubr.msk.f32.mxu1 %vm4728_vm5, %v4710_v11 }
0x23f6   :  { %10645 = vmatmul.mubr.msk.f32.vlgmr.msra.gmra.mrb[60].mxu1 %vm4728_vm5, %v4711_v12  ;;  %v11161_v12 = vpack.c.bf16 %v4962_v28, %v4961_v9 }
0x24c9   :  { %v10646_v18 = vpop.f32.mrb[60].mxu1 }
0x24ca   :  { %v4807_v19 = vadd.f32 %v10646_v18, %v9794_v15  ;;  %v4801_v20 = vpop.f32.mrb[61].mxu1 }
0x24cb   :  { %v4802_v21 = vadd.f32 %v9794_v15, %v4801_v20  ;;  %v9809_v15 = vld [vmem:[%s12882_s7 + $0xe] ss:$0 sm:$0xff] }
0x24cc   :  { %v4811_v27 = vadd.f32 %v4807_v19, %v4617_v2  ;;  %v9804_v19 = vld [vmem:[%s12882_s7 + $0xd] ss:$0 sm:$0xff] }
0x24cd   :  { %v4810_v16 = vadd.f32 %v4802_v21, %v12200_v44  ;;  %v5039_v44 = vld [vmem:[#allocation2 + $0x140] sm:$0xff] }
0x24ce   :  { %v4819_v1 = vsel %vm79_vm0, %v4811_v27, 0.0  ;;  %v11165_v49 = vpack.c.bf16 %v5040_v13, %v5039_v44 }
0x24cf   :  { %4820 = vadd.xlane.f32.xlu1 %v4819_v1  ;;  %v4816_v30 = vsel %vm79_vm0, %v4810_v16, 0.0 }
0x24d0   :  { %4817 = vadd.xlane.f32.xlu0 %v4816_v30  ;;  %11166 = vmatprep.subr.bf16.mxu1 %v11165_v49 }
0x24d1   :  { %11168 = vmatpush3.bf16.msra.mxu1 %v11165_v49 }
0x24d2   :  { %11170 = vmatprep.subr.bf16.mxu1 %v11169_v0 }
0x24d5   :  { %11172 = vmatpush3.bf16.msra.mxu1 %v11169_v0 }
0x24d6   :  { %10685 = vmatprep.subr.mxu1 %v11595_v24 }
0x255c   :  { %v4821_v32 = vpop.xlane.xlu1 %4820 }
0x255d   :  { %v4823_v35 = vmul.f32 0.03125, %v4821_v32  ;;  %v4818_v37 = vpop.xlane.xlu0 %4817 }
0x255e   :  { %v4822_v38 = vmul.f32 0.03125, %v4818_v37 }
0x255f   :  { %v4825_v39 = vsub.f32 %v4811_v27, %v4823_v35 }
0x2560   :  { %v4824_v25 = vsub.f32 %v4810_v16, %v4822_v38 }
0x2561   :  { %v4827_v42 = vmul.f32 %v4825_v39, %v4825_v39 }
0x2562   :  { %v4826_v43 = vmul.f32 %v4824_v25, %v4824_v25 }
0x2563   :  { %v4831_v63 = vsel %vm79_vm0, %v4827_v42, 0.0 }
0x2564   :  { %4832 = vadd.xlane.f32.xlu1 %v4831_v63  ;;  %v4828_v31 = vsel %vm79_vm0, %v4826_v43, 0.0 }
0x2565   :  { %4829 = vadd.xlane.f32.xlu0 %v4828_v31 }
0x25f1   :  { %v4833_v45 = vpop.xlane.xlu1 %4832 }
0x25f2   :  { %v4835_v56 = vmul.f32 0.03125, %v4833_v45  ;;  %v4830_v58 = vpop.xlane.xlu0 %4829  ;;  %v12357_v45 = vld [vmem:[#allocation2 + $0x168] sm:$0xff] }
0x25f3   :  { %v4834_v17 = vmul.f32 0.03125, %v4830_v58 }
0x25f4   :  { %v4837_v59 = vadd.f32 1e-05, %v4835_v56 }
0x25f5   :  { %v4836_v60 = vadd.f32 1e-05, %v4834_v17 }
0x25f6   :  { %11478 = vrsqrt.f32 %v4837_v59  ;;  %v12361_v59 = vld [vmem:[#allocation2 + $0x160] sm:$0xff] }
0x25f7   :  { %11480 = vrsqrt.f32 %v4836_v60 }
0x2600   :  { %v11479_v61 = vpop.eup %11478 }
0x2601   :  { %v11481_v62 = vpop.eup %11480  ;;  %v4841_v22 = vmul.f32 %v11479_v61, %v4825_v39 }
0x2602   :  { %v4840_v34 = vmul.f32 %v11481_v62, %v4824_v25 }
0x2603   :  { %v4849_v2 = vmul.f32 %v9799_v46, %v4841_v22 }
0x2604   :  { %v4848_v3 = vmul.f32 %v9799_v46, %v4840_v34 }
0x2605   :  { %v12276_v5 = vadd.f32 %v9800_v14, %v4849_v2 }
0x2606   :  { %v12278_v7 = vadd.f32 %v9800_v14, %v4848_v3 }
0x2607   :  { %v4859_v11 = vadd.f32 %v12294_v6, %v12276_v5 }
0x2608   :  { %10677 = vmatprep.mubr.msk.f32.mxu1 %vm79_vm0, %v12278_v7  ;;  %v4858_v23 = vadd.f32 %v12285_v10, %v12278_v7 }
0x2609   :  { %10678 = vmatmul.mubr.msk.f32.vlgmr.msra.gmra.mrb[62].mxu1 %vm79_vm0, %v12276_v5 }
0x260a   :  { %10655 = vmatprep.mubr.msk.f32.mxu0 %vm79_vm0, %v4858_v23  ;;  %10687 = vmatprep.mubr.msk.f32.mxu1 %vm11596_vm1, %v11595_v24 }
0x260b   :  { %10656 = vmatmul.mubr.msk.f32.vlgmr.msra.gmra.mrb[54].mxu0 %vm79_vm0, %v4859_v11 }
0x260c   :  { %11160 = vmatpush3.bf16.msra.mxu0 %v11157_v54  ;;  %10666 = vmatprep.mubr.msk.f32.mxu0 %vm79_vm0, %v4858_v23 }
0x260d   :  { %11162 = vmatprep.subr.bf16.mxu0 %v11161_v12 }
0x2610   :  { %11164 = vmatpush3.bf16.msra.mxu0 %v11161_v12 }
0x2611   :  { %10680 = vmatprep.subr.mxu0 %v11595_v24 }
0x2613   :  { %10667 = vmatmul.mubr.msk.f32.vlgmr.msra.gmra.mrb[56].mxu0 %vm79_vm0, %v4859_v11 }
0x2614   :  { %10682 = vmatprep.mubr.msk.f32.mxu0 %vm11596_vm1, %v11595_v24 }
0x26dc   :  { %v10679_v18 = vpop.f32.mrb[62].mxu1 }
0x26dd   :  { %v12313_v20 = vadd.f32 %v10679_v18, %v9809_v15  ;;  %v5121_v21 = vpop.f32.mrb[63].mxu1 }
0x26de   :  { %v12315_v27 = vadd.f32 %v9809_v15, %v5121_v21  ;;  %v10657_v16 = vpop.f32.mrb[54].mxu0 }
0x26df   :  { %v12317_v1 = vadd.f32 %v10657_v16, %v9804_v19  ;;  %v4949_v30 = vpop.f32.mrb[55].mxu0 }
0x26e0   :  { %v12319_v32 = vadd.f32 %v9804_v19, %v4949_v30  ;;  %10686 = vmatpush3.msra.mxu1 %v12315_v27 }
0x26e1   :  { %10695 = vmatprep.subr.mxu1 %v11595_v24 }
0x26e2   :  { %5295 = vrot.lane.b32.xlu1 %v12319_v32, %s11597_s10 }
0x26e6   :  { %v12325_v35 = vpop.f32.mrb[56].mxu0 }
0x26e7   :  { %v12327_v37 = vpop.f32.mrb[57].mxu0 }
0x26e8   :  { %5297 = vrot.lane.b32.xlu0 %v12327_v37, %s11597_s10  ;;  %10681 = vmatpush3.xpose.msk.msra.mxu0 %vm338_vm2, %v12327_v37 }
0x26e9   :  { %10690 = vmatprep.subr.mxu0 %v11595_v24 }
0x26eb   :  { %10683 = vmatmul.mubr.msk.f32.vlgmr.msra.gmra.mrb[58].mxu0 %vm338_vm2, %v12319_v32 }
0x26ec   :  { %10692 = vmatprep.mubr.msk.f32.mxu0 %vm11596_vm1, %v11595_v24 }
0x2754   :  { %v5296_v39 = vpop.permute.xlu1 %5295 }
0x275a   :  { %v5298_v38 = vpop.permute.xlu0 %5297 }
0x275b   :  { %10691 = vmatpush3.xpose.msk.msra.mxu0 %vm338_vm2, %v5298_v38 }
0x275c   :  { %10700 = vmatprep.subr.mxu0 %v11595_v24 }
0x275e   :  { %10693 = vmatmul.mubr.msk.f32.vlgmr.msra.gmra.mrb[60].mxu0 %vm338_vm2, %v5296_v39 }
0x275f   :  { %10702 = vmatprep.mubr.msk.f32.mxu0 %vm11596_vm1, %v11595_v24  ;;  %10701 = vmatpush3.msra.mxu0 %v12357_v45 }
0x2760   :  { %10710 = vmatprep.subr.mxu0 %v11595_v24 }
0x27be   :  { %v5207_v25 = vpop.f32.mrb[58].mxu0 }
0x27bf   :  { %v10684_v42 = vpop.f32.mrb[59].mxu0  ;;  %v5211_v43 = vsel %vm338_vm2, %v5207_v25, -inf }
0x27c0   :  { %5212 = vmax.xlane.f32.xlu1 %v5211_v43 }
0x2831   :  { %v5369_v63 = vpop.f32.mrb[60].mxu0 }
0x2832   :  { %v10694_v31 = vpop.f32.mrb[61].mxu0  ;;  %v5373_v44 = vsel %vm338_vm2, %v5369_v63, -inf }
0x2833   :  { %5374 = vmax.xlane.f32.xlu0 %v5373_v44 }
0x284d   :  { %v5213_v13 = vpop.xlane.xlu1 %5212 }
0x284e   :  { %v5214_v49 = vsub.f32 %v5207_v25, %v5213_v13 }
0x2850   :  { %v5215_v33 = vmul.f32 1.442695, %v5214_v49 }
0x2852   :  { %11482 = vpow2.f32 %v5215_v33 }
0x285c   :  { %v11483_v50 = vpop.eup %11482 }
0x285d   :  { %v5217_v36 = vsel %vm338_vm2, %v11483_v50, 0.0 }
0x285e   :  { %5218 = vadd.xlane.f32.xlu0 %v5217_v36 }
0x2874   :  { %5385 = vrot.lane.b32.xlu0 %v12315_v27, %s11597_s10 }
0x28c0   :  { %v5375_v26 = vpop.xlane.xlu0 %5374 }
0x28c1   :  { %v5376_v51 = vsub.f32 %v5369_v63, %v5375_v26 }
0x28c3   :  { %v5377_v52 = vmul.f32 1.442695, %v5376_v51  ;;  %v12411_v51 = vld [vmem:[#allocation2 + $0x178] sm:$0xff] }
0x28c5   :  { %11484 = vpow2.f32 %v5377_v52 }
0x28cf   :  { %v11485_v0 = vpop.eup %11484 }
0x28d0   :  { %v5379_v48 = vsel %vm338_vm2, %v11485_v0, 0.0 }
0x28d1   :  { %5380 = vadd.xlane.f32.xlu1 %v5379_v48 }
0x28e2   :  { %5609 = vrot.lane.b32.xlu1 %v12327_v37, %s11598_s13 }
0x28e6   :  { %5607 = vrot.lane.b32.xlu1 %v12319_v32, %s11598_s13 }
0x28eb   :  { %v5219_v40 = vpop.xlane.xlu0 %5218 }
0x28ec   :  { %11486 = vrcp.f32 %v5219_v40 }
0x28ef   :  { %v5386_v54 = vpop.permute.xlu0 %5385 }
0x28f6   :  { %v11487_v41 = vpop.eup %11486 }
0x28f7   :  { %v5221_v53 = vmul.f32 %v11487_v41, %v11483_v50 }
0x28f9   :  { %10688 = vmatmul.mubr.msk.f32.vlgmr.msra.gmra.mrb[64].mxu1 %vm338_vm2, %v5221_v53 }
0x28fa   :  { %10696 = vmatpush3.msra.mxu1 %v5386_v54  ;;  %10697 = vmatprep.mubr.msk.f32.mxu1 %vm11596_vm1, %v11595_v24 }
0x28fb   :  { %10705 = vmatprep.subr.mxu1 %v11595_v24 }
0x295e   :  { %v5381_v56 = vpop.xlane.xlu1 %5380 }
0x295f   :  { %11488 = vrcp.f32 %v5381_v56 }
0x2962   :  { %v5610_v46 = vpop.permute.xlu1 %5609 }
0x2966   :  { %v5608_v14 = vpop.permute.xlu1 %5607 }
0x2969   :  { %v11489_v58 = vpop.eup %11488 }
0x296a   :  { %v5383_v17 = vmul.f32 %v11489_v58, %v11485_v0 }
0x296c   :  { %10698 = vmatmul.mubr.msk.f32.vlgmr.msra.gmra.mrb[66].mxu1 %vm338_vm2, %v5383_v17 }
0x296d   :  { %10706 = vmatpush3.msra.mxu1 %v12361_v59  ;;  %10707 = vmatprep.mubr.msk.f32.mxu1 %vm11596_vm1, %v11595_v24 }
0x296e   :  { %10715 = vmatprep.subr.mxu1 %v11595_v24 }
0x29cc   :  { %v5291_v60 = vpop.f32.mrb[64].mxu1 }
0x29cd   :  { %v10689_v61 = vpop.f32.mrb[65].mxu1  ;;  %10708 = vmatmul.mubr.msk.f32.vlgmr.msra.gmra.mrb[68].mxu1 %vm338_vm2, %v5291_v60 }
0x29ce   :  { %10717 = vmatprep.mubr.msk.f32.mxu1 %vm11596_vm1, %v11595_v24 }
0x2a3f   :  { %v5457_v62 = vpop.f32.mrb[66].mxu1 }
0x2a40   :  { %v10699_v22 = vpop.f32.mrb[67].mxu1  ;;  %10703 = vmatmul.mubr.msk.f32.vlgmr.msra.gmra.mrb[62].mxu0 %vm338_vm2, %v5457_v62 }
0x2a41   :  { %10711 = vmatpush3.xpose.msk.msra.mxu0 %vm338_vm2, %v5610_v46  ;;  %10712 = vmatprep.mubr.msk.f32.mxu0 %vm11596_vm1, %v11595_v24 }
0x2a42   :  { %10720 = vmatprep.subr.mxu0 %v11595_v24 }
0x2a44   :  { %10713 = vmatmul.mubr.msk.f32.vlgmr.msra.gmra.mrb[64].mxu0 %vm338_vm2, %v5608_v14 }
0x2a45   :  { %10722 = vmatprep.mubr.msk.f32.mxu0 %vm11596_vm1, %v11595_v24 }
0x2aa0   :  { %v5603_v34 = vpop.f32.mrb[68].mxu1 }
0x2aa1   :  { %v10709_v2 = vpop.f32.mrb[69].mxu1 }
0x2b13   :  { %v5530_v3 = vpop.f32.mrb[62].mxu0 }
0x2b14   :  { %v5604_v9 = vadd.f32 %v5603_v34, %v5530_v3  ;;  %v10704_v28 = vpop.f32.mrb[63].mxu0 }
0x2b17   :  { %v5681_v23 = vpop.f32.mrb[64].mxu0 }
0x2b18   :  { %v10714_v11 = vpop.f32.mrb[65].mxu0  ;;  %v5685_v12 = vsel %vm338_vm2, %v5681_v23, -inf }
0x2b19   :  { %5686 = vmax.xlane.f32.xlu0 %v5685_v12 }
0x2b2f   :  { %5696 = vrot.lane.b32.xlu0 %v12315_v27, %s11598_s13 }
0x2b33   :  { %5846 = vrot.lane.b32.xlu0 %v12319_v32, %s11599_s14 }
0x2ba6   :  { %v5687_v15 = vpop.xlane.xlu0 %5686 }
0x2ba7   :  { %v5688_v18 = vsub.f32 %v5681_v23, %v5687_v15 }
0x2ba9   :  { %v5689_v19 = vmul.f32 1.442695, %v5688_v18 }
0x2baa   :  { %v5697_v21 = vpop.permute.xlu0 %5696 }
0x2bab   :  { %11490 = vpow2.f32 %v5689_v19  ;;  %10716 = vmatpush3.msra.mxu1 %v5697_v21 }
0x2bac   :  { %10725 = vmatprep.subr.mxu1 %v11595_v24 }
0x2bae   :  { %v5847_v42 = vpop.permute.xlu0 %5846 }
0x2bb5   :  { %v11491_v16 = vpop.eup %11490 }
0x2bb6   :  { %v5691_v30 = vsel %vm338_vm2, %v11491_v16, 0.0 }
0x2bb7   :  { %5692 = vadd.xlane.f32.xlu1 %v5691_v30 }
0x2bc8   :  { %5848 = vrot.lane.b32.xlu1 %v12327_v37, %s11599_s14  ;;  %v12396_v37 = vld [vmem:[#allocation2 + $0x170] sm:$0xff] }
0x2bc9   :  { %10721 = vmatpush3.msra.mxu0 %v12396_v37 }
0x2bca   :  { %10730 = vmatprep.subr.mxu0 %v11595_v24 }
0x2c44   :  { %v5693_v38 = vpop.xlane.xlu1 %5692 }
0x2c45   :  { %11492 = vrcp.f32 %v5693_v38 }
0x2c48   :  { %v5849_v32 = vpop.permute.xlu1 %5848 }
0x2c4f   :  { %v11493_v39 = vpop.eup %11492 }
0x2c50   :  { %v5695_v25 = vmul.f32 %v11493_v39, %v11491_v16 }
0x2c52   :  { %10718 = vmatmul.mubr.msk.f32.vlgmr.msra.gmra.mrb[70].mxu1 %vm338_vm2, %v5695_v25 }
0x2c53   :  { %10726 = vmatpush3.xpose.msk.msra.mxu1 %vm338_vm2, %v5849_v32  ;;  %10727 = vmatprep.mubr.msk.f32.mxu1 %vm11596_vm1, %v11595_v24 }
0x2c54   :  { %10735 = vmatprep.subr.mxu1 %v11595_v24 }
0x2c56   :  { %10728 = vmatmul.mubr.msk.f32.vlgmr.msra.gmra.mrb[72].mxu1 %vm338_vm2, %v5847_v42 }
0x2c57   :  { %10737 = vmatprep.mubr.msk.f32.mxu1 %vm11596_vm1, %v11595_v24  ;;  %10736 = vmatpush3.msra.mxu1 %v12411_v51 }
0x2c58   :  { %10745 = vmatprep.subr.mxu1 %v11595_v24 }
0x2d25   :  { %v5768_v43 = vpop.f32.mrb[70].mxu1 }
0x2d26   :  { %v10719_v63 = vpop.f32.mrb[71].mxu1  ;;  %10723 = vmatmul.mubr.msk.f32.vlgmr.msra.gmra.mrb[66].mxu0 %vm338_vm2, %v5768_v43 }
0x2d27   :  { %10732 = vmatprep.mubr.msk.f32.mxu0 %vm11596_vm1, %v11595_v24 }
0x2d29   :  { %v5920_v31 = vpop.f32.mrb[72].mxu1 }
0x2d2a   :  { %v10729_v44 = vpop.f32.mrb[73].mxu1  ;;  %v5924_v13 = vsel %vm338_vm2, %v5920_v31, -inf }
0x2d2b   :  { %5925 = vmax.xlane.f32.xlu1 %v5924_v13 }
0x2d3c   :  { %6247 = vrot.lane.b32.xlu1 %v12325_v35, %s11597_s10 }
0x2d40   :  { %6245 = vrot.lane.b32.xlu1 %v12317_v1, %s11597_s10 }
0x2db8   :  { %v5926_v49 = vpop.xlane.xlu1 %5925 }
0x2db9   :  { %v5927_v33 = vsub.f32 %v5920_v31, %v5926_v49 }
0x2dbb   :  { %v5928_v50 = vmul.f32 1.442695, %v5927_v33 }
0x2dbd   :  { %11494 = vpow2.f32 %v5928_v50 }
0x2dc7   :  { %v11495_v36 = vpop.eup %11494 }
0x2dc8   :  { %v5930_v26 = vsel %vm338_vm2, %v11495_v36, 0.0 }
0x2dc9   :  { %5931 = vadd.xlane.f32.xlu0 %v5930_v26 }
0x2ddf   :  { %5935 = vrot.lane.b32.xlu0 %v12315_v27, %s11599_s14  ;;  %v6248_v27 = vpop.permute.xlu1 %6247 }
0x2de3   :  { %v6246_v56 = vpop.permute.xlu1 %6245 }
0x2df9   :  { %v5841_v52 = vpop.f32.mrb[66].mxu0 }
0x2dfa   :  { %v5845_v0 = vadd.f32 %v5841_v52, %v5604_v9  ;;  %v10724_v48 = vpop.f32.mrb[67].mxu0 }
0x2e56   :  { %v5932_v40 = vpop.xlane.xlu0 %5931 }
0x2e57   :  { %11496 = vrcp.f32 %v5932_v40 }
0x2e5a   :  { %v5936_v41 = vpop.permute.xlu0 %5935 }
0x2e5b   :  { %10731 = vmatpush3.msra.mxu0 %v5936_v41 }
0x2e5c   :  { %10740 = vmatprep.subr.mxu0 %v11595_v24 }
0x2e61   :  { %v11497_v53 = vpop.eup %11496 }
0x2e62   :  { %v5934_v54 = vmul.f32 %v11497_v53, %v11495_v36 }
0x2e64   :  { %10733 = vmatmul.mubr.msk.f32.vlgmr.msra.gmra.mrb[68].mxu0 %vm338_vm2, %v5934_v54 }
0x2e65   :  { %10741 = vmatpush3.xpose.msk.msra.mxu0 %vm338_vm2, %v12325_v35  ;;  %10742 = vmatprep.mubr.msk.f32.mxu0 %vm11596_vm1, %v11595_v24 }
0x2e66   :  { %10750 = vmatprep.subr.mxu0 %v11595_v24 }
0x2e68   :  { %10743 = vmatmul.mubr.msk.f32.vlgmr.msra.gmra.mrb[70].mxu0 %vm338_vm2, %v12317_v1 }
0x2e69   :  { %10751 = vmatpush3.xpose.msk.msra.mxu0 %vm338_vm2, %v6248_v27  ;;  %10752 = vmatprep.mubr.msk.f32.mxu0 %vm11596_vm1, %v11595_v24 }
0x2e6a   :  { %10760 = vmatprep.subr.mxu0 %v11595_v24 }
0x2e6c   :  { %10753 = vmatmul.mubr.msk.f32.vlgmr.msra.gmra.mrb[72].mxu0 %vm338_vm2, %v6246_v56 }
0x2e6d   :  { %10761 = vmatpush3.msra.mxu0 %v12357_v45  ;;  %10762 = vmatprep.mubr.msk.f32.mxu0 %vm11596_vm1, %v11595_v24 }
0x2e6e   :  { %10770 = vmatprep.subr.mxu0 %v11595_v24 }
0x2f37   :  { %v6007_v58 = vpop.f32.mrb[68].mxu0 }
0x2f38   :  { %v10734_v17 = vpop.f32.mrb[69].mxu0  ;;  %10738 = vmatmul.mubr.msk.f32.vlgmr.msra.gmra.mrb[74].mxu1 %vm338_vm2, %v6007_v58 }
0x2f39   :  { %10746 = vmatpush3.msra.mxu1 %v12313_v20  ;;  %10747 = vmatprep.mubr.msk.f32.mxu1 %vm11596_vm1, %v11595_v24 }
0x2f3a   :  { %10755 = vmatprep.subr.mxu1 %v11595_v24 }
0x2f3b   :  { %v6157_v60 = vpop.f32.mrb[70].mxu0 }
0x2f3c   :  { %v10744_v61 = vpop.f32.mrb[71].mxu0  ;;  %v6161_v45 = vsel %vm338_vm2, %v6157_v60, -inf }
0x2f3d   :  { %6162 = vmax.xlane.f32.xlu0 %v6161_v45 }
0x2f3f   :  { %v6319_v46 = vpop.f32.mrb[72].mxu0 }
0x2f40   :  { %v10754_v62 = vpop.f32.mrb[73].mxu0  ;;  %v6323_v22 = vsel %vm338_vm2, %v6319_v46, -inf }
0x2f41   :  { %6324 = vmax.xlane.f32.xlu1 %v6323_v22 }
0x2f52   :  { %6335 = vrot.lane.b32.xlu1 %v12313_v20, %s11597_s10 }
0x2f56   :  { %6557 = vrot.lane.b32.xlu1 %v12317_v1, %s11598_s13 }
0x2fca   :  { %v6163_v14 = vpop.xlane.xlu0 %6162 }
0x2fcb   :  { %v6164_v34 = vsub.f32 %v6157_v60, %v6163_v14 }
0x2fcd   :  { %v6165_v2 = vmul.f32 1.442695, %v6164_v34 }
0x2fce   :  { %v6325_v3 = vpop.xlane.xlu1 %6324 }
0x2fcf   :  { %11498 = vpow2.f32 %v6165_v2  ;;  %v6326_v9 = vsub.f32 %v6319_v46, %v6325_v3  ;;  %v9844_v2 = vld [vmem:[%s12882_s7 + $0xf] ss:$0 sm:$0xff] }
0x2fd1   :  { %v6327_v28 = vmul.f32 1.442695, %v6326_v9 }
0x2fd2   :  { %v6336_v25 = vpop.permute.xlu1 %6335 }
0x2fd3   :  { %11500 = vpow2.f32 %v6327_v28 }
0x2fd9   :  { %v11499_v23 = vpop.eup %11498 }
0x2fda   :  { %v6167_v11 = vsel %vm338_vm2, %v11499_v23, 0.0 }
0x2fdb   :  { %6168 = vadd.xlane.f32.xlu0 %v6167_v11 }
0x2fdd   :  { %v11501_v12 = vpop.eup %11500 }
0x2fde   :  { %v6329_v15 = vsel %vm338_vm2, %v11501_v12, 0.0 }
0x2fdf   :  { %6330 = vadd.xlane.f32.xlu0 %v6329_v15 }
0x2ff5   :  { %6559 = vrot.lane.b32.xlu0 %v12325_v35, %s11598_s13 }
0x300b   :  { %v6080_v18 = vpop.f32.mrb[74].mxu1 }
0x300c   :  { %v12448_v19 = vadd.f32 %v6080_v18, %v5845_v0  ;;  %v10739_v21 = vpop.f32.mrb[75].mxu1 }
0x300e   :  { %v7041_v3 = vadd.f32 %v9844_v2, %v12448_v19 }
0x3068   :  { %v6169_v16 = vpop.xlane.xlu0 %6168 }
0x3069   :  { %11502 = vrcp.f32 %v6169_v16 }
0x306c   :  { %v6331_v30 = vpop.xlane.xlu0 %6330 }
0x306d   :  { %11504 = vrcp.f32 %v6331_v30 }
0x3070   :  { %v6560_v44 = vpop.permute.xlu0 %6559 }
0x3073   :  { %v11503_v38 = vpop.eup %11502 }
0x3074   :  { %v6171_v39 = vmul.f32 %v11503_v38, %v11499_v23  ;;  %v7043_v23 = vadd.f32 %v7041_v3, %v12278_v7 }
0x3076   :  { %10748 = vmatmul.mubr.msk.f32.vlgmr.msra.gmra.mrb[76].mxu1 %vm338_vm2, %v6171_v39 }
0x3077   :  { %v11505_v32 = vpop.eup %11504  ;;  %10756 = vmatpush3.msra.mxu1 %v6336_v25  ;;  %10757 = vmatprep.mubr.msk.f32.mxu1 %vm11596_vm1, %v11595_v24 }
0x3078   :  { %v6333_v42 = vmul.f32 %v11505_v32, %v11501_v12  ;;  %10765 = vmatprep.subr.mxu1 %v11595_v24 }
0x307a   :  { %10758 = vmatmul.mubr.msk.f32.vlgmr.msra.gmra.mrb[78].mxu1 %vm338_vm2, %v6333_v42 }
0x307b   :  { %10766 = vmatpush3.msra.mxu1 %v12361_v59  ;;  %10767 = vmatprep.mubr.msk.f32.mxu1 %vm11596_vm1, %v11595_v24  ;;  %v6558_v59 = vpop.permute.xlu1 %6557 }
0x307c   :  { %10775 = vmatprep.subr.mxu1 %v11595_v24 }
0x3149   :  { %v6241_v43 = vpop.f32.mrb[76].mxu1 }
0x314a   :  { %v10749_v63 = vpop.f32.mrb[77].mxu1  ;;  %10768 = vmatmul.mubr.msk.f32.vlgmr.msra.gmra.mrb[80].mxu1 %vm338_vm2, %v6241_v43 }
0x314b   :  { %10777 = vmatprep.mubr.msk.f32.mxu1 %vm11596_vm1, %v11595_v24 }
0x314d   :  { %v6407_v31 = vpop.f32.mrb[78].mxu1 }
0x314e   :  { %v10759_v13 = vpop.f32.mrb[79].mxu1  ;;  %10763 = vmatmul.mubr.msk.f32.vlgmr.msra.gmra.mrb[74].mxu0 %vm338_vm2, %v6407_v31 }
0x314f   :  { %10771 = vmatpush3.xpose.msk.msra.mxu0 %vm338_vm2, %v6560_v44  ;;  %10772 = vmatprep.mubr.msk.f32.mxu0 %vm11596_vm1, %v11595_v24 }
0x3150   :  { %10780 = vmatprep.subr.mxu0 %v11595_v24 }
0x3152   :  { %10773 = vmatmul.mubr.msk.f32.vlgmr.msra.gmra.mrb[76].mxu0 %vm338_vm2, %v6558_v59 }
0x3153   :  { %10781 = vmatpush3.msra.mxu0 %v12396_v37  ;;  %10782 = vmatprep.mubr.msk.f32.mxu0 %vm11596_vm1, %v11595_v24 }
0x3154   :  { %10790 = vmatprep.subr.mxu0 %v11595_v24 }
0x321d   :  { %v6553_v49 = vpop.f32.mrb[80].mxu1 }
0x321e   :  { %v10769_v33 = vpop.f32.mrb[81].mxu1 }
0x3221   :  { %v6480_v50 = vpop.f32.mrb[74].mxu0 }
0x3222   :  { %v6554_v36 = vadd.f32 %v6553_v49, %v6480_v50  ;;  %v10764_v26 = vpop.f32.mrb[75].mxu0 }
0x3225   :  { %v6631_v52 = vpop.f32.mrb[76].mxu0 }
0x3226   :  { %v10774_v0 = vpop.f32.mrb[77].mxu0  ;;  %v6635_v48 = vsel %vm338_vm2, %v6631_v52, -inf }
0x3227   :  { %6636 = vmax.xlane.f32.xlu1 %v6635_v48 }
0x3238   :  { %6798 = vrot.lane.b32.xlu1 %v12325_v35, %s11599_s14 }
0x323c   :  { %6796 = vrot.lane.b32.xlu1 %v12317_v1, %s11599_s14 }
0x32b4   :  { %v6637_v37 = vpop.xlane.xlu1 %6636 }
0x32b5   :  { %v6638_v40 = vsub.f32 %v6631_v52, %v6637_v37  ;;  %v9848_v37 = vld [vmem:[%s12882_s7 + $0x15] ss:$0 sm:$0xff] }
0x32b7   :  { %v6639_v41 = vmul.f32 1.442695, %v6638_v40 }
0x32b8   :  { %v6799_v58 = vpop.permute.xlu1 %6798 }
0x32b9   :  { %11506 = vpow2.f32 %v6639_v41  ;;  %v7192_v41 = vld [vmem:[#allocation2 + $0x1a0] sm:$0xff] }
0x32bc   :  { %v6797_v17 = vpop.permute.xlu1 %6796 }
0x32c3   :  { %v11507_v53 = vpop.eup %11506 }
0x32c4   :  { %v6641_v54 = vsel %vm338_vm2, %v11507_v53, 0.0 }
0x32c5   :  { %6642 = vadd.xlane.f32.xlu0 %v6641_v54 }
0x32db   :  { %6646 = vrot.lane.b32.xlu0 %v12313_v20, %s11598_s13 }
0x3352   :  { %v6643_v27 = vpop.xlane.xlu0 %6642 }
0x3353   :  { %11508 = vrcp.f32 %v6643_v27 }
0x3356   :  { %v6647_v56 = vpop.permute.xlu0 %6646 }
0x3357   :  { %10776 = vmatpush3.msra.mxu1 %v6647_v56 }
0x3358   :  { %10785 = vmatprep.subr.mxu1 %v11595_v24 }
0x335d   :  { %v11509_v35 = vpop.eup %11508 }
0x335e   :  { %v6645_v1 = vmul.f32 %v11509_v35, %v11507_v53  ;;  %v7193_v53 = vld [vmem:[#allocation2 + $0x1a8] sm:$0xff]  ;;  %v7194_v35 = vld [vmem:[#allocation2 + $0x1b0] sm:$0xff] }
0x335f   :  { %v11181_v27 = vpack.c.bf16 %v7193_v53, %v7192_v41 }
0x3360   :  { %10778 = vmatmul.mubr.msk.f32.vlgmr.msra.gmra.mrb[82].mxu1 %vm338_vm2, %v6645_v1 }
0x3361   :  { %10786 = vmatpush3.xpose.msk.msra.mxu1 %vm338_vm2, %v6799_v58  ;;  %10787 = vmatprep.mubr.msk.f32.mxu1 %vm11596_vm1, %v11595_v24  ;;  %v7195_v58 = vld [vmem:[#allocation2 + $0x1b8] sm:$0xff] }
0x3362   :  { %10795 = vmatprep.subr.mxu1 %v11595_v24  ;;  %v11185_v1 = vpack.c.bf16 %v7195_v58, %v7194_v35 }
0x3364   :  { %10788 = vmatmul.mubr.msk.f32.vlgmr.msra.gmra.mrb[84].mxu1 %vm338_vm2, %v6797_v17  ;;  %v7100_v17 = vld [vmem:[#allocation2 + $0x180] sm:$0xff] }
0x3365   :  { %10796 = vmatpush3.msra.mxu1 %v12411_v51  ;;  %10797 = vmatprep.mubr.msk.f32.mxu1 %vm11596_vm1, %v11595_v24 }
0x3366   :  { %11182 = vmatprep.subr.bf16.mxu1 %v11181_v27 }
0x3433   :  { %v6718_v60 = vpop.f32.mrb[82].mxu1 }
0x3434   :  { %v10779_v61 = vpop.f32.mrb[83].mxu1  ;;  %10783 = vmatmul.mubr.msk.f32.vlgmr.msra.gmra.mrb[78].mxu0 %vm338_vm2, %v6718_v60  ;;  %v7101_v60 = vld [vmem:[#allocation2 + $0x188] sm:$0xff] }
0x3435   :  { %10792 = vmatprep.mubr.msk.f32.mxu0 %vm11596_vm1, %v11595_v24  ;;  %v7102_v61 = vld [vmem:[#allocation2 + $0x190] sm:$0xff] }
0x3437   :  { %v6870_v45 = vpop.f32.mrb[84].mxu1 }
0x3438   :  { %v10789_v46 = vpop.f32.mrb[85].mxu1  ;;  %v6874_v62 = vsel %vm338_vm2, %v6870_v45, -inf }
0x3439   :  { %6875 = vmax.xlane.f32.xlu0 %v6874_v62 }
0x344f   :  { %6885 = vrot.lane.b32.xlu0 %v12313_v20, %s11599_s14  ;;  %v7049_v20 = vsel %vm79_vm0, %v7043_v23, 0.0 }
0x34c6   :  { %v6876_v22 = vpop.xlane.xlu0 %6875 }
0x34c7   :  { %v6877_v51 = vsub.f32 %v6870_v45, %v6876_v22  ;;  %v7103_v45 = vld [vmem:[#allocation2 + $0x198] sm:$0xff] }
0x34c8   :  { %v11177_v46 = vpack.c.bf16 %v7103_v45, %v7102_v61 }
0x34c9   :  { %v6878_v14 = vmul.f32 1.442695, %v6877_v51 }
0x34ca   :  { %v6886_v34 = vpop.permute.xlu0 %6885 }
0x34cb   :  { %11510 = vpow2.f32 %v6878_v14  ;;  %10791 = vmatpush3.msra.mxu0 %v6886_v34 }
0x34d5   :  { %v11511_v9 = vpop.eup %11510 }
0x34d6   :  { %v6880_v28 = vsel %vm338_vm2, %v11511_v9, 0.0 }
0x34d7   :  { %6881 = vadd.xlane.f32.xlu1 %v6880_v28 }
0x34db   :  { %7050 = vadd.xlane.f32.xlu1 %v7049_v20  ;;  %v7283_v20 = vld [vmem:[#allocation2 + $0x1c8] sm:$0xff] }
0x3507   :  { %v6791_v11 = vpop.f32.mrb[78].mxu0 }
0x3508   :  { %v6795_v12 = vadd.f32 %v6791_v11, %v6554_v36  ;;  %v10784_v15 = vpop.f32.mrb[79].mxu0  ;;  %v7284_v11 = vld [vmem:[#allocation2 + $0x1d0] sm:$0xff] }
0x3509   :  { %v7285_v15 = vld [vmem:[#allocation2 + $0x1d8] sm:$0xff] }
0x3564   :  { %v6882_v18 = vpop.xlane.xlu1 %6881 }
0x3565   :  { %11512 = vrcp.f32 %v6882_v18  ;;  %v11193_v18 = vpack.c.bf16 %v7285_v15, %v7284_v11  ;;  %v12623_v15 = vld [vmem:[#allocation2 + $0x1e0] sm:$0xff] }
0x3568   :  { %v7051_v7 = vpop.xlane.xlu1 %7050 }
0x3569   :  { %v7055_v38 = vmul.f32 0.03125, %v7051_v7 }
0x356b   :  { %v7057_v42 = vsub.f32 %v7043_v23, %v7055_v38 }
0x356d   :  { %v7059_v44 = vmul.f32 %v7057_v42, %v7057_v42 }
0x356f   :  { %v11513_v21 = vpop.eup %11512  ;;  %v7061_v13 = vsel %vm79_vm0, %v7059_v44, 0.0 }
0x3570   :  { %v6884_v16 = vmul.f32 %v11513_v21, %v11511_v9  ;;  %v11565_v21 = vld [vmem:[%s12876_s1 + $0x8] sm:$0xff] }
0x3572   :  { %10793 = vmatmul.mubr.msk.f32.vlgmr.msra.gmra.mrb[80].mxu0 %vm338_vm2, %v6884_v16  ;;  %v11566_v16 = vld [vmem:[%s12876_s1 + $0x10] sm:$0xff] }
0x3645   :  { %v6957_v30 = vpop.f32.mrb[80].mxu0 }
0x3646   :  { %v10794_v19 = vpop.f32.mrb[81].mxu0  ;;  %10798 = vmatmul.mubr.msk.f32.vlgmr.msra.gmra.mrb[86].mxu1 %vm338_vm2, %v6957_v30  ;;  %v11567_v30 = vld [vmem:[%s12876_s1 + $0x18] sm:$0xff] }
0x3647   :  { %10819 = vmatprep.mubr.msk.f32.mxu1 %vm79_vm0, %v11917_v47  ;;  %11184 = vmatpush3.bf16.msra.mxu1 %v11181_v27 }
0x3648   :  { %11186 = vmatprep.subr.bf16.mxu1 %v11185_v1 }
0x364b   :  { %11188 = vmatpush3.bf16.msra.mxu1 %v11185_v1 }
0x364c   :  { %11197 = vmatprep.subr.bf16.mxu1 %v11600_v55 }
0x364e   :  { %10820 = vmatmul.mubr.msk.f32.vlgmr.msra.gmra.mrb[88].mxu1 %vm79_vm0, %v11925_v29 }
0x364f   :  { %10822 = vmatprep.mubr.msk.f32.mxu1 %vm79_vm0, %v11938_v57 }
0x3652   :  { %10823 = vmatmul.mubr.msk.f32.gmra.mrb[90].mxu1 %vm79_vm0, %v11968_v8 }
0x3653   :  { %10843 = vmatprep.mubr.msk.f32.mxu1 %vm11596_vm1, %v11595_v24 }
0x3719   :  { %v7030_v39 = vpop.f32.mrb[86].mxu1 }
0x371a   :  { %v7034_v25 = vadd.f32 %v7030_v39, %v6795_v12  ;;  %v10799_v32 = vpop.f32.mrb[87].mxu1 }
0x371c   :  { %v7042_v43 = vadd.f32 %v9844_v2, %v7034_v25  ;;  %v11564_v2 = vld [vmem:[%s12876_s1] sm:$0xff] }
0x371e   :  { %v7044_v63 = vadd.f32 %v7042_v43, %v12276_v5  ;;  %v9847_v5 = vld [vmem:[%s12882_s7 + $0x14] ss:$0 sm:$0xff] }
0x3720   :  { %v7052_v31 = vsel %vm79_vm0, %v7044_v63, 0.0 }
0x3721   :  { %7053 = vadd.xlane.f32.xlu1 %v7052_v31  ;;  %v10821_v3 = vpop.f32.mrb[88].mxu1 }
0x3722   :  { %v7262_v9 = vpop.f32.mrb[89].mxu1 }
0x3723   :  { %v12540_v28 = vpack.i.bf16 %v10821_v3, %v7262_v9  ;;  %v11198_v23 = vpack.c.bf16 %v10821_v3, %v7262_v9  ;;  %v12618_v3 = vld [vmem:[#allocation2 + $0x1e8] sm:$0xff] }
0x3725   :  { %7062 = vadd.xlane.f32.xlu1 %v7061_v13  ;;  %11347 = vrot.lane.b32.xlu0 %v12540_v28, %s11597_s10  ;;  %v12565_v25 = vpop.f32.mrb[90].mxu1 }
0x3726   :  { %11200 = vmatpush3.bf16.xpose.msk.msra.mxu1 %vm11951_vm3, %v11198_v23  ;;  %v12567_v32 = vpop.f32.mrb[91].mxu1 }
0x3727   :  { %11201 = vmatprep.subr.bf16.mxu1 %v11600_v55  ;;  %v11226_v43 = vpack.c.bf16 %v12565_v25, %v12567_v32 }
0x3797   :  { %v11348_v19 = vpop.permute.xlu0 %11347 }
0x3798   :  { %v11350_v7 = vunpack.i.h.bf16 %v11348_v19  ;;  %v11349_v38 = vunpack.i.l.bf16 %v11348_v19 }
0x379a   :  { %v11205_v39 = vpack.c.bf16 %v11350_v7, %v11349_v38 }
0x37ae   :  { %v7054_v59 = vpop.xlane.xlu1 %7053 }
0x37af   :  { %v7056_v49 = vmul.f32 0.03125, %v7054_v59 }
0x37b1   :  { %v7058_v33 = vsub.f32 %v7044_v63, %v7056_v49  ;;  %v9852_v63 = vld [vmem:[%s12882_s7 + $0x10] ss:$0 sm:$0xff]  ;;  %v9859_v49 = vld [vmem:[%s12882_s7 + $0x11] ss:$0 sm:$0xff] }
0x37b2   :  { %v7063_v47 = vpop.xlane.xlu1 %7062 }
0x37b3   :  { %v7067_v50 = vmul.f32 0.03125, %v7063_v47  ;;  %v7060_v36 = vmul.f32 %v7058_v33, %v7058_v33 }
0x37b5   :  { %v7069_v26 = vadd.f32 1e-05, %v7067_v50  ;;  %v7064_v52 = vsel %vm79_vm0, %v7060_v36, 0.0 }
0x37b6   :  { %7065 = vadd.xlane.f32.xlu1 %v7064_v52 }
0x37b7   :  { %11514 = vrsqrt.f32 %v7069_v26 }
0x37c1   :  { %v11515_v0 = vpop.eup %11514 }
0x37c2   :  { %v7073_v48 = vmul.f32 %v11515_v0, %v7057_v42  ;;  %v12571_v42 = vpack.i.bf16 %v12565_v25, %v12567_v32 }
0x37c4   :  { %v7081_v40 = vmul.f32 %v9847_v5, %v7073_v48 }
0x37c6   :  { %v12517_v54 = vadd.f32 %v9848_v37, %v7081_v40 }
0x37c8   :  { %v7091_v56 = vadd.f32 %v12285_v10, %v12517_v54  ;;  %v11173_v10 = vpack.c.bf16 %v7101_v60, %v7100_v17 }
0x37ca   :  { %10808 = vmatprep.mubr.msk.f32.mxu0 %vm79_vm0, %v7091_v56  ;;  %11174 = vmatprep.subr.bf16.mxu0 %v11173_v10 }
0x37cb   :  { %11176 = vmatpush3.bf16.msra.mxu0 %v11173_v10 }
0x37cc   :  { %11178 = vmatprep.subr.bf16.mxu0 %v11177_v46 }
0x37cf   :  { %11180 = vmatpush3.bf16.msra.mxu0 %v11177_v46 }
0x3843   :  { %v7066_v29 = vpop.xlane.xlu1 %7065 }
0x3844   :  { %v7068_v62 = vmul.f32 0.03125, %v7066_v29 }
0x3846   :  { %v7070_v22 = vadd.f32 1e-05, %v7068_v62 }
0x3848   :  { %11516 = vrsqrt.f32 %v7070_v22 }
0x3852   :  { %v11517_v51 = vpop.eup %11516 }
0x3853   :  { %v7074_v57 = vmul.f32 %v11517_v51, %v7058_v33 }
0x3855   :  { %v7082_v14 = vmul.f32 %v9847_v5, %v7074_v57 }
0x3857   :  { %v12531_v34 = vadd.f32 %v9848_v37, %v7082_v14 }
0x3859   :  { %v7092_v8 = vadd.f32 %v12294_v6, %v12531_v34  ;;  %v7282_v6 = vld [vmem:[#allocation2 + $0x1c0] sm:$0xff] }
0x385a   :  { %v11189_v12 = vpack.c.bf16 %v7283_v20, %v7282_v6 }
0x385b   :  { %10809 = vmatmul.mubr.msk.f32.vlgmr.msra.gmra.mrb[82].mxu0 %vm79_vm0, %v7092_v8 }
0x385c   :  { %10833 = vmatprep.mubr.msk.f32.mxu0 %vm79_vm0, %v11564_v2  ;;  %11190 = vmatprep.subr.bf16.mxu0 %v11189_v12 }
0x385d   :  { %11192 = vmatpush3.bf16.msra.mxu0 %v11189_v12 }
0x385e   :  { %11194 = vmatprep.subr.bf16.mxu0 %v11193_v18 }
0x3861   :  { %11196 = vmatpush3.bf16.msra.mxu0 %v11193_v18 }
0x3862   :  { %11204 = vmatprep.subr.bf16.mxu0 %v11600_v55 }
0x3864   :  { %10834 = vmatmul.mubr.msk.f32.vlgmr.msra.gmra.mrb[84].mxu0 %vm79_vm0, %v11565_v21 }
0x3865   :  { %10836 = vmatprep.mubr.msk.f32.mxu0 %vm79_vm0, %v11566_v16 }
0x3868   :  { %10837 = vmatmul.mubr.msk.f32.gmra.mrb[86].mxu0 %vm79_vm0, %v11567_v30 }
0x3869   :  { %10857 = vmatprep.mubr.msk.f32.mxu0 %vm11596_vm1, %v11595_v24 }
0x386a   :  { %11207 = vmatpush3.bf16.xpose.msk.msra.mxu0 %vm11951_vm3, %v11205_v39 }
0x386b   :  { %10867 = vmatprep.subr.mxu0 %v11595_v24 }
0x392e   :  { %v10810_v31 = vpop.f32.mrb[82].mxu0 }
0x392f   :  { %v12578_v44 = vadd.f32 %v10810_v31, %v9852_v63  ;;  %v7182_v13 = vpop.f32.mrb[83].mxu0 }
0x3930   :  { %v7183_v59 = vadd.f32 %v9852_v63, %v7182_v13 }
0x3932   :  { %7545 = vrot.lane.b32.xlu1 %v7183_v59, %s11597_s10  ;;  %10844 = vmatmul.mubr.msk.f32.vlgmr.msra.gmra.mrb[92].mxu1 %vm338_vm2, %v7183_v59 }
0x3933   :  { %10850 = vmatprep.mubr.msk.f32.mxu1 %vm11596_vm1, %v11595_v24 }
0x3937   :  { %v10835_v33 = vpop.f32.mrb[84].mxu0 }
0x3938   :  { %v7364_v47 = vadd.f32 %v10835_v33, %v9859_v49  ;;  %v7358_v50 = vpop.f32.mrb[85].mxu0 }
0x3939   :  { %v7359_v36 = vadd.f32 %v9859_v49, %v7358_v50 }
0x393b   :  { %v10838_v26 = vpop.f32.mrb[86].mxu0  ;;  %v11202_v52 = vpack.c.bf16 %v7364_v47, %v7359_v36  ;;  %v12608_v57 = vpack.i.bf16 %v7364_v47, %v7359_v36 }
0x393c   :  { %v12587_v0 = vadd.f32 %v10838_v26, %v9859_v49  ;;  %v7368_v5 = vpop.f32.mrb[87].mxu0 }
0x393d   :  { %v12589_v48 = vadd.f32 %v9859_v49, %v7368_v5  ;;  %11203 = vmatpush3.bf16.msra.mxu1 %v11202_v52 }
0x393e   :  { %11208 = vmatprep.subr.bf16.mxu1 %v11600_v55 }
0x393f   :  { %v11230_v40 = vpack.c.bf16 %v12587_v0, %v12589_v48  ;;  %v12599_v41 = vpack.i.bf16 %v12587_v0, %v12589_v48 }
0x39a4   :  { %v7546_v37 = vpop.permute.xlu1 %7545 }
0x39a5   :  { %10858 = vmatmul.mubr.msk.f32.vlgmr.msra.gmra.mrb[88].mxu0 %vm338_vm2, %v7546_v37 }
0x39a6   :  { %10869 = vmatprep.mubr.msk.f32.mxu0 %vm11596_vm1, %v11595_v24  ;;  %10868 = vmatpush3.msra.mxu0 %v12618_v3 }
0x39a7   :  { %11211 = vmatprep.subr.bf16.mxu0 %v11600_v55 }
0x3a05   :  { %v7457_v53 = vpop.f32.mrb[92].mxu1 }
0x3a06   :  { %v10845_v27 = vpop.f32.mrb[93].mxu1  ;;  %v7461_v56 = vsel %vm2690_vm4, %v7457_v53, -inf }
0x3a07   :  { %7462 = vmax.xlane.f32.xlu0 %v7461_v56 }
0x3a78   :  { %v7623_v35 = vpop.f32.mrb[88].mxu0 }
0x3a79   :  { %v10859_v58 = vpop.f32.mrb[89].mxu0  ;;  %v7627_v1 = vsel %vm2690_vm4, %v7623_v35, -inf }
0x3a7a   :  { %7628 = vmax.xlane.f32.xlu1 %v7627_v1 }
0x3a8b   :  { %11357 = vrot.lane.b32.xlu1 %v12540_v28, %s11598_s13 }
0x3a8f   :  { %8111 = vrot.lane.b32.xlu1 %v7183_v59, %s11599_s14 }
0x3a94   :  { %v7463_v17 = vpop.xlane.xlu0 %7462 }
0x3a95   :  { %v7464_v60 = vsub.f32 %v7457_v53, %v7463_v17 }
0x3a97   :  { %v7465_v10 = vmul.f32 1.442695, %v7464_v60 }
0x3a99   :  { %11518 = vpow2.f32 %v7465_v10 }
0x3aa3   :  { %v11519_v61 = vpop.eup %11518 }
0x3aa4   :  { %v7467_v45 = vsel %vm2690_vm4, %v11519_v61, 0.0 }
0x3aa5   :  { %7468 = vadd.xlane.f32.xlu0 %v7467_v45 }
0x3b07   :  { %v7629_v46 = vpop.xlane.xlu1 %7628 }
0x3b08   :  { %v7630_v29 = vsub.f32 %v7623_v35, %v7629_v46 }
0x3b0a   :  { %v7631_v62 = vmul.f32 1.442695, %v7630_v29 }
0x3b0b   :  { %v11358_v16 = vpop.permute.xlu1 %11357 }
0x3b0c   :  { %11520 = vpow2.f32 %v7631_v62  ;;  %v11360_v19 = vunpack.i.h.bf16 %v11358_v16  ;;  %v11359_v7 = vunpack.i.l.bf16 %v11358_v16 }
0x3b0e   :  { %v11212_v38 = vpack.c.bf16 %v11360_v19, %v11359_v7 }
0x3b0f   :  { %v8112_v33 = vpop.permute.xlu1 %8111 }
0x3b16   :  { %v11521_v22 = vpop.eup %11520 }
0x3b17   :  { %v7633_v51 = vsel %vm2690_vm4, %v11521_v22, 0.0 }
0x3b18   :  { %7634 = vadd.xlane.f32.xlu0 %v7633_v51 }
0x3b2e   :  { %11352 = vrot.lane.b32.xlu0 %v12608_v57, %s11597_s10 }
0x3b32   :  { %7865 = vrot.lane.b32.xlu0 %v7183_v59, %s11598_s13  ;;  %v7469_v14 = vpop.xlane.xlu0 %7468 }
0x3b33   :  { %11522 = vrcp.f32 %v7469_v14 }
0x3b36   :  { %11362 = vrot.lane.b32.xlu0 %v12540_v28, %s11599_s14 }
0x3b3d   :  { %v11523_v8 = vpop.eup %11522 }
0x3b3e   :  { %v7471_v2 = vmul.f32 %v11523_v8, %v11519_v61 }
0x3b40   :  { %10851 = vmatmul.mubr.msk.f32.vlgmr.msra.gmra.mrb[94].mxu1 %vm2690_vm4, %v7471_v2 }
0x3b41   :  { %10864 = vmatprep.mubr.msk.f32.mxu1 %vm11596_vm1, %v11595_v24 }
0x3ba5   :  { %v7635_v9 = vpop.xlane.xlu0 %7634 }
0x3ba6   :  { %11524 = vrcp.f32 %v7635_v9 }
0x3ba9   :  { %v11353_v23 = vpop.permute.xlu0 %11352 }
0x3baa   :  { %v11355_v6 = vunpack.i.h.bf16 %v11353_v23  ;;  %v11354_v20 = vunpack.i.l.bf16 %v11353_v23 }
0x3bac   :  { %v11209_v11 = vpack.c.bf16 %v11355_v6, %v11354_v20 }
0x3bad   :  { %v7866_v30 = vpop.permute.xlu0 %7865 }
0x3bae   :  { %11210 = vmatpush3.bf16.msra.mxu1 %v11209_v11 }
0x3baf   :  { %10872 = vmatprep.subr.mxu1 %v11595_v24 }
0x3bb0   :  { %v11525_v28 = vpop.eup %11524 }
0x3bb1   :  { %v7637_v12 = vmul.f32 %v11525_v28, %v11521_v22  ;;  %v11363_v63 = vpop.permute.xlu0 %11362 }
0x3bb2   :  { %v11365_v13 = vunpack.i.h.bf16 %v11363_v63  ;;  %v11364_v59 = vunpack.i.l.bf16 %v11363_v63 }
0x3bb3   :  { %10865 = vmatmul.mubr.msk.f32.vlgmr.msra.gmra.mrb[96].mxu1 %vm2690_vm4, %v7637_v12 }
0x3bb4   :  { %10873 = vmatpush3.msra.mxu1 %v12623_v15  ;;  %10874 = vmatprep.mubr.msk.f32.mxu1 %vm11596_vm1, %v11595_v24  ;;  %v11219_v49 = vpack.c.bf16 %v11365_v13, %v11364_v59 }
0x3bb5   :  { %11215 = vmatprep.subr.bf16.mxu1 %v11600_v55 }
0x3c13   :  { %v7541_v18 = vpop.f32.mrb[94].mxu1 }
0x3c14   :  { %v10852_v21 = vpop.f32.mrb[95].mxu1  ;;  %10875 = vmatmul.mubr.msk.f32.vlgmr.msra.gmra.mrb[98].mxu1 %vm338_vm2, %v7541_v18  ;;  %v12678_v18 = vld [vmem:[#allocation2 + $0x1f0] sm:$0xff] }
0x3c15   :  { %10888 = vmatprep.mubr.msk.f32.mxu1 %vm11596_vm1, %v11595_v24 }
0x3c86   :  { %v7715_v39 = vpop.f32.mrb[96].mxu1 }
0x3c87   :  { %v10866_v31 = vpop.f32.mrb[97].mxu1  ;;  %10870 = vmatmul.mubr.msk.f32.vlgmr.msra.gmra.mrb[90].mxu0 %vm338_vm2, %v7715_v39 }
0x3c88   :  { %11214 = vmatpush3.bf16.xpose.msk.msra.mxu0 %vm11951_vm3, %v11212_v38  ;;  %10881 = vmatprep.mubr.msk.f32.mxu0 %vm11596_vm1, %v11595_v24  ;;  %v12689_v31 = vld [vmem:[#allocation2 + $0x1f8] sm:$0xff] }
0x3c89   :  { %11218 = vmatprep.subr.bf16.mxu0 %v11600_v55 }
0x3c8f   :  { %10882 = vmatmul.mubr.msk.f32.vlgmr.msra.gmra.mrb[92].mxu0 %vm338_vm2, %v7866_v30 }
0x3c90   :  { %11221 = vmatpush3.bf16.xpose.msk.msra.mxu0 %vm11951_vm3, %v11219_v49  ;;  %10900 = vmatprep.mubr.msk.f32.mxu0 %vm11596_vm1, %v11595_v24 }
0x3c91   :  { %11225 = vmatprep.subr.bf16.mxu0 %v11600_v55 }
0x3c97   :  { %10901 = vmatmul.mubr.msk.f32.vlgmr.msra.gmra.mrb[94].mxu0 %vm338_vm2, %v8112_v33 }
0x3c98   :  { %11228 = vmatpush3.bf16.xpose.msk.msra.mxu0 %vm11951_vm3, %v11226_v43  ;;  %10919 = vmatprep.mubr.msk.f32.mxu0 %vm11596_vm1, %v11595_v24 }
0x3c99   :  { %11236 = vmatprep.subr.bf16.mxu0 %v11600_v55 }
0x3c9f   :  { %10920 = vmatmul.mubr.msk.f32.vlgmr.msra.gmra.mrb[96].mxu0 %vm338_vm2, %v12578_v44 }
0x3ca0   :  { %10940 = vmatprep.mubr.msk.f32.mxu0 %vm11596_vm1, %v11595_v24 }
0x3ce7   :  { %v7861_v47 = vpop.f32.mrb[98].mxu1 }
0x3ce8   :  { %v10876_v50 = vpop.f32.mrb[99].mxu1 }
0x3d5a   :  { %v7788_v36 = vpop.f32.mrb[90].mxu0 }
0x3d5b   :  { %v12658_v26 = vadd.f32 %v7861_v47, %v7788_v36  ;;  %v10871_v25 = vpop.f32.mrb[91].mxu0 }
0x3d62   :  { %v7943_v32 = vpop.f32.mrb[92].mxu0 }
0x3d63   :  { %v10883_v52 = vpop.f32.mrb[93].mxu0  ;;  %v7947_v43 = vsel %vm2690_vm4, %v7943_v32, -inf }
0x3d64   :  { %7948 = vmax.xlane.f32.xlu0 %v7947_v43 }
0x3d6a   :  { %v8189_v5 = vpop.f32.mrb[94].mxu0 }
0x3d6b   :  { %v10902_v37 = vpop.f32.mrb[95].mxu0  ;;  %v8193_v29 = vsel %vm2690_vm4, %v8189_v5, -inf }
0x3d72   :  { %v8432_v53 = vpop.f32.mrb[96].mxu0 }
0x3d73   :  { %v10921_v27 = vpop.f32.mrb[97].mxu0  ;;  %v8436_v56 = vsel %vm2690_vm4, %v8432_v53, -inf }
0x3d7a   :  { %11367 = vrot.lane.b32.xlu0 %v12608_v57, %s11598_s13 }
0x3d99   :  { %8437 = vmax.xlane.f32.xlu0 %v8436_v56 }
0x3daf   :  { %11377 = vrot.lane.b32.xlu0 %v12571_v42, %s11597_s10 }
0x3df1   :  { %v7949_v35 = vpop.xlane.xlu0 %7948 }
0x3df2   :  { %v7950_v58 = vsub.f32 %v7943_v32, %v7949_v35 }
0x3df4   :  { %v7951_v1 = vmul.f32 1.442695, %v7950_v58 }
0x3df5   :  { %v11368_v17 = vpop.permute.xlu0 %11367 }
0x3df6   :  { %11526 = vpow2.f32 %v7951_v1  ;;  %v11370_v60 = vunpack.i.h.bf16 %v11368_v17  ;;  %v11369_v10 = vunpack.i.l.bf16 %v11368_v17 }
0x3df8   :  { %v11216_v61 = vpack.c.bf16 %v11370_v60, %v11369_v10 }
0x3dfa   :  { %11217 = vmatpush3.bf16.msra.mxu1 %v11216_v61 }
0x3dfb   :  { %10891 = vmatprep.subr.mxu1 %v11595_v24 }
0x3e00   :  { %v11527_v45 = vpop.eup %11526 }
0x3e01   :  { %v7953_v46 = vsel %vm2690_vm4, %v11527_v45, 0.0 }
0x3e02   :  { %7954 = vadd.xlane.f32.xlu1 %v7953_v46 }
0x3e06   :  { %8194 = vmax.xlane.f32.xlu1 %v8193_v29 }
0x3e26   :  { %v8438_v6 = vpop.xlane.xlu0 %8437 }
0x3e27   :  { %v8439_v20 = vsub.f32 %v8432_v53, %v8438_v6 }
0x3e29   :  { %v8440_v11 = vmul.f32 1.442695, %v8439_v20 }
0x3e2a   :  { %v11378_v25 = vpop.permute.xlu0 %11377 }
0x3e2b   :  { %v11380_v52 = vunpack.i.h.bf16 %v11378_v25  ;;  %v11379_v43 = vunpack.i.l.bf16 %v11378_v25 }
0x3e8f   :  { %v7955_v62 = vpop.xlane.xlu1 %7954 }
0x3e90   :  { %11528 = vrcp.f32 %v7955_v62 }
0x3e93   :  { %v8195_v22 = vpop.xlane.xlu1 %8194 }
0x3e94   :  { %v8196_v51 = vsub.f32 %v8189_v5, %v8195_v22 }
0x3e96   :  { %v8197_v14 = vmul.f32 1.442695, %v8196_v51 }
0x3e98   :  { %11530 = vpow2.f32 %v8197_v14 }
0x3e99   :  { %11532 = vpow2.f32 %v8440_v11 }
0x3e9a   :  { %v11529_v8 = vpop.eup %11528 }
0x3e9b   :  { %v7957_v2 = vmul.f32 %v11529_v8, %v11527_v45 }
0x3e9d   :  { %10889 = vmatmul.mubr.msk.f32.vlgmr.msra.gmra.mrb[100].mxu1 %vm2690_vm4, %v7957_v2 }
0x3e9e   :  { %10893 = vmatprep.mubr.msk.f32.mxu1 %vm11596_vm1, %v11595_v24  ;;  %10892 = vmatpush3.msra.mxu1 %v12678_v18 }
0x3e9f   :  { %11222 = vmatprep.subr.bf16.mxu1 %v11600_v55 }
0x3ea2   :  { %v11531_v9 = vpop.eup %11530 }
0x3ea3   :  { %v8199_v23 = vsel %vm2690_vm4, %v11531_v9, 0.0  ;;  %v11533_v28 = vpop.eup %11532 }
0x3ea4   :  { %8200 = vadd.xlane.f32.xlu1 %v8199_v23  ;;  %v8442_v12 = vsel %vm2690_vm4, %v11533_v28, 0.0 }
0x3eb5   :  { %11372 = vrot.lane.b32.xlu1 %v12608_v57, %s11599_s14 }
0x3ed9   :  { %8443 = vadd.xlane.f32.xlu1 %v8442_v12 }
0x3eea   :  { %8520 = vrot.lane.b32.xlu1 %v12578_v44, %s11597_s10 }
0x3f31   :  { %v8201_v21 = vpop.xlane.xlu1 %8200 }
0x3f32   :  { %11534 = vrcp.f32 %v8201_v21 }
0x3f35   :  { %v11373_v57 = vpop.permute.xlu1 %11372 }
0x3f36   :  { %v11375_v16 = vunpack.i.h.bf16 %v11373_v57  ;;  %v11374_v30 = vunpack.i.l.bf16 %v11373_v57 }
0x3f38   :  { %v11223_v7 = vpack.c.bf16 %v11375_v16, %v11374_v30 }
0x3f3c   :  { %v11535_v19 = vpop.eup %11534 }
0x3f3d   :  { %v8203_v63 = vmul.f32 %v11535_v19, %v11531_v9 }
0x3f66   :  { %v8444_v13 = vpop.xlane.xlu1 %8443 }
0x3f67   :  { %11536 = vrcp.f32 %v8444_v13 }
0x3f6a   :  { %v8521_v0 = vpop.permute.xlu1 %8520 }
0x3f70   :  { %v8033_v38 = vpop.f32.mrb[100].mxu1 }
0x3f71   :  { %v10890_v39 = vpop.f32.mrb[101].mxu1  ;;  %10894 = vmatmul.mubr.msk.f32.vlgmr.msra.gmra.mrb[102].mxu1 %vm338_vm2, %v8033_v38  ;;  %v11537_v47 = vpop.eup %11536 }
0x3f72   :  { %11224 = vmatpush3.bf16.msra.mxu1 %v11223_v7  ;;  %10907 = vmatprep.mubr.msk.f32.mxu1 %vm11596_vm1, %v11595_v24  ;;  %v8446_v32 = vmul.f32 %v11537_v47, %v11533_v28 }
0x3f73   :  { %10910 = vmatprep.subr.mxu1 %v11595_v24 }
0x3f75   :  { %10908 = vmatmul.mubr.msk.f32.vlgmr.msra.gmra.mrb[104].mxu1 %vm2690_vm4, %v8203_v63 }
0x3f76   :  { %10912 = vmatprep.mubr.msk.f32.mxu1 %vm11596_vm1, %v11595_v24  ;;  %10911 = vmatpush3.msra.mxu1 %v12689_v31 }
0x3f77   :  { %11229 = vmatprep.subr.bf16.mxu1 %v11600_v55 }
0x4044   :  { %v8106_v59 = vpop.f32.mrb[102].mxu1 }
0x4045   :  { %v8110_v49 = vadd.f32 %v8106_v59, %v12658_v26  ;;  %v10895_v33 = vpop.f32.mrb[103].mxu1  ;;  %v11233_v26 = vpack.c.bf16 %v11380_v52, %v11379_v43  ;;  %v9904_v52 = vld [vmem:[%s12882_s7 + $0x12] ss:$0 sm:$0xff] }
0x4048   :  { %v8279_v50 = vpop.f32.mrb[104].mxu1 }
0x4049   :  { %v10909_v36 = vpop.f32.mrb[105].mxu1  ;;  %10913 = vmatmul.mubr.msk.f32.vlgmr.msra.gmra.mrb[106].mxu1 %vm338_vm2, %v8279_v50 }
0x404a   :  { %11231 = vmatpush3.bf16.msra.mxu1 %v11230_v40  ;;  %10926 = vmatprep.mubr.msk.f32.mxu1 %vm11596_vm1, %v11595_v24 }
0x404b   :  { %11232 = vmatprep.subr.bf16.mxu1 %v11600_v55 }
0x404d   :  { %10927 = vmatmul.mubr.msk.f32.vlgmr.msra.gmra.mrb[108].mxu1 %vm2690_vm4, %v8446_v32 }
0x404e   :  { %10933 = vmatprep.mubr.msk.f32.mxu1 %vm11596_vm1, %v11595_v24 }
0x4053   :  { %11235 = vmatpush3.bf16.xpose.msk.msra.mxu1 %vm11951_vm3, %v11233_v26 }
0x4054   :  { %10948 = vmatprep.subr.mxu1 %v11595_v24 }
0x405a   :  { %10934 = vmatmul.mubr.msk.f32.vlgmr.msra.gmra.mrb[110].mxu1 %vm338_vm2, %v8521_v0 }
0x405b   :  { %10949 = vmatpush3.msra.mxu1 %v12623_v15  ;;  %10950 = vmatprep.mubr.msk.f32.mxu1 %vm11596_vm1, %v11595_v24 }
0x405c   :  { %11243 = vmatprep.subr.bf16.mxu1 %v11600_v55 }
0x411c   :  { %v8352_v48 = vpop.f32.mrb[106].mxu1 }
0x411d   :  { %v12712_v40 = vadd.f32 %v8352_v48, %v8110_v49  ;;  %v10914_v5 = vpop.f32.mrb[107].mxu1 }
0x411f   :  { %v9338_v43 = vadd.f32 %v9904_v52, %v12712_v40 }
0x4120   :  { %v8516_v37 = vpop.f32.mrb[108].mxu1 }
0x4121   :  { %v10928_v53 = vpop.f32.mrb[109].mxu1  ;;  %10951 = vmatmul.mubr.msk.f32.vlgmr.msra.gmra.mrb[112].mxu1 %vm338_vm2, %v8516_v37  ;;  %v9340_v26 = vadd.f32 %v9338_v43, %v12517_v54 }
0x4122   :  { %10964 = vmatprep.mubr.msk.f32.mxu1 %vm11596_vm1, %v11595_v24 }
0x4123   :  { %v9346_v0 = vsel %vm79_vm0, %v9340_v26, 0.0 }
0x412d   :  { %v8598_v27 = vpop.f32.mrb[110].mxu1 }
0x412e   :  { %v10935_v56 = vpop.f32.mrb[111].mxu1  ;;  %v8602_v15 = vsel %vm2690_vm4, %v8598_v27, -inf }
0x412f   :  { %8603 = vmax.xlane.f32.xlu0 %v8602_v15 }
0x4145   :  { %11382 = vrot.lane.b32.xlu0 %v12599_v41, %s11597_s10 }
0x4149   :  { %8840 = vrot.lane.b32.xlu0 %v12578_v44, %s11598_s13 }
0x414d   :  { %11392 = vrot.lane.b32.xlu0 %v12571_v42, %s11599_s14 }
0x4151   :  { %9086 = vrot.lane.b32.xlu0 %v12578_v44, %s11599_s14 }
0x41bc   :  { %v8604_v35 = vpop.xlane.xlu0 %8603 }
0x41bd   :  { %v8605_v58 = vsub.f32 %v8598_v27, %v8604_v35 }
0x41bf   :  { %v8606_v1 = vmul.f32 1.442695, %v8605_v58 }
0x41c0   :  { %v11383_v17 = vpop.permute.xlu0 %11382 }
0x41c1   :  { %11538 = vpow2.f32 %v8606_v1  ;;  %v11385_v60 = vunpack.i.h.bf16 %v11383_v17  ;;  %v11384_v10 = vunpack.i.l.bf16 %v11383_v17 }
0x41c3   :  { %v11237_v61 = vpack.c.bf16 %v11385_v60, %v11384_v10 }
0x41c4   :  { %v8841_v8 = vpop.permute.xlu0 %8840 }
0x41c5   :  { %11238 = vmatpush3.bf16.msra.mxu0 %v11237_v61 }
0x41c6   :  { %10943 = vmatprep.subr.mxu0 %v11595_v24 }
0x41c8   :  { %v11393_v6 = vpop.permute.xlu0 %11392 }
0x41c9   :  { %v11394_v11 = vunpack.i.l.bf16 %v11393_v6 }
0x41cb   :  { %v11539_v45 = vpop.eup %11538 }
0x41cc   :  { %v8608_v46 = vsel %vm2690_vm4, %v11539_v45, 0.0  ;;  %v9087_v12 = vpop.permute.xlu0 %9086 }
0x41cd   :  { %8609 = vadd.xlane.f32.xlu1 %v8608_v46  ;;  %v12778_v46 = vld [vmem:[%s12882_s7 + $0x17] ss:$0 sm:$0xff] }
0x41de   :  { %11387 = vrot.lane.b32.xlu1 %v12571_v42, %s11598_s13 }
0x41f4   :  { %v8836_v29 = vpop.f32.mrb[112].mxu1 }
0x41f5   :  { %v10952_v44 = vpop.f32.mrb[113].mxu1 }
0x425a   :  { %v8610_v62 = vpop.xlane.xlu1 %8609 }
0x425b   :  { %11540 = vrcp.f32 %v8610_v62 }
0x425e   :  { %v11388_v14 = vpop.permute.xlu1 %11387 }
0x425f   :  { %v11390_v2 = vunpack.i.h.bf16 %v11388_v14  ;;  %v11389_v9 = vunpack.i.l.bf16 %v11388_v14 }
0x4261   :  { %v11240_v42 = vpack.c.bf16 %v11390_v2, %v11389_v9 }
0x4265   :  { %v11541_v22 = vpop.eup %11540 }
0x4266   :  { %v8612_v51 = vmul.f32 %v11541_v22, %v11539_v45 }
0x4268   :  { %10941 = vmatmul.mubr.msk.f32.vlgmr.msra.gmra.mrb[98].mxu0 %vm2690_vm4, %v8612_v51 }
0x4269   :  { %10944 = vmatpush3.msra.mxu0 %v12618_v3  ;;  %10945 = vmatprep.mubr.msk.f32.mxu0 %vm11596_vm1, %v11595_v24  ;;  %v11395_v3 = vunpack.i.h.bf16 %v11393_v6 }
0x426a   :  { %11239 = vmatprep.subr.bf16.mxu0 %v11600_v55 }
0x426b   :  { %v11247_v28 = vpack.c.bf16 %v11395_v3, %v11394_v11 }
0x433b   :  { %v8690_v23 = vpop.f32.mrb[98].mxu0 }
0x433c   :  { %v10942_v20 = vpop.f32.mrb[99].mxu0  ;;  %10946 = vmatmul.mubr.msk.f32.vlgmr.msra.gmra.mrb[100].mxu0 %vm338_vm2, %v8690_v23 }
0x433d   :  { %11242 = vmatpush3.bf16.xpose.msk.msra.mxu0 %vm11951_vm3, %v11240_v42  ;;  %10957 = vmatprep.mubr.msk.f32.mxu0 %vm11596_vm1, %v11595_v24 }
0x433e   :  { %11246 = vmatprep.subr.bf16.mxu0 %v11600_v55 }
0x4344   :  { %10958 = vmatmul.mubr.msk.f32.vlgmr.msra.gmra.mrb[102].mxu0 %vm338_vm2, %v8841_v8 }
0x4345   :  { %11249 = vmatpush3.bf16.xpose.msk.msra.mxu0 %vm11951_vm3, %v11247_v28  ;;  %10976 = vmatprep.mubr.msk.f32.mxu0 %vm11596_vm1, %v11595_v24 }
0x434c   :  { %10977 = vmatmul.mubr.msk.f32.vlgmr.msra.gmra.mrb[104].mxu0 %vm338_vm2, %v9087_v12 }
0x440f   :  { %v8763_v21 = vpop.f32.mrb[100].mxu0 }
0x4410   :  { %v12747_v57 = vadd.f32 %v8836_v29, %v8763_v21  ;;  %v10947_v16 = vpop.f32.mrb[101].mxu0 }
0x4417   :  { %v8918_v30 = vpop.f32.mrb[102].mxu0 }
0x4418   :  { %v10959_v19 = vpop.f32.mrb[103].mxu0  ;;  %v8922_v7 = vsel %vm2690_vm4, %v8918_v30, -inf }
0x4419   :  { %8923 = vmax.xlane.f32.xlu1 %v8922_v7 }
0x441f   :  { %v9164_v38 = vpop.f32.mrb[104].mxu0 }
0x4420   :  { %v10978_v39 = vpop.f32.mrb[105].mxu0  ;;  %v9168_v4 = vsel %vm2690_vm4, %v9164_v38, -inf }
0x4421   :  { %9169 = vmax.xlane.f32.xlu1 %v9168_v4  ;;  %v9910_v39 = vld [vmem:[%s12880_s5 + $0x28] sm:$0xff] }
0x44a6   :  { %v8924_v63 = vpop.xlane.xlu1 %8923 }
0x44a7   :  { %v8925_v13 = vsub.f32 %v8918_v30, %v8924_v63  ;;  %v9912_v63 = vld [vmem:[%s12880_s5 + $0x38] sm:$0xff] }
0x44a9   :  { %v8926_v59 = vmul.f32 1.442695, %v8925_v13 }
0x44ab   :  { %11542 = vpow2.f32 %v8926_v59  ;;  %v9917_v59 = vld [vmem:[%s12881_s6 + $0x40] sm:$0xff] }
0x44ae   :  { %v9170_v49 = vpop.xlane.xlu1 %9169 }
0x44af   :  { %v9171_v33 = vsub.f32 %v9164_v38, %v9170_v49  ;;  %v9909_v38 = vld [vmem:[%s12880_s5 + $0x20] sm:$0xff]  ;;  %v9918_v49 = vld [vmem:[%s12881_s6 + $0x48] sm:$0xff] }
0x44b0   :  { %v11253_v4 = vpack.c.bf16 %v9910_v39, %v9909_v38 }
0x44b1   :  { %v9172_v47 = vmul.f32 1.442695, %v9171_v33  ;;  %v9919_v33 = vld [vmem:[%s12881_s6 + $0x50] sm:$0xff] }
0x44b2   :  { %11254 = vmatprep.subr.bf16.mxu0 %v11253_v4 }
0x44b3   :  { %11544 = vpow2.f32 %v9172_v47  ;;  %11256 = vmatpush3.bf16.msra.mxu0 %v11253_v4  ;;  %v11261_v47 = vpack.c.bf16 %v9918_v49, %v9917_v59 }
0x44b5   :  { %v11543_v50 = vpop.eup %11542 }
0x44b6   :  { %v8928_v36 = vsel %vm2690_vm4, %v11543_v50, 0.0 }
0x44b7   :  { %8929 = vadd.xlane.f32.xlu0 %v8928_v36 }
0x44bd   :  { %v11545_v25 = vpop.eup %11544 }
0x44be   :  { %v9174_v32 = vsel %vm2690_vm4, %v11545_v25, 0.0 }
0x44bf   :  { %9175 = vadd.xlane.f32.xlu1 %v9174_v32  ;;  %v9922_v32 = vld [vmem:[%s12881_s6 + $0x68] sm:$0xff] }
0x44cd   :  { %11397 = vrot.lane.b32.xlu0 %v12599_v41, %s11598_s13 }
0x44d0   :  { %11402 = vrot.lane.b32.xlu1 %v12599_v41, %s11599_s14 }
0x44ec   :  { %9347 = vadd.xlane.f32.xlu0 %v9346_v0 }
0x4544   :  { %v8930_v48 = vpop.xlane.xlu0 %8929 }
0x4545   :  { %11546 = vrcp.f32 %v8930_v48 }
0x4548   :  { %v11398_v5 = vpop.permute.xlu0 %11397 }
0x4549   :  { %v11400_v37 = vunpack.i.h.bf16 %v11398_v5  ;;  %v11399_v53 = vunpack.i.l.bf16 %v11398_v5 }
0x454b   :  { %v11244_v27 = vpack.c.bf16 %v11400_v37, %v11399_v53 }
0x454c   :  { %v9176_v10 = vpop.xlane.xlu1 %9175 }
0x454d   :  { %11245 = vmatpush3.bf16.msra.mxu1 %v11244_v27  ;;  %v9923_v27 = vld [vmem:[%s12881_s6 + $0x70] sm:$0xff] }
0x454e   :  { %10967 = vmatprep.subr.mxu1 %v11595_v24 }
0x454f   :  { %v11547_v41 = vpop.eup %11546 }
0x4550   :  { %v8932_v56 = vmul.f32 %v11547_v41, %v11543_v50  ;;  %v9920_v50 = vld [vmem:[%s12881_s6 + $0x58] sm:$0xff] }
0x4551   :  { %v11265_v36 = vpack.c.bf16 %v9920_v50, %v9919_v33  ;;  %v9924_v41 = vld [vmem:[%s12881_s6 + $0x78] sm:$0xff] }
0x4552   :  { %10965 = vmatmul.mubr.msk.f32.vlgmr.msra.gmra.mrb[114].mxu1 %vm2690_vm4, %v8932_v56  ;;  %v11273_v56 = vpack.c.bf16 %v9924_v41, %v9923_v27  ;;  %v9935_v27 = vld [vmem:[%s12882_s7 + $0x1a] ss:$0 sm:$0xff] }
0x4553   :  { %10968 = vmatpush3.msra.mxu1 %v12678_v18  ;;  %10969 = vmatprep.mubr.msk.f32.mxu1 %vm11596_vm1, %v11595_v24  ;;  %v12773_v18 = vld [vmem:[%s12882_s7 + $0x16] ss:$0 sm:$0xff] }
0x4554   :  { %11250 = vmatprep.subr.bf16.mxu1 %v11600_v55  ;;  %v11403_v55 = vpop.permute.xlu1 %11402 }
0x4555   :  { %v11405_v44 = vunpack.i.h.bf16 %v11403_v55  ;;  %v11404_v62 = vunpack.i.l.bf16 %v11403_v55 }
0x4557   :  { %v11251_v14 = vpack.c.bf16 %v11405_v44, %v11404_v62 }
0x4579   :  { %v9348_v54 = vpop.xlane.xlu0 %9347 }
0x457a   :  { %v9352_v40 = vmul.f32 0.03125, %v9348_v54  ;;  %v9914_v54 = vld [vmem:[%s12883_s8 + $0x1] ss:$0 sm:$0xff] }
0x457c   :  { %v9354_v15 = vsub.f32 %v9340_v26, %v9352_v40 }
0x457e   :  { %v9356_v35 = vmul.f32 %v9354_v15, %v9354_v15 }
0x4580   :  { %v9358_v58 = vsel %vm79_vm0, %v9356_v35, 0.0 }
0x4581   :  { %9359 = vadd.xlane.f32.xlu0 %v9358_v58 }
0x460e   :  { %v9360_v1 = vpop.xlane.xlu0 %9359 }
0x460f   :  { %v9364_v17 = vmul.f32 0.03125, %v9360_v1 }
0x4611   :  { %v9366_v60 = vadd.f32 1e-05, %v9364_v17 }
0x4613   :  { %11548 = vrsqrt.f32 %v9366_v60  ;;  %v9926_v60 = vld [vmem:[%s12882_s7 + $0x13] ss:$0 sm:$0xff] }
0x4614   :  { %11550 = vrcp.f32 %v9176_v10 }
0x461d   :  { %v11549_v61 = vpop.eup %11548 }
0x461e   :  { %v9370_v45 = vmul.f32 %v11549_v61, %v9354_v15  ;;  %v11551_v51 = vpop.eup %11550 }
0x461f   :  { %v9178_v9 = vmul.f32 %v11551_v51, %v11545_v25  ;;  %v9921_v25 = vld [vmem:[%s12881_s6 + $0x60] sm:$0xff] }
0x4620   :  { %v9378_v29 = vmul.f32 %v12773_v18, %v9370_v45 }
0x4622   :  { %v12782_v22 = vadd.f32 %v12778_v46, %v9378_v29 }
0x4624   :  { %10999 = vmatprep.mubr.msk.f32.mxu0 %vm79_vm0, %v12782_v22 }
0x4625   :  { %v9008_v8 = vpop.f32.mrb[114].mxu1 }
0x4626   :  { %v10966_v2 = vpop.f32.mrb[115].mxu1  ;;  %10970 = vmatmul.mubr.msk.f32.vlgmr.msra.gmra.mrb[116].mxu1 %vm338_vm2, %v9008_v8 }
0x4627   :  { %11252 = vmatpush3.bf16.msra.mxu1 %v11251_v14  ;;  %10983 = vmatprep.mubr.msk.f32.mxu1 %vm11596_vm1, %v11595_v24 }
0x4628   :  { %10986 = vmatprep.subr.mxu1 %v11595_v24 }
0x462a   :  { %10984 = vmatmul.mubr.msk.f32.vlgmr.msra.gmra.mrb[118].mxu1 %vm2690_vm4, %v9178_v9 }
0x462b   :  { %10987 = vmatpush3.msra.mxu1 %v12689_v31  ;;  %10988 = vmatprep.mubr.msk.f32.mxu1 %vm11596_vm1, %v11595_v24 }
0x462c   :  { %11262 = vmatprep.subr.bf16.mxu1 %v11261_v47 }
0x46f9   :  { %v9081_v42 = vpop.f32.mrb[116].mxu1 }
0x46fa   :  { %v9085_v23 = vadd.f32 %v9081_v42, %v12747_v57  ;;  %v10971_v6 = vpop.f32.mrb[117].mxu1 }
0x46fd   :  { %v9254_v20 = vpop.f32.mrb[118].mxu1 }
0x46fe   :  { %v10985_v3 = vpop.f32.mrb[119].mxu1  ;;  %10989 = vmatmul.mubr.msk.f32.vlgmr.msra.gmra.mrb[120].mxu1 %vm338_vm2, %v9254_v20 }
0x46ff   :  { %11264 = vmatpush3.bf16.msra.mxu1 %v11261_v47 }
0x4700   :  { %11266 = vmatprep.subr.bf16.mxu1 %v11265_v36 }
0x4703   :  { %11268 = vmatpush3.bf16.msra.mxu1 %v11265_v36 }
0x47d1   :  { %v9327_v11 = vpop.f32.mrb[120].mxu1 }
0x47d2   :  { %v9331_v28 = vadd.f32 %v9327_v11, %v9085_v23  ;;  %v10990_v12 = vpop.f32.mrb[121].mxu1 }
0x47d4   :  { %v9339_v21 = vadd.f32 %v9904_v52, %v9331_v28  ;;  %v11269_v52 = vpack.c.bf16 %v9922_v32, %v9921_v25 }
0x47d6   :  { %v9341_v16 = vadd.f32 %v9339_v21, %v12531_v34  ;;  %v9911_v34 = vld [vmem:[%s12880_s5 + $0x30] sm:$0xff]  ;;  %11270 = vmatprep.subr.bf16.mxu1 %v11269_v52 }
0x47d7   :  { %v11257_v13 = vpack.c.bf16 %v9912_v63, %v9911_v34  ;;  %11272 = vmatpush3.bf16.msra.mxu1 %v11269_v52 }
0x47d8   :  { %v9349_v30 = vsel %vm79_vm0, %v9341_v16, 0.0  ;;  %11274 = vmatprep.subr.bf16.mxu1 %v11273_v56 }
0x47d9   :  { %9350 = vadd.xlane.f32.xlu1 %v9349_v30  ;;  %11258 = vmatprep.subr.bf16.mxu0 %v11257_v13  ;;  %v9931_v30 = vld [vmem:[%s12882_s7 + $0x18] ss:$0 sm:$0xff] }
0x47da   :  { %11260 = vmatpush3.bf16.msra.mxu0 %v11257_v13 }
0x47db   :  { %11276 = vmatpush3.bf16.msra.mxu1 %v11273_v56 }
0x4866   :  { %v9351_v31 = vpop.xlane.xlu1 %9350 }
0x4867   :  { %v9353_v19 = vmul.f32 0.03125, %v9351_v31 }
0x4869   :  { %v9355_v24 = vsub.f32 %v9341_v16, %v9353_v19 }
0x486b   :  { %v9357_v7 = vmul.f32 %v9355_v24, %v9355_v24 }
0x486d   :  { %v9361_v57 = vsel %vm79_vm0, %v9357_v7, 0.0 }
0x486e   :  { %9362 = vadd.xlane.f32.xlu0 %v9361_v57 }
0x48fb   :  { %v9363_v43 = vpop.xlane.xlu0 %9362 }
0x48fc   :  { %v9365_v26 = vmul.f32 0.03125, %v9363_v43 }
0x48fe   :  { %v9367_v0 = vadd.f32 1e-05, %v9365_v26 }
0x4900   :  { %11552 = vrsqrt.f32 %v9367_v0 }
0x490a   :  { %v11553_v48 = vpop.eup %11552 }
0x490b   :  { %v9371_v5 = vmul.f32 %v11553_v48, %v9355_v24  ;;  %v9932_v24 = vld [vmem:[%s12882_s7 + $0x19] ss:$0 sm:$0xff] }
0x490d   :  { %v9379_v37 = vmul.f32 %v12773_v18, %v9371_v5 }
0x490f   :  { %v9387_v53 = vadd.f32 %v12778_v46, %v9379_v37 }
0x4911   :  { %11000 = vmatmul.mubr.msk.f32.vlgmr.msra.gmra.mrb[106].mxu0 %vm79_vm0, %v9387_v53 }
0x49e4   :  { %v11001_v40 = vpop.f32.mrb[106].mxu0 }
0x49e5   :  { %v9479_v15 = vadd.f32 %v11001_v40, %v9914_v54  ;;  %v9473_v35 = vpop.f32.mrb[107].mxu0 }
0x49e6   :  { %v9474_v58 = vadd.f32 %v9914_v54, %v9473_v35  ;;  %v9936_v54 = vld [vmem:[%s12882_s7 + $0x1b] ss:$0 sm:$0xff] }
0x49e7   :  { %v9483_v17 = vmax.f32 %v9479_v15, 0.0 }
0x49e8   :  { %v9482_v1 = vmax.f32 %v9474_v58, 0.0 }
0x49ea   :  { %11018 = vmatprep.mubr.msk.f32.mxu1 %vm4728_vm5, %v9482_v1 }
0x49eb   :  { %11019 = vmatmul.mubr.msk.f32.vlgmr.msra.gmra.mrb[122].mxu1 %vm4728_vm5, %v9483_v17 }
0x4abe   :  { %v11020_v10 = vpop.f32.mrb[122].mxu1 }
0x4abf   :  { %v9579_v61 = vadd.f32 %v11020_v10, %v9926_v60  ;;  %v9573_v18 = vpop.f32.mrb[123].mxu1 }
0x4ac0   :  { %v9574_v55 = vadd.f32 %v9926_v60, %v9573_v18 }
0x4ac1   :  { %v9583_v45 = vadd.f32 %v9579_v61, %v9387_v53 }
0x4ac2   :  { %v9582_v46 = vadd.f32 %v9574_v55, %v12782_v22 }
0x4ac3   :  { %v9591_v29 = vsel %vm79_vm0, %v9583_v45, 0.0 }
0x4ac4   :  { %9592 = vadd.xlane.f32.xlu1 %v9591_v29  ;;  %v9588_v44 = vsel %vm79_vm0, %v9582_v46, 0.0 }
0x4ac5   :  { %9589 = vadd.xlane.f32.xlu0 %v9588_v44 }
0x4b51   :  { %v9593_v62 = vpop.xlane.xlu1 %9592 }
0x4b52   :  { %v9595_v51 = vmul.f32 0.03125, %v9593_v62  ;;  %v9590_v14 = vpop.xlane.xlu0 %9589 }
0x4b53   :  { %v9594_v8 = vmul.f32 0.03125, %v9590_v14 }
0x4b54   :  { %v9597_v2 = vsub.f32 %v9583_v45, %v9595_v51 }
0x4b55   :  { %v9596_v9 = vsub.f32 %v9582_v46, %v9594_v8 }
0x4b56   :  { %v9599_v42 = vmul.f32 %v9597_v2, %v9597_v2 }
0x4b57   :  { %v9598_v23 = vmul.f32 %v9596_v9, %v9596_v9 }
0x4b58   :  { %v9603_v6 = vsel %vm79_vm0, %v9599_v42, 0.0 }
0x4b59   :  { %9604 = vadd.xlane.f32.xlu1 %v9603_v6  ;;  %v9600_v20 = vsel %vm79_vm0, %v9598_v23, 0.0 }
0x4b5a   :  { %9601 = vadd.xlane.f32.xlu0 %v9600_v20 }
0x4be6   :  { %v9605_v22 = vpop.xlane.xlu1 %9604 }
0x4be7   :  { %v9607_v3 = vmul.f32 0.03125, %v9605_v22  ;;  %v9602_v11 = vpop.xlane.xlu0 %9601 }
0x4be8   :  { %v9606_v28 = vmul.f32 0.03125, %v9602_v11 }
0x4be9   :  { %v9609_v12 = vadd.f32 1e-05, %v9607_v3 }
0x4bea   :  { %v9608_v21 = vadd.f32 1e-05, %v9606_v28 }
0x4beb   :  { %11554 = vrsqrt.f32 %v9609_v12 }
0x4bec   :  { %11556 = vrsqrt.f32 %v9608_v21 }
0x4bf5   :  { %v11555_v16 = vpop.eup %11554 }
0x4bf6   :  { %v11557_v31 = vpop.eup %11556  ;;  %v9613_v19 = vmul.f32 %v11555_v16, %v9597_v2 }
0x4bf7   :  { %v9612_v7 = vmul.f32 %v11557_v31, %v9596_v9 }
0x4bf8   :  { %v9621_v57 = vmul.f32 %v9931_v30, %v9613_v19 }
0x4bf9   :  { %v9620_v38 = vmul.f32 %v9931_v30, %v9612_v7 }
0x4bfa   :  { %v9629_v39 = vadd.f32 %v9932_v24, %v9621_v57 }
0x4bfb   :  { %v9628_v4 = vadd.f32 %v9932_v24, %v9620_v38 }
0x4bfc   :  { %v9637_v34 = vsel %vm79_vm0, %v9629_v39, 0.0 }
0x4bfd   :  { %9638 = vadd.xlane.f32.xlu1 %v9637_v34  ;;  %v9634_v63 = vsel %vm79_vm0, %v9628_v4, 0.0 }
0x4bfe   :  { %9635 = vadd.xlane.f32.xlu0 %v9634_v63 }
0x4c8a   :  { %v9639_v13 = vpop.xlane.xlu1 %9638 }
0x4c8b   :  { %v9641_v59 = vmul.f32 0.03125, %v9639_v13  ;;  %v9636_v49 = vpop.xlane.xlu0 %9635 }
0x4c8c   :  { %v9640_v33 = vmul.f32 0.03125, %v9636_v49 }
0x4c8d   :  { %v9643_v47 = vsub.f32 %v9629_v39, %v9641_v59 }
0x4c8e   :  { %v9642_v50 = vsub.f32 %v9628_v4, %v9640_v33 }
0x4c8f   :  { %v9645_v36 = vmul.f32 %v9643_v47, %v9643_v47 }
0x4c90   :  { %v9644_v25 = vmul.f32 %v9642_v50, %v9642_v50 }
0x4c91   :  { %v9649_v32 = vsel %vm79_vm0, %v9645_v36, 0.0 }
0x4c92   :  { %9650 = vadd.xlane.f32.xlu1 %v9649_v32  ;;  %v9646_v52 = vsel %vm79_vm0, %v9644_v25, 0.0 }
0x4c93   :  { %9647 = vadd.xlane.f32.xlu0 %v9646_v52 }
0x4d1f   :  { %v9651_v43 = vpop.xlane.xlu1 %9650 }
0x4d20   :  { %v9653_v26 = vmul.f32 0.03125, %v9651_v43  ;;  %v9648_v0 = vpop.xlane.xlu0 %9647 }
0x4d21   :  { %v9652_v48 = vmul.f32 0.03125, %v9648_v0 }
0x4d22   :  { %v9655_v5 = vadd.f32 1e-05, %v9653_v26 }
0x4d23   :  { %v9654_v37 = vadd.f32 1e-05, %v9652_v48 }
0x4d24   :  { %11558 = vrsqrt.f32 %v9655_v5 }
0x4d25   :  { %11560 = vrsqrt.f32 %v9654_v37 }
0x4d2e   :  { %v11559_v53 = vpop.eup %11558 }
0x4d2f   :  { %v11561_v41 = vpop.eup %11560  ;;  %v9659_v56 = vmul.f32 %v11559_v53, %v9643_v47 }
0x4d30   :  { %v9658_v40 = vmul.f32 %v11561_v41, %v9642_v50 }
0x4d31   :  { %v9667_v15 = vmul.f32 %v9935_v27, %v9659_v56 }
0x4d32   :  { %v9666_v35 = vmul.f32 %v9935_v27, %v9658_v40 }
0x4d33   :  { %v9675_v58 = vadd.f32 %v9936_v54, %v9667_v15 }
0x4d34   :  { %v9674_v1 = vadd.f32 %v9936_v54, %v9666_v35 }
0x4d35   :  { %9677 = vst.msk [vmem:[%s12884_s9 + $0x8] sm:$0xff] %vm79_vm0, %v9675_v58 }
0x4d36   :  { %9676 = vst.msk [vmem:[%s12884_s9] sm:$0xff] %vm79_vm0, %v9674_v1 }
0x4d37   :  { %9682 = vsyncpa [#allocation3], 1 }

</bundles_post_ra>
